<compile_context>
chip_gen: v5e
topology: v5e:2x2
jax: 0.10.0
libtpu: 0.0.40
codegen_flags: <defaults>
</compile_context>

<pallas_src>
import math
from functools import partial

import jax
import jax.numpy as jnp
from jax.experimental import pallas as pl
from jax.experimental.pallas import tpu as pltpu

_NEG = -1e30                       # finite "minus infinity" (NaN-safe masking)
_VMEM_LIMIT = 48 * 1024 * 1024     # fits v7x (64 MiB phys) and v5e/v6e
_COMPUTE_DTYPE = jnp.bfloat16      # MXU operand dtype; accumulation stays f32


# ---------------------------------------------------------------------------
# Elementwise helpers (exact GELU, matching torch nn.GELU default)
# ---------------------------------------------------------------------------

def _erf(x):
    # Abramowitz & Stegun 7.1.26 rational approximation (|err| < 1.5e-7).
    a1, a2, a3, a4, a5 = 0.254829592, -0.284496736, 1.421413741, -1.453152027, 1.061405429
    p = 0.3275911
    sgn = jnp.where(x >= 0.0, 1.0, -1.0)
    ax = jnp.abs(x)
    t = 1.0 / (1.0 + p * ax)
    poly = ((((a5 * t + a4) * t + a3) * t + a2) * t + a1) * t
    return sgn * (1.0 - poly * jnp.exp(-ax * ax))


def _gelu(x):
    return 0.5 * x * (1.0 + _erf(x * (1.0 / math.sqrt(2.0))))


# ---------------------------------------------------------------------------
# Tiled matmul kernel (bias + optional GELU epilogue, optional RHS-transposed)
# ---------------------------------------------------------------------------

def _matmul_kernel(x_ref, w_ref, b_ref, o_ref, acc_ref, *, act, nt, nk):
    @pl.when(pl.program_id(2) == 0)
    def _():
        acc_ref[...] = jnp.zeros_like(acc_ref)

    if nt:  # contract last dims: x (tm, tk) @ w (tn, tk)^T
        acc_ref[...] += jax.lax.dot_general(
            x_ref[...], w_ref[...], (((1,), (1,)), ((), ())),
            preferred_element_type=jnp.float32)
    else:
        acc_ref[...] += jnp.dot(x_ref[...], w_ref[...],
                                preferred_element_type=jnp.float32)

    @pl.when(pl.program_id(2) == nk - 1)
    def _():
        y = acc_ref[...] + b_ref[...]
        if act == "gelu":
            y = _gelu(y)
        o_ref[...] = y.astype(o_ref.dtype)


def _pick_k_tile(K, pref):
    """K tile must divide the (possibly padded) K exactly."""
    if K <= pref:
        return K, K
    for t in (pref, 384, 256, 128):
        if t <= pref and K % t == 0:
            return t, K
    Kp = pl.cdiv(K, pref) * pref
    return pref, Kp


def matmul(x, w, b=None, act="none", nt=False, tm=256, tn=512, tk=512):
    """y = x @ (w.T if nt else w) + b, optional fused exact GELU.

    bf16 MXU operands, f32 accumulator scratch, grid (M, N, K) with K last.
    """
    M, K = x.shape
    if nt:
        N, K2 = w.shape
    else:
        K2, N = w.shape
    assert K == K2

    tk_, Kp = _pick_k_tile(K, tk)
    tm_ = M if M <= tm else tm
    tn_ = N if N <= tn else tn

    xb = x.astype(_COMPUTE_DTYPE)
    wb = w.astype(_COMPUTE_DTYPE)
    if Kp != K:  # zero-pad contracted dim only (rare; M/N use masked edge blocks)
        xb = jnp.pad(xb, ((0, 0), (0, Kp - K)))
        wb = jnp.pad(wb, ((0, 0), (0, Kp - K)) if nt else ((0, Kp - K), (0, 0)))
    if b is None:
        b = jnp.zeros((N,), jnp.float32)
    b2 = b.reshape(1, N).astype(jnp.float32)

    nk = Kp // tk_
    grid = (pl.cdiv(M, tm_), pl.cdiv(N, tn_), nk)
    w_spec = (pl.BlockSpec((tn_, tk_), lambda i, j, k: (j, k)) if nt
              else pl.BlockSpec((tk_, tn_), lambda i, j, k: (k, j)))

    cost = pl.CostEstimate(
        flops=2 * M * N * K,
        transcendentals=M * N if act == "gelu" else 0,
        bytes_accessed=2 * (M * K + N * K) + 4 * (M * N + N))

    return pl.pallas_call(
        partial(_matmul_kernel, act=act, nt=nt, nk=nk),
        out_shape=jax.ShapeDtypeStruct((M, N), jnp.float32),
        grid=grid,
        in_specs=[pl.BlockSpec((tm_, tk_), lambda i, j, k: (i, k)),
                  w_spec,
                  pl.BlockSpec((1, tn_), lambda i, j, k: (0, j))],
        out_specs=pl.BlockSpec((tm_, tn_), lambda i, j, k: (i, j)),
        scratch_shapes=[pltpu.VMEM((tm_, tn_), jnp.float32)],
        compiler_params=pltpu.CompilerParams(
            dimension_semantics=("parallel", "parallel", "arbitrary"),
            vmem_limit_bytes=_VMEM_LIMIT),
        cost_estimate=cost,
    )(xb, wb, b2)


# ---------------------------------------------------------------------------
# Row-tiled LayerNorm
# ---------------------------------------------------------------------------

def _ln_kernel(x_ref, g_ref, b_ref, o_ref, *, eps):
    x = x_ref[...]
    mean = jnp.mean(x, axis=-1, keepdims=True)
    xc = x - mean
    var = jnp.mean(xc * xc, axis=-1, keepdims=True)     # biased var (torch LN)
    o_ref[...] = (xc * jax.lax.rsqrt(var + eps)) * g_ref[...] + b_ref[...]


def layernorm(x, gamma, beta, eps=1e-5, tm=256):
    shp = x.shape
    c = shp[-1]
    x2 = x.reshape(-1, c).astype(jnp.float32)
    M = x2.shape[0]
    tm_ = M if M <= tm else tm
    out = pl.pallas_call(
        partial(_ln_kernel, eps=eps),
        out_shape=jax.ShapeDtypeStruct((M, c), jnp.float32),
        grid=(pl.cdiv(M, tm_),),
        in_specs=[pl.BlockSpec((tm_, c), lambda i: (i, 0)),
                  pl.BlockSpec((1, c), lambda i: (0, 0)),
                  pl.BlockSpec((1, c), lambda i: (0, 0))],
        out_specs=pl.BlockSpec((tm_, c), lambda i: (i, 0)),
        compiler_params=pltpu.CompilerParams(
            dimension_semantics=("parallel",)),
    )(x2, gamma.reshape(1, c).astype(jnp.float32),
      beta.reshape(1, c).astype(jnp.float32))
    return out.reshape(shp)


# ---------------------------------------------------------------------------
# Flash attention (online softmax over kv tiles)
# ---------------------------------------------------------------------------

def _flash_kernel(q_ref, k_ref, v_ref, o_ref, m_sc, l_sc, acc_sc, *,
                  causal, kv_len, kv_partial):
    qi = pl.program_id(1)
    ki = pl.program_id(2)
    tq = q_ref.shape[1]
    tkv = k_ref.shape[1]

    @pl.when(ki == 0)
    def _():
        m_sc[...] = jnp.full_like(m_sc, _NEG)
        l_sc[...] = jnp.zeros_like(l_sc)
        acc_sc[...] = jnp.zeros_like(acc_sc)

    def compute():
        q = q_ref[0]                       # (tq, D)  bf16, pre-scaled by 1/sqrt(D)
        k = k_ref[0]                       # (tkv, D) bf16
        v = v_ref[0]                       # (tkv, D) bf16
        s = jax.lax.dot_general(q, k, (((1,), (1,)), ((), ())),
                                preferred_element_type=jnp.float32)  # (tq, tkv)
        if causal or kv_partial:
            col = ki * tkv + jax.lax.broadcasted_iota(jnp.int32, (tq, tkv), 1)
        if causal:
            # torch SDPA is_causal=True => top-left aligned tril(ones(L, S))
            row = qi * tq + jax.lax.broadcasted_iota(jnp.int32, (tq, tkv), 0)
            s = jnp.where(col <= row, s, _NEG)
        if kv_partial:
            s = jnp.where(col < kv_len, s, _NEG)
            vrow = ki * tkv + jax.lax.broadcasted_iota(jnp.int32, (tkv, 1), 0)
            v = jnp.where(vrow < kv_len, v, jnp.zeros_like(v))
        m_prev = m_sc[...]
        m_new = jnp.maximum(m_prev, jnp.max(s, axis=-1, keepdims=True))
        alpha = jnp.exp(m_prev - m_new)
        p = jnp.exp(s - m_new)
        l_sc[...] = alpha * l_sc[...] + jnp.sum(p, axis=-1, keepdims=True)
        acc_sc[...] = alpha * acc_sc[...] + jnp.dot(
            p.astype(v.dtype), v, preferred_element_type=jnp.float32)
        m_sc[...] = m_new

    if causal:
        # Skip kv tiles strictly above the causal diagonal.
        pl.when(ki * tkv <= qi * tq + tq - 1)(compute)
    else:
        compute()

    @pl.when(ki == pl.num_programs(2) - 1)
    def _():
        o_ref[0] = (acc_sc[...] *
                    pl.reciprocal(l_sc[...], approx=True)).astype(o_ref.dtype)


def sdpa(q, k, v, causal, tq=256, tkv=512):
    """q:(BH,Tq,D), k/v:(BH,Tk,D) in bf16 (q pre-scaled) -> (BH,Tq,D) f32."""
    BH, Tq, D = q.shape
    Tk = k.shape[1]
    tq_ = Tq if Tq <= tq else tq
    tkv_ = Tk if Tk <= tkv else tkv
    cost = pl.CostEstimate(
        flops=4 * BH * Tq * Tk * D,
        transcendentals=BH * Tq * Tk,
        bytes_accessed=2 * BH * (Tq + 2 * Tk) * D + 4 * BH * Tq * D)
    return pl.pallas_call(
        partial(_flash_kernel, causal=causal, kv_len=Tk,
                kv_partial=(Tk % tkv_ != 0)),
        out_shape=jax.ShapeDtypeStruct((BH, Tq, D), jnp.float32),
        grid=(BH, pl.cdiv(Tq, tq_), pl.cdiv(Tk, tkv_)),
        in_specs=[pl.BlockSpec((1, tq_, D), lambda b, i, j: (b, i, 0)),
                  pl.BlockSpec((1, tkv_, D), lambda b, i, j: (b, j, 0)),
                  pl.BlockSpec((1, tkv_, D), lambda b, i, j: (b, j, 0))],
        out_specs=pl.BlockSpec((1, tq_, D), lambda b, i, j: (b, i, 0)),
        scratch_shapes=[pltpu.VMEM((tq_, 1), jnp.float32),
                        pltpu.VMEM((tq_, 1), jnp.float32),
                        pltpu.VMEM((tq_, D), jnp.float32)],
        compiler_params=pltpu.CompilerParams(
            dimension_semantics=("parallel", "parallel", "arbitrary"),
            vmem_limit_bytes=_VMEM_LIMIT),
        cost_estimate=cost,
    )(q, k, v)
    # TODO(synk): with D=64 the output lane width is sub-128 (masked stores);
    # packing two heads per grid step would make stores lane-dense.


# ---------------------------------------------------------------------------
# Conv1d(kernel=3, stride=1, padding=1, bias=False) + GELU as 3 shifted matmuls
# ---------------------------------------------------------------------------

def _conv3_kernel(x_ref, w_ref, o_ref, *, t_len, cin):
    x = x_ref[0]                                   # (T+2, Cin) bf16
    acc = jnp.zeros(o_ref.shape[1:], jnp.float32)  # (T, tn)
    for tap in range(3):                           # unrolled shifted matmuls
        acc = acc + jnp.dot(x[tap:tap + t_len, :],
                            w_ref[pl.ds(tap * cin, cin), :],
                            preferred_element_type=jnp.float32)
    o_ref[0] = _gelu(acc)


def conv1d_k3_gelu(x_btc, w_flat, tn=512):
    B, T, Cin = x_btc.shape
    Cout = w_flat.shape[1]
    xp = jnp.pad(x_btc, ((0, 0), (1, 1), (0, 0))).astype(_COMPUTE_DTYPE)
    wb = w_flat.astype(_COMPUTE_DTYPE)
    tn_ = Cout if Cout <= tn else tn
    return pl.pallas_call(
        partial(_conv3_kernel, t_len=T, cin=Cin),
        out_shape=jax.ShapeDtypeStruct((B, T, Cout), jnp.float32),
        grid=(B, pl.cdiv(Cout, tn_)),
        in_specs=[pl.BlockSpec((1, T + 2, Cin), lambda b, j: (b, 0, 0)),
                  pl.BlockSpec((3 * Cin, tn_), lambda b, j: (0, j))],
        out_specs=pl.BlockSpec((1, T, tn_), lambda b, j: (b, 0, j)),
        compiler_params=pltpu.CompilerParams(
            dimension_semantics=("parallel", "parallel"),
            vmem_limit_bytes=_VMEM_LIMIT),
        cost_estimate=pl.CostEstimate(
            flops=2 * B * T * 3 * Cin * Cout,
            transcendentals=B * T * Cout,
            bytes_accessed=2 * (B * (T + 2) * Cin + 3 * Cin * Cout)
            + 4 * B * T * Cout),
    )(xp, wb)


# ---------------------------------------------------------------------------
# Model (wrappers around the kernels)
# ---------------------------------------------------------------------------

def mha_self(p, n_head, x, causal):
    B, T, C = x.shape
    D = C // n_head
    scale = 1.0 / math.sqrt(D)
    qkv = matmul(x.reshape(B * T, C), p["wqkv"], p["bqkv"])      # fused Q,K,V
    qkv = qkv.reshape(B, T, 3, n_head, D)
    q = (qkv[:, :, 0] * scale).transpose(0, 2, 1, 3).reshape(B * n_head, T, D)
    k = qkv[:, :, 1].transpose(0, 2, 1, 3).reshape(B * n_head, T, D)
    v = qkv[:, :, 2].transpose(0, 2, 1, 3).reshape(B * n_head, T, D)
    y = sdpa(q.astype(_COMPUTE_DTYPE), k.astype(_COMPUTE_DTYPE),
             v.astype(_COMPUTE_DTYPE), causal)
    y = y.reshape(B, n_head, T, D).transpose(0, 2, 1, 3).reshape(B * T, C)
    return matmul(y, p["wo"], p["bo"]).reshape(B, T, C)


def mha_cross(p, n_head, xq, xkv):
    B, Tq, C = xq.shape
    Tk = xkv.shape[1]
    D = C // n_head
    scale = 1.0 / math.sqrt(D)
    q = matmul(xq.reshape(B * Tq, C), p["wq"], p["bq"]).reshape(B, Tq, n_head, D)
    kv = matmul(xkv.reshape(B * Tk, C), p["wkv"], p["bkv"])      # fused K,V
    kv = kv.reshape(B, Tk, 2, n_head, D)
    q = (q * scale).transpose(0, 2, 1, 3).reshape(B * n_head, Tq, D)
    k = kv[:, :, 0].transpose(0, 2, 1, 3).reshape(B * n_head, Tk, D)
    v = kv[:, :, 1].transpose(0, 2, 1, 3).reshape(B * n_head, Tk, D)
    # Reference quirk preserved: cross-attention runs with is_causal=True
    # (top-left aligned tril over Tq x Tk), exactly like torch SDPA.
    y = sdpa(q.astype(_COMPUTE_DTYPE), k.astype(_COMPUTE_DTYPE),
             v.astype(_COMPUTE_DTYPE), causal=True)
    y = y.reshape(B, n_head, Tq, D).transpose(0, 2, 1, 3).reshape(B * Tq, C)
    return matmul(y, p["wo"], p["bo"]).reshape(B, Tq, C)


def mlp(p, x):
    B, T, C = x.shape
    h = matmul(x.reshape(B * T, C), p["mlp_w1"], p["mlp_b1"], act="gelu")
    h = matmul(h, p["mlp_w2"], p["mlp_b2"])
    return h.reshape(B, T, C)


def attention_block(p, n_head, x_q, x_kv, cross):
    # Reproduces the reference exactly: residual taken from ln1(q), and the
    # self-attention uses causal = `cross`.
    x = layernorm(x_q, p["ln1_g"], p["ln1_b"])
    x = x + mha_self(p["attn"], n_head, x, causal=cross)
    if cross:
        xq = layernorm(x, p["ln2_g"], p["ln2_b"])
        kv = layernorm(x_kv, p["ln2_g"], p["ln2_b"])   # ln2(k) == ln2(v): once
        x = x + mha_cross(p["xattn"], n_head, xq, kv)
    x = x + mlp(p, layernorm(x, p["ln3_g"], p["ln3_b"]))
    return x


def encoder_forward(cfg, p, x_ncw):
    x = x_ncw.transpose(0, 2, 1)                       # NCW -> (B, T, n_mels)
    x = conv1d_k3_gelu(x, p["conv1_w"])
    x = conv1d_k3_gelu(x, p["conv2_w"])
    x = x + p["pos"]                                   # sinusoidal pos. emb.
    for blk in p["blocks"]:
        x = attention_block(blk, cfg["n_audio_head"], x, x, cross=False)
    return layernorm(x, p["ln_g"], p["ln_b"])


def decoder_forward(cfg, p, tokens, enc_out):
    B, T = tokens.shape
    emb = p["tok_emb"]                                 # (V, C)
    # TODO(synk): embedding lookup (gather) kept in plain JAX glue.
    x = emb[tokens] + p["pos"][:T]
    for blk in p["blocks"]:
        x = attention_block(blk, cfg["n_text_head"], x, enc_out, cross=True)
    x = layernorm(x, p["ln_g"], p["ln_b"])
    C = x.shape[-1]
    V = emb.shape[0]
    # logits = x @ emb.T without materializing the transpose (vocab-tiled).
    logits = matmul(x.reshape(B * T, C), emb, nt=True)
    return logits.reshape(B, T, V).astype(jnp.float32)


def transformer_forward(cfg, params, enc_input, dec_input):
    enc_out = encoder_forward(cfg, params["enc"], enc_input)
    return decoder_forward(cfg, params["dec"], dec_input, enc_out)


# ---------------------------------------------------------------------------
# Deterministic parameter init (shapes from the PyTorch __init__)
# ---------------------------------------------------------------------------

def sinusoids(length, channels, max_timescale=10000):
    assert channels % 2 == 0
    log_inc = math.log(max_timescale) / (channels // 2 - 1)
    inv = jnp.exp(-log_inc * jnp.arange(channels // 2, dtype=jnp.float32))
    scaled = jnp.arange(length, dtype=jnp.float32)[:, None] * inv[None, :]
    return jnp.concatenate([jnp.sin(scaled), jnp.cos(scaled)], axis=1)


def init_linear(key, din, dout, scale=0.02):
    kw, kb = jax.random.split(key)
    return (scale * jax.random.normal(kw, (din, dout), jnp.float32),
            scale * jax.random.normal(kb, (dout,), jnp.float32))


def init_mha(key, c, fused):
    ks = jax.random.split(key, 4)
    wk, bk = init_linear(ks[0], c, c)
    wq, bq = init_linear(ks[1], c, c)
    wv, bv = init_linear(ks[2], c, c)
    wo, bo = init_linear(ks[3], c, c)
    p = dict(wo=wo, bo=bo)
    if fused == "qkv":      # self-attention: one fused projection weight
        p["wqkv"] = jnp.concatenate([wq, wk, wv], axis=1)
        p["bqkv"] = jnp.concatenate([bq, bk, bv])
    else:                   # cross-attention: q alone, fused k/v
        p["wq"], p["bq"] = wq, bq
        p["wkv"] = jnp.concatenate([wk, wv], axis=1)
        p["bkv"] = jnp.concatenate([bk, bv])
    return p


def init_block(key, c, cross):
    ks = jax.random.split(key, 4)
    w1, b1 = init_linear(ks[1], c, 4 * c)
    w2, b2 = init_linear(ks[2], 4 * c, c)
    p = dict(
        ln1_g=jnp.ones((c,), jnp.float32), ln1_b=jnp.zeros((c,), jnp.float32),
        ln3_g=jnp.ones((c,), jnp.float32), ln3_b=jnp.zeros((c,), jnp.float32),
        attn=init_mha(ks[0], c, fused="qkv"),
        mlp_w1=w1, mlp_b1=b1, mlp_w2=w2, mlp_b2=b2,
    )
    if cross:
        p.update(ln2_g=jnp.ones((c,), jnp.float32),
                 ln2_b=jnp.zeros((c,), jnp.float32),
                 xattn=init_mha(ks[3], c, fused="kv"))
    return p


def init_conv_flat(key, cin, cout, scale=0.02):
    # torch Conv1d weight (Cout, Cin, K=3) -> flattened (K*Cin, Cout)
    w = scale * jax.random.normal(key, (cout, cin, 3), jnp.float32)
    return w.transpose(2, 1, 0).reshape(3 * cin, cout)


def init_params(key, cfg):
    ka, kd = jax.random.split(key)
    # encoder
    c = cfg["n_audio_embd"]
    ks = jax.random.split(ka, 2 + cfg["n_audio_layer"])
    enc = dict(
        conv1_w=init_conv_flat(ks[0], cfg["n_mels"], c),
        conv2_w=init_conv_flat(ks[1], c, c),
        pos=sinusoids(cfg["n_audio_ctx"], c),
        blocks=[init_block(ks[2 + i], c, cross=False)
                for i in range(cfg["n_audio_layer"])],
        ln_g=jnp.ones((c,), jnp.float32), ln_b=jnp.zeros((c,), jnp.float32),
    )
    # decoder
    ct = cfg["n_text_embd"]
    kt = jax.random.split(kd, 1 + cfg["n_text_layer"])
    dec = dict(
        tok_emb=0.02 * jax.random.normal(kt[0], (cfg["vocab_size"], ct), jnp.float32),
        pos=jnp.zeros((cfg["n_text_ctx"], ct), jnp.float32),   # nn.Parameter(zeros)
        blocks=[init_block(kt[1 + i], ct, cross=True)
                for i in range(cfg["n_text_layer"])],
        ln_g=jnp.ones((ct,), jnp.float32), ln_b=jnp.zeros((ct,), jnp.float32),
    )
    return dict(enc=enc, dec=dec)


# ---------------------------------------------------------------------------

if __name__ == "__main__":
    cfg = dict(n_mels=8, n_audio_ctx=16, n_audio_layer=2, n_audio_embd=32, n_audio_head=4,
               vocab_size=64, n_text_ctx=8, n_text_layer=2, n_text_embd=32, n_text_head=4)

    key = jax.random.PRNGKey(0)
    kp, kx, kt = jax.random.split(key, 3)
    params = init_params(kp, cfg)

    B = 2
    enc_input = jax.random.normal(kx, (B, cfg["n_mels"], cfg["n_audio_ctx"]), jnp.float32)
    dec_input = jax.random.randint(kt, (B, cfg["n_text_ctx"]), 0, cfg["vocab_size"],
                                   dtype=jnp.int32)

    fwd = jax.jit(partial(transformer_forward, cfg))
    logits = fwd(params, enc_input, dec_input)
    jax.block_until_ready(logits)

    assert logits.shape == (B, cfg["n_text_ctx"], cfg["vocab_size"])
    assert logits.dtype == jnp.float32
    assert bool(jnp.all(jnp.isfinite(logits)))
    print("KERNEL_OK")
</pallas_src>

<mosaic_0001>
module attributes {stable_mosaic.version = 11 : i64} {
  func.func @_ln_kernel(%arg0: i32, %arg1: memref<16x32xf32, #tpu.memory_space<vmem>>, %arg2: memref<1x32xf32, #tpu.memory_space<vmem>>, %arg3: memref<1x32xf32, #tpu.memory_space<vmem>>, %arg4: memref<16x32xf32, #tpu.memory_space<vmem>>) attributes {dimension_semantics = [#tpu.dimension_semantics<parallel>], iteration_bounds = array<i64: 1>, scalar_prefetch = 0 : i64, scratch_operands = 0 : i64, tpu.core_type = #tpu.core_type<tc>, window_params = [{transform_indices = @transform_0, window_bounds = array<i64: 16, 32>}, {pipeline_mode = #tpu.pipeline_mode<synchronous>, transform_indices = @transform_1, window_bounds = array<i64: 1, 32>}, {pipeline_mode = #tpu.pipeline_mode<synchronous>, transform_indices = @transform_2, window_bounds = array<i64: 1, 32>}, {transform_indices = @transform_3, window_bounds = array<i64: 16, 32>}]} {
    %c0 = arith.constant 0 : index
    %c0_0 = arith.constant 0 : index
    %0 = vector.load %arg1[%c0, %c0_0] : memref<16x32xf32, #tpu.memory_space<vmem>>, vector<16x32xf32>
    %cst = arith.constant dense<0.000000e+00> : vector<16xf32>
    %1 = vector.multi_reduction <add>, %0, %cst [1] : vector<16x32xf32> to vector<16xf32>
    %2 = vector.shape_cast %1 : vector<16xf32> to vector<16x1xf32>
    %cst_1 = arith.constant 3.200000e+01 : f32
    %3 = vector.broadcast %cst_1 : f32 to vector<16x1xf32>
    %4 = arith.divf %2, %3 : vector<16x1xf32>
    %5 = vector.broadcast %4 : vector<16x1xf32> to vector<16x32xf32>
    %6 = arith.subf %0, %5 : vector<16x32xf32>
    %7 = arith.mulf %6, %6 : vector<16x32xf32>
    %cst_2 = arith.constant dense<0.000000e+00> : vector<16xf32>
    %8 = vector.multi_reduction <add>, %7, %cst_2 [1] : vector<16x32xf32> to vector<16xf32>
    %9 = vector.shape_cast %8 : vector<16xf32> to vector<16x1xf32>
    %cst_3 = arith.constant 3.200000e+01 : f32
    %10 = vector.broadcast %cst_3 : f32 to vector<16x1xf32>
    %11 = arith.divf %9, %10 : vector<16x1xf32>
    %cst_4 = arith.constant 9.99999974E-6 : f32
    %12 = vector.broadcast %cst_4 : f32 to vector<16x1xf32>
    %13 = arith.addf %11, %12 : vector<16x1xf32>
    %14 = math.rsqrt %13 : vector<16x1xf32>
    %15 = vector.broadcast %14 : vector<16x1xf32> to vector<16x32xf32>
    %16 = arith.mulf %6, %15 : vector<16x32xf32>
    %c0_5 = arith.constant 0 : index
    %c0_6 = arith.constant 0 : index
    %17 = vector.load %arg2[%c0_5, %c0_6] : memref<1x32xf32, #tpu.memory_space<vmem>>, vector<1x32xf32>
    %18 = vector.broadcast %17 : vector<1x32xf32> to vector<16x32xf32>
    %19 = arith.mulf %16, %18 : vector<16x32xf32>
    %c0_7 = arith.constant 0 : index
    %c0_8 = arith.constant 0 : index
    %20 = vector.load %arg3[%c0_7, %c0_8] : memref<1x32xf32, #tpu.memory_space<vmem>>, vector<1x32xf32>
    %21 = vector.broadcast %20 : vector<1x32xf32> to vector<16x32xf32>
    %22 = arith.addf %19, %21 : vector<16x32xf32>
    %c0_9 = arith.constant 0 : index
    %c0_10 = arith.constant 0 : index
    %23 = vector.load %arg4[%c0_9, %c0_10] : memref<16x32xf32, #tpu.memory_space<vmem>>, vector<16x32xf32>
    tpu.vector_store %arg4[%c0_9, %c0_10], %22 {strides = array<i32>} : memref<16x32xf32, #tpu.memory_space<vmem>>, vector<16x32xf32>,
    return
  }
  func.func @transform_0(%arg0: i32) -> (i32, i32) {
    %c0_i32 = arith.constant 0 : i32
    %c0_i32_0 = arith.constant 0 : i32
    return %arg0, %c0_i32 : i32, i32
  }
  func.func @transform_1(%arg0: i32) -> (i32, i32) {
    %c0_i32 = arith.constant 0 : i32
    %c0_i32_0 = arith.constant 0 : i32
    %c0_i32_1 = arith.constant 0 : i32
    return %c0_i32, %c0_i32_0 : i32, i32
  }
  func.func @transform_2(%arg0: i32) -> (i32, i32) {
    %c0_i32 = arith.constant 0 : i32
    %c0_i32_0 = arith.constant 0 : i32
    %c0_i32_1 = arith.constant 0 : i32
    return %c0_i32, %c0_i32_0 : i32, i32
  }
  func.func @transform_3(%arg0: i32) -> (i32, i32) {
    %c0_i32 = arith.constant 0 : i32
    %c0_i32_0 = arith.constant 0 : i32
    return %arg0, %c0_i32 : i32, i32
  }
}

module attributes {stable_mosaic.version = 11 : i64} {
  func.func @_matmul_kernel(%arg0: i32, %arg1: i32, %arg2: i32, %arg3: memref<16x32xbf16, #tpu.memory_space<vmem>>, %arg4: memref<32x96xbf16, #tpu.memory_space<vmem>>, %arg5: memref<1x96xf32, #tpu.memory_space<vmem>>, %arg6: memref<16x96xf32, #tpu.memory_space<vmem>>, %arg7: memref<16x96xf32, #tpu.memory_space<vmem>>) attributes {dimension_semantics = [#tpu.dimension_semantics<parallel>, #tpu.dimension_semantics<parallel>, #tpu.dimension_semantics<arbitrary>], iteration_bounds = array<i64: 1, 1, 1>, scalar_prefetch = 0 : i64, scratch_operands = 1 : i64, tpu.core_type = #tpu.core_type<tc>, window_params = [{transform_indices = @transform_0, window_bounds = array<i64: 16, 32>}, {transform_indices = @transform_1, window_bounds = array<i64: 32, 96>}, {transform_indices = @transform_2, window_bounds = array<i64: 1, 96>}, {transform_indices = @transform_3, window_bounds = array<i64: 16, 96>}]} {
    %c0_i32 = arith.constant 0 : i32
    %0 = arith.cmpi eq, %arg2, %c0_i32 : i32
    %1 = arith.extui %0 : i1 to i32
    %c0_i32_0 = arith.constant 0 : i32
    %2 = arith.cmpi ne, %1, %c0_i32_0 : i32
    scf.if %2 {
      %cst_10 = arith.constant 0.000000e+00 : f32
      %12 = vector.broadcast %cst_10 : f32 to vector<16x96xf32>
      %c0_11 = arith.constant 0 : index
      %c0_12 = arith.constant 0 : index
      %13 = vector.load %arg7[%c0_11, %c0_12] : memref<16x96xf32, #tpu.memory_space<vmem>>, vector<16x96xf32>
      tpu.vector_store %arg7[%c0_11, %c0_12], %12 {strides = array<i32>} : memref<16x96xf32, #tpu.memory_space<vmem>>, vector<16x96xf32>,
    } else {
    }
    %c0 = arith.constant 0 : index
    %c0_1 = arith.constant 0 : index
    %3 = vector.load %arg7[%c0, %c0_1] : memref<16x96xf32, #tpu.memory_space<vmem>>, vector<16x96xf32>
    %c0_2 = arith.constant 0 : index
    %c0_3 = arith.constant 0 : index
    %4 = vector.load %arg3[%c0_2, %c0_3] : memref<16x32xbf16, #tpu.memory_space<vmem>>, vector<16x32xbf16>
    %c0_4 = arith.constant 0 : index
    %c0_5 = arith.constant 0 : index
    %5 = vector.load %arg4[%c0_4, %c0_5] : memref<32x96xbf16, #tpu.memory_space<vmem>>, vector<32x96xbf16>
    %cst = arith.constant dense<0.000000e+00> : vector<16x96xf32>
    %6 = tpu.matmul %4, %5, %cst {dimension_numbers = #tpu.dot_dimension_numbers<[1], [0], [0], [1], [0, 0, 1, 1], [], []>} : vector<16x32xbf16>, vector<32x96xbf16>, vector<16x96xf32> -> vector<16x96xf32>
    %7 = arith.addf %3, %6 : vector<16x96xf32>
    %c0_6 = arith.constant 0 : index
    %c0_7 = arith.constant 0 : index
    %8 = vector.load %arg7[%c0_6, %c0_7] : memref<16x96xf32, #tpu.memory_space<vmem>>, vector<16x96xf32>
    tpu.vector_store %arg7[%c0_6, %c0_7], %7 {strides = array<i32>} : memref<16x96xf32, #tpu.memory_space<vmem>>, vector<16x96xf32>,
    %c0_i32_8 = arith.constant 0 : i32
    %9 = arith.cmpi eq, %arg2, %c0_i32_8 : i32
    %10 = arith.extui %9 : i1 to i32
    %c0_i32_9 = arith.constant 0 : i32
    %11 = arith.cmpi ne, %10, %c0_i32_9 : i32
    scf.if %11 {
      %c0_10 = arith.constant 0 : index
      %c0_11 = arith.constant 0 : index
      %12 = vector.load %arg7[%c0_10, %c0_11] : memref<16x96xf32, #tpu.memory_space<vmem>>, vector<16x96xf32>
      %c0_12 = arith.constant 0 : index
      %c0_13 = arith.constant 0 : index
      %13 = vector.load %arg5[%c0_12, %c0_13] : memref<1x96xf32, #tpu.memory_space<vmem>>, vector<1x96xf32>
      %14 = vector.broadcast %13 : vector<1x96xf32> to vector<16x96xf32>
      %15 = arith.addf %12, %14 : vector<16x96xf32>
      %c0_14 = arith.constant 0 : index
      %c0_15 = arith.constant 0 : index
      %16 = vector.load %arg6[%c0_14, %c0_15] : memref<16x96xf32, #tpu.memory_space<vmem>>, vector<16x96xf32>
      tpu.vector_store %arg6[%c0_14, %c0_15], %15 {strides = array<i32>} : memref<16x96xf32, #tpu.memory_space<vmem>>, vector<16x96xf32>,
    } else {
    }
    return
  }
  func.func @transform_0(%arg0: i32, %arg1: i32, %arg2: i32) -> (i32, i32) {
    %c0_i32 = arith.constant 0 : i32
    return %arg0, %arg2 : i32, i32
  }
  func.func @transform_1(%arg0: i32, %arg1: i32, %arg2: i32) -> (i32, i32) {
    %c0_i32 = arith.constant 0 : i32
    return %arg2, %arg1 : i32, i32
  }
  func.func @transform_2(%arg0: i32, %arg1: i32, %arg2: i32) -> (i32, i32) {
    %c0_i32 = arith.constant 0 : i32
    %c0_i32_0 = arith.constant 0 : i32
    return %c0_i32, %arg1 : i32, i32
  }
  func.func @transform_3(%arg0: i32, %arg1: i32, %arg2: i32) -> (i32, i32) {
    %c0_i32 = arith.constant 0 : i32
    return %arg0, %arg1 : i32, i32
  }
}

module attributes {stable_mosaic.version = 11 : i64} {
  func.func @_flash_kernel(%arg0: i32, %arg1: i32, %arg2: i32, %arg3: memref<1x8x8xbf16, #tpu.memory_space<vmem>>, %arg4: memref<1x8x8xbf16, #tpu.memory_space<vmem>>, %arg5: memref<1x8x8xbf16, #tpu.memory_space<vmem>>, %arg6: memref<1x8x8xf32, #tpu.memory_space<vmem>>, %arg7: memref<8x1xf32, #tpu.memory_space<vmem>>, %arg8: memref<8x1xf32, #tpu.memory_space<vmem>>, %arg9: memref<8x8xf32, #tpu.memory_space<vmem>>) attributes {dimension_semantics = [#tpu.dimension_semantics<parallel>, #tpu.dimension_semantics<parallel>, #tpu.dimension_semantics<arbitrary>], iteration_bounds = array<i64: 8, 1, 1>, scalar_prefetch = 0 : i64, scratch_operands = 3 : i64, tpu.core_type = #tpu.core_type<tc>, window_params = [{transform_indices = @transform_0, window_bounds = array<i64: 1, 8, 8>}, {transform_indices = @transform_1, window_bounds = array<i64: 1, 8, 8>}, {transform_indices = @transform_2, window_bounds = array<i64: 1, 8, 8>}, {transform_indices = @transform_3, window_bounds = array<i64: 1, 8, 8>}]} {
    %c0_i32 = arith.constant 0 : i32
    %0 = arith.cmpi eq, %arg2, %c0_i32 : i32
    %1 = arith.extui %0 : i1 to i32
    %c0_i32_0 = arith.constant 0 : i32
    %2 = arith.cmpi ne, %1, %c0_i32_0 : i32
    scf.if %2 {
      %cst = arith.constant -1.000000e+30 : f32
      %13 = vector.broadcast %cst : f32 to vector<8x1xf32>
      %c0 = arith.constant 0 : index
      %c0_6 = arith.constant 0 : index
      %14 = vector.load %arg7[%c0, %c0_6] : memref<8x1xf32, #tpu.memory_space<vmem>>, vector<8x1xf32>
      tpu.vector_store %arg7[%c0, %c0_6], %13 {strides = array<i32>} : memref<8x1xf32, #tpu.memory_space<vmem>>, vector<8x1xf32>,
      %cst_7 = arith.constant 0.000000e+00 : f32
      %15 = vector.broadcast %cst_7 : f32 to vector<8x1xf32>
      %c0_8 = arith.constant 0 : index
      %c0_9 = arith.constant 0 : index
      %16 = vector.load %arg8[%c0_8, %c0_9] : memref<8x1xf32, #tpu.memory_space<vmem>>, vector<8x1xf32>
      tpu.vector_store %arg8[%c0_8, %c0_9], %15 {strides = array<i32>} : memref<8x1xf32, #tpu.memory_space<vmem>>, vector<8x1xf32>,
      %cst_10 = arith.constant 0.000000e+00 : f32
      %17 = vector.broadcast %cst_10 : f32 to vector<8x8xf32>
      %c0_11 = arith.constant 0 : index
      %c0_12 = arith.constant 0 : index
      %18 = vector.load %arg9[%c0_11, %c0_12] : memref<8x8xf32, #tpu.memory_space<vmem>>, vector<8x8xf32>
      tpu.vector_store %arg9[%c0_11, %c0_12], %17 {strides = array<i32>} : memref<8x8xf32, #tpu.memory_space<vmem>>, vector<8x8xf32>,
    } else {
    }
    %c8_i32 = arith.constant 8 : i32
    %3 = arith.muli %arg2, %c8_i32 : i32
    %c8_i32_1 = arith.constant 8 : i32
    %4 = arith.muli %arg1, %c8_i32_1 : i32
    %c8_i32_2 = arith.constant 8 : i32
    %5 = arith.addi %4, %c8_i32_2 : i32
    %c1_i32 = arith.constant 1 : i32
    %6 = arith.subi %5, %c1_i32 : i32
    %7 = arith.cmpi sle, %3, %6 : i32
    %8 = arith.extui %7 : i1 to i32
    %c0_i32_3 = arith.constant 0 : i32
    %9 = arith.cmpi ne, %8, %c0_i32_3 : i32
    scf.if %9 {
      %c0 = arith.constant 0 : index
      %c0_6 = arith.constant 0 : index
      %c0_7 = arith.constant 0 : index
      %13 = vector.load %arg3[%c0, %c0_6, %c0_7] : memref<1x8x8xbf16, #tpu.memory_space<vmem>>, vector<1x8x8xbf16>
      %14 = vector.shape_cast %13 : vector<1x8x8xbf16> to vector<8x8xbf16>
      %c0_8 = arith.constant 0 : index
      %c0_9 = arith.constant 0 : index
      %c0_10 = arith.constant 0 : index
      %15 = vector.load %arg4[%c0_8, %c0_9, %c0_10] : memref<1x8x8xbf16, #tpu.memory_space<vmem>>, vector<1x8x8xbf16>
      %16 = vector.shape_cast %15 : vector<1x8x8xbf16> to vector<8x8xbf16>
      %c0_11 = arith.constant 0 : index
      %c0_12 = arith.constant 0 : index
      %c0_13 = arith.constant 0 : index
      %17 = vector.load %arg5[%c0_11, %c0_12, %c0_13] : memref<1x8x8xbf16, #tpu.memory_space<vmem>>, vector<1x8x8xbf16>
      %18 = vector.shape_cast %17 : vector<1x8x8xbf16> to vector<8x8xbf16>
      %cst = arith.constant dense<0.000000e+00> : vector<8x8xf32>
      %19 = tpu.matmul %14, %16, %cst {dimension_numbers = #tpu.dot_dimension_numbers<[1], [1], [0], [0], [0, 0, 1, 0], [], []>} : vector<8x8xbf16>, vector<8x8xbf16>, vector<8x8xf32> -> vector<8x8xf32>
      %c8_i32_14 = arith.constant 8 : i32
      %20 = arith.muli %arg2, %c8_i32_14 : i32
      %21 = tpu.iota {dimensions = array<i32: 1>} : vector<8x8xi32>
      %22 = vector.broadcast %20 : i32 to vector<8x8xi32>
      %23 = arith.addi %22, %21 : vector<8x8xi32>
      %c8_i32_15 = arith.constant 8 : i32
      %24 = arith.muli %arg1, %c8_i32_15 : i32
      %25 = tpu.iota {dimensions = array<i32: 0>} : vector<8x8xi32>
      %26 = vector.broadcast %24 : i32 to vector<8x8xi32>
      %27 = arith.addi %26, %25 : vector<8x8xi32>
      %28 = arith.cmpi sle, %23, %27 : vector<8x8xi32>
      %cst_16 = arith.constant -1.000000e+30 : f32
      %29 = vector.broadcast %cst_16 : f32 to vector<8x8xf32>
      %30 = arith.select %28, %19, %29 : vector<8x8xi1>, vector<8x8xf32>
      %c0_17 = arith.constant 0 : index
      %c0_18 = arith.constant 0 : index
      %31 = vector.load %arg7[%c0_17, %c0_18] : memref<8x1xf32, #tpu.memory_space<vmem>>, vector<8x1xf32>
      %cst_19 = arith.constant dense<0xFF800000> : vector<8xf32>
      %32 = vector.multi_reduction <maximumf>, %30, %cst_19 [1] : vector<8x8xf32> to vector<8xf32>
      %33 = vector.shape_cast %32 : vector<8xf32> to vector<8x1xf32>
      %34 = arith.maximumf %31, %33 : vector<8x1xf32>
      %35 = arith.subf %31, %34 : vector<8x1xf32>
      %36 = math.exp %35 : vector<8x1xf32>
      %37 = vector.broadcast %34 : vector<8x1xf32> to vector<8x8xf32>
      %38 = arith.subf %30, %37 : vector<8x8xf32>
      %39 = math.exp %38 : vector<8x8xf32>
      %c0_20 = arith.constant 0 : index
      %c0_21 = arith.constant 0 : index
      %40 = vector.load %arg8[%c0_20, %c0_21] : memref<8x1xf32, #tpu.memory_space<vmem>>, vector<8x1xf32>
      %41 = arith.mulf %36, %40 : vector<8x1xf32>
      %cst_22 = arith.constant dense<0.000000e+00> : vector<8xf32>
      %42 = vector.multi_reduction <add>, %39, %cst_22 [1] : vector<8x8xf32> to vector<8xf32>
      %43 = vector.shape_cast %42 : vector<8xf32> to vector<8x1xf32>
      %44 = arith.addf %41, %43 : vector<8x1xf32>
      %c0_23 = arith.constant 0 : index
      %c0_24 = arith.constant 0 : index
      %45 = vector.load %arg8[%c0_23, %c0_24] : memref<8x1xf32, #tpu.memory_space<vmem>>, vector<8x1xf32>
      tpu.vector_store %arg8[%c0_23, %c0_24], %44 {strides = array<i32>} : memref<8x1xf32, #tpu.memory_space<vmem>>, vector<8x1xf32>,
      %c0_25 = arith.constant 0 : index
      %c0_26 = arith.constant 0 : index
      %46 = vector.load %arg9[%c0_25, %c0_26] : memref<8x8xf32, #tpu.memory_space<vmem>>, vector<8x8xf32>
      %47 = vector.broadcast %36 : vector<8x1xf32> to vector<8x8xf32>
      %48 = arith.mulf %47, %46 : vector<8x8xf32>
      %49 = arith.truncf %39 : vector<8x8xf32> to vector<8x8xbf16>
      %cst_27 = arith.constant dense<0.000000e+00> : vector<8x8xf32>
      %50 = tpu.matmul %49, %18, %cst_27 {dimension_numbers = #tpu.dot_dimension_numbers<[1], [0], [0], [1], [0, 0, 1, 1], [], []>} : vector<8x8xbf16>, vector<8x8xbf16>, vector<8x8xf32> -> vector<8x8xf32>
      %51 = arith.addf %48, %50 : vector<8x8xf32>
      %c0_28 = arith.constant 0 : index
      %c0_29 = arith.constant 0 : index
      %52 = vector.load %arg9[%c0_28, %c0_29] : memref<8x8xf32, #tpu.memory_space<vmem>>, vector<8x8xf32>
      tpu.vector_store %arg9[%c0_28, %c0_29], %51 {strides = array<i32>} : memref<8x8xf32, #tpu.memory_space<vmem>>, vector<8x8xf32>,
      %c0_30 = arith.constant 0 : index
      %c0_31 = arith.constant 0 : index
      %53 = vector.load %arg7[%c0_30, %c0_31] : memref<8x1xf32, #tpu.memory_space<vmem>>, vector<8x1xf32>
      tpu.vector_store %arg7[%c0_30, %c0_31], %34 {strides = array<i32>} : memref<8x1xf32, #tpu.memory_space<vmem>>, vector<8x1xf32>,
    } else {
    }
    %c0_i32_4 = arith.constant 0 : i32
    %10 = arith.cmpi eq, %arg2, %c0_i32_4 : i32
    %11 = arith.extui %10 : i1 to i32
    %c0_i32_5 = arith.constant 0 : i32
    %12 = arith.cmpi ne, %11, %c0_i32_5 : i32
    scf.if %12 {
      %c0 = arith.constant 0 : index
      %c0_6 = arith.constant 0 : index
      %13 = vector.load %arg9[%c0, %c0_6] : memref<8x8xf32, #tpu.memory_space<vmem>>, vector<8x8xf32>
      %c0_7 = arith.constant 0 : index
      %c0_8 = arith.constant 0 : index
      %14 = vector.load %arg8[%c0_7, %c0_8] : memref<8x1xf32, #tpu.memory_space<vmem>>, vector<8x1xf32>
      %15 = tpu.reciprocal %14 {approx = true} : vector<8x1xf32> -> vector<8x1xf32>
      %16 = vector.broadcast %15 : vector<8x1xf32> to vector<8x8xf32>
      %17 = arith.mulf %13, %16 : vector<8x8xf32>
      %c0_9 = arith.constant 0 : index
      %c0_10 = arith.constant 0 : index
      %c0_11 = arith.constant 0 : index
      %18 = vector.load %arg6[%c0_9, %c0_10, %c0_11] : memref<1x8x8xf32, #tpu.memory_space<vmem>>, vector<1x8x8xf32>
      %19 = vector.shape_cast %18 : vector<1x8x8xf32> to vector<8x8xf32>
      %20 = vector.shape_cast %17 : vector<8x8xf32> to vector<1x8x8xf32>
      tpu.vector_store %arg6[%c0_9, %c0_10, %c0_11], %20 {strides = array<i32>} : memref<1x8x8xf32, #tpu.memory_space<vmem>>, vector<1x8x8xf32>,
    } else {
    }
    return
  }
  func.func @transform_0(%arg0: i32, %arg1: i32, %arg2: i32) -> (i32, i32, i32) {
    %c0_i32 = arith.constant 0 : i32
    %c0_i32_0 = arith.constant 0 : i32
    return %arg0, %arg1, %c0_i32 : i32, i32, i32
  }
  func.func @transform_1(%arg0: i32, %arg1: i32, %arg2: i32) -> (i32, i32, i32) {
    %c0_i32 = arith.constant 0 : i32
    %c0_i32_0 = arith.constant 0 : i32
    return %arg0, %arg2, %c0_i32 : i32, i32, i32
  }
  func.func @transform_2(%arg0: i32, %arg1: i32, %arg2: i32) -> (i32, i32, i32) {
    %c0_i32 = arith.constant 0 : i32
    %c0_i32_0 = arith.constant 0 : i32
    return %arg0, %arg2, %c0_i32 : i32, i32, i32
  }
  func.func @transform_3(%arg0: i32, %arg1: i32, %arg2: i32) -> (i32, i32, i32) {
    %c0_i32 = arith.constant 0 : i32
    %c0_i32_0 = arith.constant 0 : i32
    return %arg0, %arg1, %c0_i32 : i32, i32, i32
  }
}

module attributes {stable_mosaic.version = 11 : i64} {
  func.func @_matmul_kernel(%arg0: i32, %arg1: i32, %arg2: i32, %arg3: memref<16x32xbf16, #tpu.memory_space<vmem>>, %arg4: memref<32x32xbf16, #tpu.memory_space<vmem>>, %arg5: memref<1x32xf32, #tpu.memory_space<vmem>>, %arg6: memref<16x32xf32, #tpu.memory_space<vmem>>, %arg7: memref<16x32xf32, #tpu.memory_space<vmem>>) attributes {dimension_semantics = [#tpu.dimension_semantics<parallel>, #tpu.dimension_semantics<parallel>, #tpu.dimension_semantics<arbitrary>], iteration_bounds = array<i64: 1, 1, 1>, scalar_prefetch = 0 : i64, scratch_operands = 1 : i64, tpu.core_type = #tpu.core_type<tc>, window_params = [{transform_indices = @transform_0, window_bounds = array<i64: 16, 32>}, {transform_indices = @transform_1, window_bounds = array<i64: 32, 32>}, {transform_indices = @transform_2, window_bounds = array<i64: 1, 32>}, {transform_indices = @transform_3, window_bounds = array<i64: 16, 32>}]} {
    %c0_i32 = arith.constant 0 : i32
    %0 = arith.cmpi eq, %arg2, %c0_i32 : i32
    %1 = arith.extui %0 : i1 to i32
    %c0_i32_0 = arith.constant 0 : i32
    %2 = arith.cmpi ne, %1, %c0_i32_0 : i32
    scf.if %2 {
      %cst_10 = arith.constant 0.000000e+00 : f32
      %12 = vector.broadcast %cst_10 : f32 to vector<16x32xf32>
      %c0_11 = arith.constant 0 : index
      %c0_12 = arith.constant 0 : index
      %13 = vector.load %arg7[%c0_11, %c0_12] : memref<16x32xf32, #tpu.memory_space<vmem>>, vector<16x32xf32>
      tpu.vector_store %arg7[%c0_11, %c0_12], %12 {strides = array<i32>} : memref<16x32xf32, #tpu.memory_space<vmem>>, vector<16x32xf32>,
    } else {
    }
    %c0 = arith.constant 0 : index
    %c0_1 = arith.constant 0 : index
    %3 = vector.load %arg7[%c0, %c0_1] : memref<16x32xf32, #tpu.memory_space<vmem>>, vector<16x32xf32>
    %c0_2 = arith.constant 0 : index
    %c0_3 = arith.constant 0 : index
    %4 = vector.load %arg3[%c0_2, %c0_3] : memref<16x32xbf16, #tpu.memory_space<vmem>>, vector<16x32xbf16>
    %c0_4 = arith.constant 0 : index
    %c0_5 = arith.constant 0 : index
    %5 = vector.load %arg4[%c0_4, %c0_5] : memref<32x32xbf16, #tpu.memory_space<vmem>>, vector<32x32xbf16>
    %cst = arith.constant dense<0.000000e+00> : vector<16x32xf32>
    %6 = tpu.matmul %4, %5, %cst {dimension_numbers = #tpu.dot_dimension_numbers<[1], [0], [0], [1], [0, 0, 1, 1], [], []>} : vector<16x32xbf16>, vector<32x32xbf16>, vector<16x32xf32> -> vector<16x32xf32>
    %7 = arith.addf %3, %6 : vector<16x32xf32>
    %c0_6 = arith.constant 0 : index
    %c0_7 = arith.constant 0 : index
    %8 = vector.load %arg7[%c0_6, %c0_7] : memref<16x32xf32, #tpu.memory_space<vmem>>, vector<16x32xf32>
    tpu.vector_store %arg7[%c0_6, %c0_7], %7 {strides = array<i32>} : memref<16x32xf32, #tpu.memory_space<vmem>>, vector<16x32xf32>,
    %c0_i32_8 = arith.constant 0 : i32
    %9 = arith.cmpi eq, %arg2, %c0_i32_8 : i32
    %10 = arith.extui %9 : i1 to i32
    %c0_i32_9 = arith.constant 0 : i32
    %11 = arith.cmpi ne, %10, %c0_i32_9 : i32
    scf.if %11 {
      %c0_10 = arith.constant 0 : index
      %c0_11 = arith.constant 0 : index
      %12 = vector.load %arg7[%c0_10, %c0_11] : memref<16x32xf32, #tpu.memory_space<vmem>>, vector<16x32xf32>
      %c0_12 = arith.constant 0 : index
      %c0_13 = arith.constant 0 : index
      %13 = vector.load %arg5[%c0_12, %c0_13] : memref<1x32xf32, #tpu.memory_space<vmem>>, vector<1x32xf32>
      %14 = vector.broadcast %13 : vector<1x32xf32> to vector<16x32xf32>
      %15 = arith.addf %12, %14 : vector<16x32xf32>
      %c0_14 = arith.constant 0 : index
      %c0_15 = arith.constant 0 : index
      %16 = vector.load %arg6[%c0_14, %c0_15] : memref<16x32xf32, #tpu.memory_space<vmem>>, vector<16x32xf32>
      tpu.vector_store %arg6[%c0_14, %c0_15], %15 {strides = array<i32>} : memref<16x32xf32, #tpu.memory_space<vmem>>, vector<16x32xf32>,
    } else {
    }
    return
  }
  func.func @transform_0(%arg0: i32, %arg1: i32, %arg2: i32) -> (i32, i32) {
    %c0_i32 = arith.constant 0 : i32
    return %arg0, %arg2 : i32, i32
  }
  func.func @transform_1(%arg0: i32, %arg1: i32, %arg2: i32) -> (i32, i32) {
    %c0_i32 = arith.constant 0 : i32
    return %arg2, %arg1 : i32, i32
  }
  func.func @transform_2(%arg0: i32, %arg1: i32, %arg2: i32) -> (i32, i32) {
    %c0_i32 = arith.constant 0 : i32
    %c0_i32_0 = arith.constant 0 : i32
    return %c0_i32, %arg1 : i32, i32
  }
  func.func @transform_3(%arg0: i32, %arg1: i32, %arg2: i32) -> (i32, i32) {
    %c0_i32 = arith.constant 0 : i32
    return %arg0, %arg1 : i32, i32
  }
}

module attributes {stable_mosaic.version = 11 : i64} {
  func.func @_conv3_kernel(%arg0: i32, %arg1: i32, %arg2: memref<1x18x8xbf16, #tpu.memory_space<vmem>>, %arg3: memref<24x32xbf16, #tpu.memory_space<vmem>>, %arg4: memref<1x16x32xf32, #tpu.memory_space<vmem>>) attributes {dimension_semantics = [#tpu.dimension_semantics<parallel>, #tpu.dimension_semantics<parallel>], iteration_bounds = array<i64: 2, 1>, scalar_prefetch = 0 : i64, scratch_operands = 0 : i64, tpu.core_type = #tpu.core_type<tc>, window_params = [{transform_indices = @transform_0, window_bounds = array<i64: 1, 18, 8>}, {transform_indices = @transform_1, window_bounds = array<i64: 24, 32>}, {transform_indices = @transform_2, window_bounds = array<i64: 1, 16, 32>}]} {
    %c0 = arith.constant 0 : index
    %c0_0 = arith.constant 0 : index
    %c0_1 = arith.constant 0 : index
    %0 = vector.load %arg2[%c0, %c0_0, %c0_1] : memref<1x18x8xbf16, #tpu.memory_space<vmem>>, vector<1x18x8xbf16>
    %1 = vector.shape_cast %0 : vector<1x18x8xbf16> to vector<18x8xbf16>
    %cst = arith.constant 0.000000e+00 : f32
    %2 = vector.broadcast %cst : f32 to vector<16x32xf32>
    %3 = vector.extract_strided_slice %1 {offsets = [0, 0], sizes = [16, 8], strides = [1, 1]} : vector<18x8xbf16> to vector<16x8xbf16>
    %c0_2 = arith.constant 0 : index
    %c0_3 = arith.constant 0 : index
    %4 = vector.load %arg3[%c0_2, %c0_3] : memref<24x32xbf16, #tpu.memory_space<vmem>>, vector<8x32xbf16>
    %cst_4 = arith.constant dense<0.000000e+00> : vector<16x32xf32>
    %5 = tpu.matmul %3, %4, %cst_4 {dimension_numbers = #tpu.dot_dimension_numbers<[1], [0], [0], [1], [0, 0, 1, 1], [], []>} : vector<16x8xbf16>, vector<8x32xbf16>, vector<16x32xf32> -> vector<16x32xf32>
    %6 = arith.addf %2, %5 : vector<16x32xf32>
    %7 = vector.extract_strided_slice %1 {offsets = [1, 0], sizes = [16, 8], strides = [1, 1]} : vector<18x8xbf16> to vector<16x8xbf16>
    %c8 = arith.constant 8 : index
    %c0_5 = arith.constant 0 : index
    %8 = vector.load %arg3[%c8, %c0_5] : memref<24x32xbf16, #tpu.memory_space<vmem>>, vector<8x32xbf16>
    %cst_6 = arith.constant dense<0.000000e+00> : vector<16x32xf32>
    %9 = tpu.matmul %7, %8, %cst_6 {dimension_numbers = #tpu.dot_dimension_numbers<[1], [0], [0], [1], [0, 0, 1, 1], [], []>} : vector<16x8xbf16>, vector<8x32xbf16>, vector<16x32xf32> -> vector<16x32xf32>
    %10 = arith.addf %6, %9 : vector<16x32xf32>
    %11 = vector.extract_strided_slice %1 {offsets = [2, 0], sizes = [16, 8], strides = [1, 1]} : vector<18x8xbf16> to vector<16x8xbf16>
    %c16 = arith.constant 16 : index
    %c0_7 = arith.constant 0 : index
    %12 = vector.load %arg3[%c16, %c0_7] : memref<24x32xbf16, #tpu.memory_space<vmem>>, vector<8x32xbf16>
    %cst_8 = arith.constant dense<0.000000e+00> : vector<16x32xf32>
    %13 = tpu.matmul %11, %12, %cst_8 {dimension_numbers = #tpu.dot_dimension_numbers<[1], [0], [0], [1], [0, 0, 1, 1], [], []>} : vector<16x8xbf16>, vector<8x32xbf16>, vector<16x32xf32> -> vector<16x32xf32>
    %14 = arith.addf %10, %13 : vector<16x32xf32>
    %cst_9 = arith.constant 5.000000e-01 : f32
    %15 = vector.broadcast %cst_9 : f32 to vector<16x32xf32>
    %16 = arith.mulf %15, %14 : vector<16x32xf32>
    %cst_10 = arith.constant 0.707106769 : f32
    %17 = vector.broadcast %cst_10 : f32 to vector<16x32xf32>
    %18 = arith.mulf %14, %17 : vector<16x32xf32>
    %cst_11 = arith.constant 0.000000e+00 : f32
    %19 = vector.broadcast %cst_11 : f32 to vector<16x32xf32>
    %20 = arith.cmpf oge, %18, %19 : vector<16x32xf32>
    %cst_12 = arith.constant 1.000000e+00 : f32
    %cst_13 = arith.constant -1.000000e+00 : f32
    %21 = vector.broadcast %cst_12 : f32 to vector<16x32xf32>
    %22 = vector.broadcast %cst_13 : f32 to vector<16x32xf32>
    %23 = arith.select %20, %21, %22 : vector<16x32xi1>, vector<16x32xf32>
    %24 = math.absf %18 : vector<16x32xf32>
    %cst_14 = arith.constant 0.327591091 : f32
    %25 = vector.broadcast %cst_14 : f32 to vector<16x32xf32>
    %26 = arith.mulf %25, %24 : vector<16x32xf32>
    %cst_15 = arith.constant 1.000000e+00 : f32
    %27 = vector.broadcast %cst_15 : f32 to vector<16x32xf32>
    %28 = arith.addf %27, %26 : vector<16x32xf32>
    %cst_16 = arith.constant 1.000000e+00 : f32
    %29 = vector.broadcast %cst_16 : f32 to vector<16x32xf32>
    %30 = arith.divf %29, %28 : vector<16x32xf32>
    %cst_17 = arith.constant 1.06140542 : f32
    %31 = vector.broadcast %cst_17 : f32 to vector<16x32xf32>
    %32 = arith.mulf %31, %30 : vector<16x32xf32>
    %cst_18 = arith.constant -1.45315206 : f32
    %33 = vector.broadcast %cst_18 : f32 to vector<16x32xf32>
    %34 = arith.addf %32, %33 : vector<16x32xf32>
    %35 = arith.mulf %34, %30 : vector<16x32xf32>
    %cst_19 = arith.constant 1.42141378 : f32
    %36 = vector.broadcast %cst_19 : f32 to vector<16x32xf32>
    %37 = arith.addf %35, %36 : vector<16x32xf32>
    %38 = arith.mulf %37, %30 : vector<16x32xf32>
    %cst_20 = arith.constant -0.284496725 : f32
    %39 = vector.broadcast %cst_20 : f32 to vector<16x32xf32>
    %40 = arith.addf %38, %39 : vector<16x32xf32>
    %41 = arith.mulf %40, %30 : vector<16x32xf32>
    %cst_21 = arith.constant 0.254829586 : f32
    %42 = vector.broadcast %cst_21 : f32 to vector<16x32xf32>
    %43 = arith.addf %41, %42 : vector<16x32xf32>
    %44 = arith.mulf %43, %30 : vector<16x32xf32>
    %cst_22 = arith.constant 0.000000e+00 : f32
    %45 = vector.broadcast %cst_22 : f32 to vector<16x32xf32>
    %46 = arith.subf %45, %24 : vector<16x32xf32>
    %47 = arith.mulf %46, %24 : vector<16x32xf32>
    %48 = math.exp %47 : vector<16x32xf32>
    %49 = arith.mulf %44, %48 : vector<16x32xf32>
    %cst_23 = arith.constant 1.000000e+00 : f32
    %50 = vector.broadcast %cst_23 : f32 to vector<16x32xf32>
    %51 = arith.subf %50, %49 : vector<16x32xf32>
    %52 = arith.mulf %23, %51 : vector<16x32xf32>
    %cst_24 = arith.constant 1.000000e+00 : f32
    %53 = vector.broadcast %cst_24 : f32 to vector<16x32xf32>
    %54 = arith.addf %53, %52 : vector<16x32xf32>
    %55 = arith.mulf %16, %54 : vector<16x32xf32>
    %c0_25 = arith.constant 0 : index
    %c0_26 = arith.constant 0 : index
    %c0_27 = arith.constant 0 : index
    %56 = vector.load %arg4[%c0_25, %c0_26, %c0_27] : memref<1x16x32xf32, #tpu.memory_space<vmem>>, vector<1x16x32xf32>
    %57 = vector.shape_cast %56 : vector<1x16x32xf32> to vector<16x32xf32>
    %58 = vector.shape_cast %55 : vector<16x32xf32> to vector<1x16x32xf32>
    tpu.vector_store %arg4[%c0_25, %c0_26, %c0_27], %58 {strides = array<i32>} : memref<1x16x32xf32, #tpu.memory_space<vmem>>, vector<1x16x32xf32>,
    return
  }
  func.func @transform_0(%arg0: i32, %arg1: i32) -> (i32, i32, i32) {
    %c0_i32 = arith.constant 0 : i32
    %c0_i32_0 = arith.constant 0 : i32
    %c0_i32_1 = arith.constant 0 : i32
    return %arg0, %c0_i32, %c0_i32_0 : i32, i32, i32
  }
  func.func @transform_1(%arg0: i32, %arg1: i32) -> (i32, i32) {
    %c0_i32 = arith.constant 0 : i32
    %c0_i32_0 = arith.constant 0 : i32
    return %c0_i32, %arg1 : i32, i32
  }
  func.func @transform_2(%arg0: i32, %arg1: i32) -> (i32, i32, i32) {
    %c0_i32 = arith.constant 0 : i32
    %c0_i32_0 = arith.constant 0 : i32
    return %arg0, %c0_i32, %arg1 : i32, i32, i32
  }
}

module attributes {stable_mosaic.version = 11 : i64} {
  func.func @_conv3_kernel(%arg0: i32, %arg1: i32, %arg2: memref<1x18x32xbf16, #tpu.memory_space<vmem>>, %arg3: memref<96x32xbf16, #tpu.memory_space<vmem>>, %arg4: memref<1x16x32xf32, #tpu.memory_space<vmem>>) attributes {dimension_semantics = [#tpu.dimension_semantics<parallel>, #tpu.dimension_semantics<parallel>], iteration_bounds = array<i64: 2, 1>, scalar_prefetch = 0 : i64, scratch_operands = 0 : i64, tpu.core_type = #tpu.core_type<tc>, window_params = [{transform_indices = @transform_0, window_bounds = array<i64: 1, 18, 32>}, {transform_indices = @transform_1, window_bounds = array<i64: 96, 32>}, {transform_indices = @transform_2, window_bounds = array<i64: 1, 16, 32>}]} {
    %c0 = arith.constant 0 : index
    %c0_0 = arith.constant 0 : index
    %c0_1 = arith.constant 0 : index
    %0 = vector.load %arg2[%c0, %c0_0, %c0_1] : memref<1x18x32xbf16, #tpu.memory_space<vmem>>, vector<1x18x32xbf16>
    %1 = vector.shape_cast %0 : vector<1x18x32xbf16> to vector<18x32xbf16>
    %cst = arith.constant 0.000000e+00 : f32
    %2 = vector.broadcast %cst : f32 to vector<16x32xf32>
    %3 = vector.extract_strided_slice %1 {offsets = [0, 0], sizes = [16, 32], strides = [1, 1]} : vector<18x32xbf16> to vector<16x32xbf16>
    %c0_2 = arith.constant 0 : index
    %c0_3 = arith.constant 0 : index
    %4 = vector.load %arg3[%c0_2, %c0_3] : memref<96x32xbf16, #tpu.memory_space<vmem>>, vector<32x32xbf16>
    %cst_4 = arith.constant dense<0.000000e+00> : vector<16x32xf32>
    %5 = tpu.matmul %3, %4, %cst_4 {dimension_numbers = #tpu.dot_dimension_numbers<[1], [0], [0], [1], [0, 0, 1, 1], [], []>} : vector<16x32xbf16>, vector<32x32xbf16>, vector<16x32xf32> -> vector<16x32xf32>
    %6 = arith.addf %2, %5 : vector<16x32xf32>
    %7 = vector.extract_strided_slice %1 {offsets = [1, 0], sizes = [16, 32], strides = [1, 1]} : vector<18x32xbf16> to vector<16x32xbf16>
    %c32 = arith.constant 32 : index
    %c0_5 = arith.constant 0 : index
    %8 = vector.load %arg3[%c32, %c0_5] : memref<96x32xbf16, #tpu.memory_space<vmem>>, vector<32x32xbf16>
    %cst_6 = arith.constant dense<0.000000e+00> : vector<16x32xf32>
    %9 = tpu.matmul %7, %8, %cst_6 {dimension_numbers = #tpu.dot_dimension_numbers<[1], [0], [0], [1], [0, 0, 1, 1], [], []>} : vector<16x32xbf16>, vector<32x32xbf16>, vector<16x32xf32> -> vector<16x32xf32>
    %10 = arith.addf %6, %9 : vector<16x32xf32>
    %11 = vector.extract_strided_slice %1 {offsets = [2, 0], sizes = [16, 32], strides = [1, 1]} : vector<18x32xbf16> to vector<16x32xbf16>
    %c64 = arith.constant 64 : index
    %c0_7 = arith.constant 0 : index
    %12 = vector.load %arg3[%c64, %c0_7] : memref<96x32xbf16, #tpu.memory_space<vmem>>, vector<32x32xbf16>
    %cst_8 = arith.constant dense<0.000000e+00> : vector<16x32xf32>
    %13 = tpu.matmul %11, %12, %cst_8 {dimension_numbers = #tpu.dot_dimension_numbers<[1], [0], [0], [1], [0, 0, 1, 1], [], []>} : vector<16x32xbf16>, vector<32x32xbf16>, vector<16x32xf32> -> vector<16x32xf32>
    %14 = arith.addf %10, %13 : vector<16x32xf32>
    %cst_9 = arith.constant 5.000000e-01 : f32
    %15 = vector.broadcast %cst_9 : f32 to vector<16x32xf32>
    %16 = arith.mulf %15, %14 : vector<16x32xf32>
    %cst_10 = arith.constant 0.707106769 : f32
    %17 = vector.broadcast %cst_10 : f32 to vector<16x32xf32>
    %18 = arith.mulf %14, %17 : vector<16x32xf32>
    %cst_11 = arith.constant 0.000000e+00 : f32
    %19 = vector.broadcast %cst_11 : f32 to vector<16x32xf32>
    %20 = arith.cmpf oge, %18, %19 : vector<16x32xf32>
    %cst_12 = arith.constant 1.000000e+00 : f32
    %cst_13 = arith.constant -1.000000e+00 : f32
    %21 = vector.broadcast %cst_12 : f32 to vector<16x32xf32>
    %22 = vector.broadcast %cst_13 : f32 to vector<16x32xf32>
    %23 = arith.select %20, %21, %22 : vector<16x32xi1>, vector<16x32xf32>
    %24 = math.absf %18 : vector<16x32xf32>
    %cst_14 = arith.constant 0.327591091 : f32
    %25 = vector.broadcast %cst_14 : f32 to vector<16x32xf32>
    %26 = arith.mulf %25, %24 : vector<16x32xf32>
    %cst_15 = arith.constant 1.000000e+00 : f32
    %27 = vector.broadcast %cst_15 : f32 to vector<16x32xf32>
    %28 = arith.addf %27, %26 : vector<16x32xf32>
    %cst_16 = arith.constant 1.000000e+00 : f32
    %29 = vector.broadcast %cst_16 : f32 to vector<16x32xf32>
    %30 = arith.divf %29, %28 : vector<16x32xf32>
    %cst_17 = arith.constant 1.06140542 : f32
    %31 = vector.broadcast %cst_17 : f32 to vector<16x32xf32>
    %32 = arith.mulf %31, %30 : vector<16x32xf32>
    %cst_18 = arith.constant -1.45315206 : f32
    %33 = vector.broadcast %cst_18 : f32 to vector<16x32xf32>
    %34 = arith.addf %32, %33 : vector<16x32xf32>
    %35 = arith.mulf %34, %30 : vector<16x32xf32>
    %cst_19 = arith.constant 1.42141378 : f32
    %36 = vector.broadcast %cst_19 : f32 to vector<16x32xf32>
    %37 = arith.addf %35, %36 : vector<16x32xf32>
    %38 = arith.mulf %37, %30 : vector<16x32xf32>
    %cst_20 = arith.constant -0.284496725 : f32
    %39 = vector.broadcast %cst_20 : f32 to vector<16x32xf32>
    %40 = arith.addf %38, %39 : vector<16x32xf32>
    %41 = arith.mulf %40, %30 : vector<16x32xf32>
    %cst_21 = arith.constant 0.254829586 : f32
    %42 = vector.broadcast %cst_21 : f32 to vector<16x32xf32>
    %43 = arith.addf %41, %42 : vector<16x32xf32>
    %44 = arith.mulf %43, %30 : vector<16x32xf32>
    %cst_22 = arith.constant 0.000000e+00 : f32
    %45 = vector.broadcast %cst_22 : f32 to vector<16x32xf32>
    %46 = arith.subf %45, %24 : vector<16x32xf32>
    %47 = arith.mulf %46, %24 : vector<16x32xf32>
    %48 = math.exp %47 : vector<16x32xf32>
    %49 = arith.mulf %44, %48 : vector<16x32xf32>
    %cst_23 = arith.constant 1.000000e+00 : f32
    %50 = vector.broadcast %cst_23 : f32 to vector<16x32xf32>
    %51 = arith.subf %50, %49 : vector<16x32xf32>
    %52 = arith.mulf %23, %51 : vector<16x32xf32>
    %cst_24 = arith.constant 1.000000e+00 : f32
    %53 = vector.broadcast %cst_24 : f32 to vector<16x32xf32>
    %54 = arith.addf %53, %52 : vector<16x32xf32>
    %55 = arith.mulf %16, %54 : vector<16x32xf32>
    %c0_25 = arith.constant 0 : index
    %c0_26 = arith.constant 0 : index
    %c0_27 = arith.constant 0 : index
    %56 = vector.load %arg4[%c0_25, %c0_26, %c0_27] : memref<1x16x32xf32, #tpu.memory_space<vmem>>, vector<1x16x32xf32>
    %57 = vector.shape_cast %56 : vector<1x16x32xf32> to vector<16x32xf32>
    %58 = vector.shape_cast %55 : vector<16x32xf32> to vector<1x16x32xf32>
    tpu.vector_store %arg4[%c0_25, %c0_26, %c0_27], %58 {strides = array<i32>} : memref<1x16x32xf32, #tpu.memory_space<vmem>>, vector<1x16x32xf32>,
    return
  }
  func.func @transform_0(%arg0: i32, %arg1: i32) -> (i32, i32, i32) {
    %c0_i32 = arith.constant 0 : i32
    %c0_i32_0 = arith.constant 0 : i32
    %c0_i32_1 = arith.constant 0 : i32
    return %arg0, %c0_i32, %c0_i32_0 : i32, i32, i32
  }
  func.func @transform_1(%arg0: i32, %arg1: i32) -> (i32, i32) {
    %c0_i32 = arith.constant 0 : i32
    %c0_i32_0 = arith.constant 0 : i32
    return %c0_i32, %arg1 : i32, i32
  }
  func.func @transform_2(%arg0: i32, %arg1: i32) -> (i32, i32, i32) {
    %c0_i32 = arith.constant 0 : i32
    %c0_i32_0 = arith.constant 0 : i32
    return %arg0, %c0_i32, %arg1 : i32, i32, i32
  }
}

module attributes {stable_mosaic.version = 11 : i64} {
  func.func @_ln_kernel(%arg0: i32, %arg1: memref<32x32xf32, #tpu.memory_space<vmem>>, %arg2: memref<1x32xf32, #tpu.memory_space<vmem>>, %arg3: memref<1x32xf32, #tpu.memory_space<vmem>>, %arg4: memref<32x32xf32, #tpu.memory_space<vmem>>) attributes {dimension_semantics = [#tpu.dimension_semantics<parallel>], iteration_bounds = array<i64: 1>, scalar_prefetch = 0 : i64, scratch_operands = 0 : i64, tpu.core_type = #tpu.core_type<tc>, window_params = [{transform_indices = @transform_0, window_bounds = array<i64: 32, 32>}, {pipeline_mode = #tpu.pipeline_mode<synchronous>, transform_indices = @transform_1, window_bounds = array<i64: 1, 32>}, {pipeline_mode = #tpu.pipeline_mode<synchronous>, transform_indices = @transform_2, window_bounds = array<i64: 1, 32>}, {transform_indices = @transform_3, window_bounds = array<i64: 32, 32>}]} {
    %c0 = arith.constant 0 : index
    %c0_0 = arith.constant 0 : index
    %0 = vector.load %arg1[%c0, %c0_0] : memref<32x32xf32, #tpu.memory_space<vmem>>, vector<32x32xf32>
    %cst = arith.constant dense<0.000000e+00> : vector<32xf32>
    %1 = vector.multi_reduction <add>, %0, %cst [1] : vector<32x32xf32> to vector<32xf32>
    %2 = vector.shape_cast %1 : vector<32xf32> to vector<32x1xf32>
    %cst_1 = arith.constant 3.200000e+01 : f32
    %3 = vector.broadcast %cst_1 : f32 to vector<32x1xf32>
    %4 = arith.divf %2, %3 : vector<32x1xf32>
    %5 = vector.broadcast %4 : vector<32x1xf32> to vector<32x32xf32>
    %6 = arith.subf %0, %5 : vector<32x32xf32>
    %7 = arith.mulf %6, %6 : vector<32x32xf32>
    %cst_2 = arith.constant dense<0.000000e+00> : vector<32xf32>
    %8 = vector.multi_reduction <add>, %7, %cst_2 [1] : vector<32x32xf32> to vector<32xf32>
    %9 = vector.shape_cast %8 : vector<32xf32> to vector<32x1xf32>
    %cst_3 = arith.constant 3.200000e+01 : f32
    %10 = vector.broadcast %cst_3 : f32 to vector<32x1xf32>
    %11 = arith.divf %9, %10 : vector<32x1xf32>
    %cst_4 = arith.constant 9.99999974E-6 : f32
    %12 = vector.broadcast %cst_4 : f32 to vector<32x1xf32>
    %13 = arith.addf %11, %12 : vector<32x1xf32>
    %14 = math.rsqrt %13 : vector<32x1xf32>
    %15 = vector.broadcast %14 : vector<32x1xf32> to vector<32x32xf32>
    %16 = arith.mulf %6, %15 : vector<32x32xf32>
    %c0_5 = arith.constant 0 : index
    %c0_6 = arith.constant 0 : index
    %17 = vector.load %arg2[%c0_5, %c0_6] : memref<1x32xf32, #tpu.memory_space<vmem>>, vector<1x32xf32>
    %18 = vector.broadcast %17 : vector<1x32xf32> to vector<32x32xf32>
    %19 = arith.mulf %16, %18 : vector<32x32xf32>
    %c0_7 = arith.constant 0 : index
    %c0_8 = arith.constant 0 : index
    %20 = vector.load %arg3[%c0_7, %c0_8] : memref<1x32xf32, #tpu.memory_space<vmem>>, vector<1x32xf32>
    %21 = vector.broadcast %20 : vector<1x32xf32> to vector<32x32xf32>
    %22 = arith.addf %19, %21 : vector<32x32xf32>
    %c0_9 = arith.constant 0 : index
    %c0_10 = arith.constant 0 : index
    %23 = vector.load %arg4[%c0_9, %c0_10] : memref<32x32xf32, #tpu.memory_space<vmem>>, vector<32x32xf32>
    tpu.vector_store %arg4[%c0_9, %c0_10], %22 {strides = array<i32>} : memref<32x32xf32, #tpu.memory_space<vmem>>, vector<32x32xf32>,
    return
  }
  func.func @transform_0(%arg0: i32) -> (i32, i32) {
    %c0_i32 = arith.constant 0 : i32
    %c0_i32_0 = arith.constant 0 : i32
    return %arg0, %c0_i32 : i32, i32
  }
  func.func @transform_1(%arg0: i32) -> (i32, i32) {
    %c0_i32 = arith.constant 0 : i32
    %c0_i32_0 = arith.constant 0 : i32
    %c0_i32_1 = arith.constant 0 : i32
    return %c0_i32, %c0_i32_0 : i32, i32
  }
  func.func @transform_2(%arg0: i32) -> (i32, i32) {
    %c0_i32 = arith.constant 0 : i32
    %c0_i32_0 = arith.constant 0 : i32
    %c0_i32_1 = arith.constant 0 : i32
    return %c0_i32, %c0_i32_0 : i32, i32
  }
  func.func @transform_3(%arg0: i32) -> (i32, i32) {
    %c0_i32 = arith.constant 0 : i32
    %c0_i32_0 = arith.constant 0 : i32
    return %arg0, %c0_i32 : i32, i32
  }
}

module attributes {stable_mosaic.version = 11 : i64} {
  func.func @_matmul_kernel(%arg0: i32, %arg1: i32, %arg2: i32, %arg3: memref<32x32xbf16, #tpu.memory_space<vmem>>, %arg4: memref<32x96xbf16, #tpu.memory_space<vmem>>, %arg5: memref<1x96xf32, #tpu.memory_space<vmem>>, %arg6: memref<32x96xf32, #tpu.memory_space<vmem>>, %arg7: memref<32x96xf32, #tpu.memory_space<vmem>>) attributes {dimension_semantics = [#tpu.dimension_semantics<parallel>, #tpu.dimension_semantics<parallel>, #tpu.dimension_semantics<arbitrary>], iteration_bounds = array<i64: 1, 1, 1>, scalar_prefetch = 0 : i64, scratch_operands = 1 : i64, tpu.core_type = #tpu.core_type<tc>, window_params = [{transform_indices = @transform_0, window_bounds = array<i64: 32, 32>}, {transform_indices = @transform_1, window_bounds = array<i64: 32, 96>}, {transform_indices = @transform_2, window_bounds = array<i64: 1, 96>}, {transform_indices = @transform_3, window_bounds = array<i64: 32, 96>}]} {
    %c0_i32 = arith.constant 0 : i32
    %0 = arith.cmpi eq, %arg2, %c0_i32 : i32
    %1 = arith.extui %0 : i1 to i32
    %c0_i32_0 = arith.constant 0 : i32
    %2 = arith.cmpi ne, %1, %c0_i32_0 : i32
    scf.if %2 {
      %cst_10 = arith.constant 0.000000e+00 : f32
      %12 = vector.broadcast %cst_10 : f32 to vector<32x96xf32>
      %c0_11 = arith.constant 0 : index
      %c0_12 = arith.constant 0 : index
      %13 = vector.load %arg7[%c0_11, %c0_12] : memref<32x96xf32, #tpu.memory_space<vmem>>, vector<32x96xf32>
      tpu.vector_store %arg7[%c0_11, %c0_12], %12 {strides = array<i32>} : memref<32x96xf32, #tpu.memory_space<vmem>>, vector<32x96xf32>,
    } else {
    }
    %c0 = arith.constant 0 : index
    %c0_1 = arith.constant 0 : index
    %3 = vector.load %arg7[%c0, %c0_1] : memref<32x96xf32, #tpu.memory_space<vmem>>, vector<32x96xf32>
    %c0_2 = arith.constant 0 : index
    %c0_3 = arith.constant 0 : index
    %4 = vector.load %arg3[%c0_2, %c0_3] : memref<32x32xbf16, #tpu.memory_space<vmem>>, vector<32x32xbf16>
    %c0_4 = arith.constant 0 : index
    %c0_5 = arith.constant 0 : index
    %5 = vector.load %arg4[%c0_4, %c0_5] : memref<32x96xbf16, #tpu.memory_space<vmem>>, vector<32x96xbf16>
    %cst = arith.constant dense<0.000000e+00> : vector<32x96xf32>
    %6 = tpu.matmul %4, %5, %cst {dimension_numbers = #tpu.dot_dimension_numbers<[1], [0], [0], [1], [0, 0, 1, 1], [], []>} : vector<32x32xbf16>, vector<32x96xbf16>, vector<32x96xf32> -> vector<32x96xf32>
    %7 = arith.addf %3, %6 : vector<32x96xf32>
    %c0_6 = arith.constant 0 : index
    %c0_7 = arith.constant 0 : index
    %8 = vector.load %arg7[%c0_6, %c0_7] : memref<32x96xf32, #tpu.memory_space<vmem>>, vector<32x96xf32>
    tpu.vector_store %arg7[%c0_6, %c0_7], %7 {strides = array<i32>} : memref<32x96xf32, #tpu.memory_space<vmem>>, vector<32x96xf32>,
    %c0_i32_8 = arith.constant 0 : i32
    %9 = arith.cmpi eq, %arg2, %c0_i32_8 : i32
    %10 = arith.extui %9 : i1 to i32
    %c0_i32_9 = arith.constant 0 : i32
    %11 = arith.cmpi ne, %10, %c0_i32_9 : i32
    scf.if %11 {
      %c0_10 = arith.constant 0 : index
      %c0_11 = arith.constant 0 : index
      %12 = vector.load %arg7[%c0_10, %c0_11] : memref<32x96xf32, #tpu.memory_space<vmem>>, vector<32x96xf32>
      %c0_12 = arith.constant 0 : index
      %c0_13 = arith.constant 0 : index
      %13 = vector.load %arg5[%c0_12, %c0_13] : memref<1x96xf32, #tpu.memory_space<vmem>>, vector<1x96xf32>
      %14 = vector.broadcast %13 : vector<1x96xf32> to vector<32x96xf32>
      %15 = arith.addf %12, %14 : vector<32x96xf32>
      %c0_14 = arith.constant 0 : index
      %c0_15 = arith.constant 0 : index
      %16 = vector.load %arg6[%c0_14, %c0_15] : memref<32x96xf32, #tpu.memory_space<vmem>>, vector<32x96xf32>
      tpu.vector_store %arg6[%c0_14, %c0_15], %15 {strides = array<i32>} : memref<32x96xf32, #tpu.memory_space<vmem>>, vector<32x96xf32>,
    } else {
    }
    return
  }
  func.func @transform_0(%arg0: i32, %arg1: i32, %arg2: i32) -> (i32, i32) {
    %c0_i32 = arith.constant 0 : i32
    return %arg0, %arg2 : i32, i32
  }
  func.func @transform_1(%arg0: i32, %arg1: i32, %arg2: i32) -> (i32, i32) {
    %c0_i32 = arith.constant 0 : i32
    return %arg2, %arg1 : i32, i32
  }
  func.func @transform_2(%arg0: i32, %arg1: i32, %arg2: i32) -> (i32, i32) {
    %c0_i32 = arith.constant 0 : i32
    %c0_i32_0 = arith.constant 0 : i32
    return %c0_i32, %arg1 : i32, i32
  }
  func.func @transform_3(%arg0: i32, %arg1: i32, %arg2: i32) -> (i32, i32) {
    %c0_i32 = arith.constant 0 : i32
    return %arg0, %arg1 : i32, i32
  }
}

module attributes {stable_mosaic.version = 11 : i64} {
  func.func @_flash_kernel(%arg0: i32, %arg1: i32, %arg2: i32, %arg3: memref<1x16x8xbf16, #tpu.memory_space<vmem>>, %arg4: memref<1x16x8xbf16, #tpu.memory_space<vmem>>, %arg5: memref<1x16x8xbf16, #tpu.memory_space<vmem>>, %arg6: memref<1x16x8xf32, #tpu.memory_space<vmem>>, %arg7: memref<16x1xf32, #tpu.memory_space<vmem>>, %arg8: memref<16x1xf32, #tpu.memory_space<vmem>>, %arg9: memref<16x8xf32, #tpu.memory_space<vmem>>) attributes {dimension_semantics = [#tpu.dimension_semantics<parallel>, #tpu.dimension_semantics<parallel>, #tpu.dimension_semantics<arbitrary>], iteration_bounds = array<i64: 8, 1, 1>, scalar_prefetch = 0 : i64, scratch_operands = 3 : i64, tpu.core_type = #tpu.core_type<tc>, window_params = [{transform_indices = @transform_0, window_bounds = array<i64: 1, 16, 8>}, {transform_indices = @transform_1, window_bounds = array<i64: 1, 16, 8>}, {transform_indices = @transform_2, window_bounds = array<i64: 1, 16, 8>}, {transform_indices = @transform_3, window_bounds = array<i64: 1, 16, 8>}]} {
    %c0_i32 = arith.constant 0 : i32
    %0 = arith.cmpi eq, %arg2, %c0_i32 : i32
    %1 = arith.extui %0 : i1 to i32
    %c0_i32_0 = arith.constant 0 : i32
    %2 = arith.cmpi ne, %1, %c0_i32_0 : i32
    scf.if %2 {
      %cst_26 = arith.constant -1.000000e+30 : f32
      %36 = vector.broadcast %cst_26 : f32 to vector<16x1xf32>
      %c0_27 = arith.constant 0 : index
      %c0_28 = arith.constant 0 : index
      %37 = vector.load %arg7[%c0_27, %c0_28] : memref<16x1xf32, #tpu.memory_space<vmem>>, vector<16x1xf32>
      tpu.vector_store %arg7[%c0_27, %c0_28], %36 {strides = array<i32>} : memref<16x1xf32, #tpu.memory_space<vmem>>, vector<16x1xf32>,
      %cst_29 = arith.constant 0.000000e+00 : f32
      %38 = vector.broadcast %cst_29 : f32 to vector<16x1xf32>
      %c0_30 = arith.constant 0 : index
      %c0_31 = arith.constant 0 : index
      %39 = vector.load %arg8[%c0_30, %c0_31] : memref<16x1xf32, #tpu.memory_space<vmem>>, vector<16x1xf32>
      tpu.vector_store %arg8[%c0_30, %c0_31], %38 {strides = array<i32>} : memref<16x1xf32, #tpu.memory_space<vmem>>, vector<16x1xf32>,
      %cst_32 = arith.constant 0.000000e+00 : f32
      %40 = vector.broadcast %cst_32 : f32 to vector<16x8xf32>
      %c0_33 = arith.constant 0 : index
      %c0_34 = arith.constant 0 : index
      %41 = vector.load %arg9[%c0_33, %c0_34] : memref<16x8xf32, #tpu.memory_space<vmem>>, vector<16x8xf32>
      tpu.vector_store %arg9[%c0_33, %c0_34], %40 {strides = array<i32>} : memref<16x8xf32, #tpu.memory_space<vmem>>, vector<16x8xf32>,
    } else {
    }
    %c0 = arith.constant 0 : index
    %c0_1 = arith.constant 0 : index
    %c0_2 = arith.constant 0 : index
    %3 = vector.load %arg3[%c0, %c0_1, %c0_2] : memref<1x16x8xbf16, #tpu.memory_space<vmem>>, vector<1x16x8xbf16>
    %4 = vector.shape_cast %3 : vector<1x16x8xbf16> to vector<16x8xbf16>
    %c0_3 = arith.constant 0 : index
    %c0_4 = arith.constant 0 : index
    %c0_5 = arith.constant 0 : index
    %5 = vector.load %arg4[%c0_3, %c0_4, %c0_5] : memref<1x16x8xbf16, #tpu.memory_space<vmem>>, vector<1x16x8xbf16>
    %6 = vector.shape_cast %5 : vector<1x16x8xbf16> to vector<16x8xbf16>
    %c0_6 = arith.constant 0 : index
    %c0_7 = arith.constant 0 : index
    %c0_8 = arith.constant 0 : index
    %7 = vector.load %arg5[%c0_6, %c0_7, %c0_8] : memref<1x16x8xbf16, #tpu.memory_space<vmem>>, vector<1x16x8xbf16>
    %8 = vector.shape_cast %7 : vector<1x16x8xbf16> to vector<16x8xbf16>
    %cst = arith.constant dense<0.000000e+00> : vector<16x16xf32>
    %9 = tpu.matmul %4, %6, %cst {dimension_numbers = #tpu.dot_dimension_numbers<[1], [1], [0], [0], [0, 0, 1, 0], [], []>} : vector<16x8xbf16>, vector<16x8xbf16>, vector<16x16xf32> -> vector<16x16xf32>
    %c0_9 = arith.constant 0 : index
    %c0_10 = arith.constant 0 : index
    %10 = vector.load %arg7[%c0_9, %c0_10] : memref<16x1xf32, #tpu.memory_space<vmem>>, vector<16x1xf32>
    %cst_11 = arith.constant dense<0xFF800000> : vector<16xf32>
    %11 = vector.multi_reduction <maximumf>, %9, %cst_11 [1] : vector<16x16xf32> to vector<16xf32>
    %12 = vector.shape_cast %11 : vector<16xf32> to vector<16x1xf32>
    %13 = arith.maximumf %10, %12 : vector<16x1xf32>
    %14 = arith.subf %10, %13 : vector<16x1xf32>
    %15 = math.exp %14 : vector<16x1xf32>
    %16 = vector.broadcast %13 : vector<16x1xf32> to vector<16x16xf32>
    %17 = arith.subf %9, %16 : vector<16x16xf32>
    %18 = math.exp %17 : vector<16x16xf32>
    %c0_12 = arith.constant 0 : index
    %c0_13 = arith.constant 0 : index
    %19 = vector.load %arg8[%c0_12, %c0_13] : memref<16x1xf32, #tpu.memory_space<vmem>>, vector<16x1xf32>
    %20 = arith.mulf %15, %19 : vector<16x1xf32>
    %cst_14 = arith.constant dense<0.000000e+00> : vector<16xf32>
    %21 = vector.multi_reduction <add>, %18, %cst_14 [1] : vector<16x16xf32> to vector<16xf32>
    %22 = vector.shape_cast %21 : vector<16xf32> to vector<16x1xf32>
    %23 = arith.addf %20, %22 : vector<16x1xf32>
    %c0_15 = arith.constant 0 : index
    %c0_16 = arith.constant 0 : index
    %24 = vector.load %arg8[%c0_15, %c0_16] : memref<16x1xf32, #tpu.memory_space<vmem>>, vector<16x1xf32>
    tpu.vector_store %arg8[%c0_15, %c0_16], %23 {strides = array<i32>} : memref<16x1xf32, #tpu.memory_space<vmem>>, vector<16x1xf32>,
    %c0_17 = arith.constant 0 : index
    %c0_18 = arith.constant 0 : index
    %25 = vector.load %arg9[%c0_17, %c0_18] : memref<16x8xf32, #tpu.memory_space<vmem>>, vector<16x8xf32>
    %26 = vector.broadcast %15 : vector<16x1xf32> to vector<16x8xf32>
    %27 = arith.mulf %26, %25 : vector<16x8xf32>
    %28 = arith.truncf %18 : vector<16x16xf32> to vector<16x16xbf16>
    %cst_19 = arith.constant dense<0.000000e+00> : vector<16x8xf32>
    %29 = tpu.matmul %28, %8, %cst_19 {dimension_numbers = #tpu.dot_dimension_numbers<[1], [0], [0], [1], [0, 0, 1, 1], [], []>} : vector<16x16xbf16>, vector<16x8xbf16>, vector<16x8xf32> -> vector<16x8xf32>
    %30 = arith.addf %27, %29 : vector<16x8xf32>
    %c0_20 = arith.constant 0 : index
    %c0_21 = arith.constant 0 : index
    %31 = vector.load %arg9[%c0_20, %c0_21] : memref<16x8xf32, #tpu.memory_space<vmem>>, vector<16x8xf32>
    tpu.vector_store %arg9[%c0_20, %c0_21], %30 {strides = array<i32>} : memref<16x8xf32, #tpu.memory_space<vmem>>, vector<16x8xf32>,
    %c0_22 = arith.constant 0 : index
    %c0_23 = arith.constant 0 : index
    %32 = vector.load %arg7[%c0_22, %c0_23] : memref<16x1xf32, #tpu.memory_space<vmem>>, vector<16x1xf32>
    tpu.vector_store %arg7[%c0_22, %c0_23], %13 {strides = array<i32>} : memref<16x1xf32, #tpu.memory_space<vmem>>, vector<16x1xf32>,
    %c0_i32_24 = arith.constant 0 : i32
    %33 = arith.cmpi eq, %arg2, %c0_i32_24 : i32
    %34 = arith.extui %33 : i1 to i32
    %c0_i32_25 = arith.constant 0 : i32
    %35 = arith.cmpi ne, %34, %c0_i32_25 : i32
    scf.if %35 {
      %c0_26 = arith.constant 0 : index
      %c0_27 = arith.constant 0 : index
      %36 = vector.load %arg9[%c0_26, %c0_27] : memref<16x8xf32, #tpu.memory_space<vmem>>, vector<16x8xf32>
      %c0_28 = arith.constant 0 : index
      %c0_29 = arith.constant 0 : index
      %37 = vector.load %arg8[%c0_28, %c0_29] : memref<16x1xf32, #tpu.memory_space<vmem>>, vector<16x1xf32>
      %38 = tpu.reciprocal %37 {approx = true} : vector<16x1xf32> -> vector<16x1xf32>
      %39 = vector.broadcast %38 : vector<16x1xf32> to vector<16x8xf32>
      %40 = arith.mulf %36, %39 : vector<16x8xf32>
      %c0_30 = arith.constant 0 : index
      %c0_31 = arith.constant 0 : index
      %c0_32 = arith.constant 0 : index
      %41 = vector.load %arg6[%c0_30, %c0_31, %c0_32] : memref<1x16x8xf32, #tpu.memory_space<vmem>>, vector<1x16x8xf32>
      %42 = vector.shape_cast %41 : vector<1x16x8xf32> to vector<16x8xf32>
      %43 = vector.shape_cast %40 : vector<16x8xf32> to vector<1x16x8xf32>
      tpu.vector_store %arg6[%c0_30, %c0_31, %c0_32], %43 {strides = array<i32>} : memref<1x16x8xf32, #tpu.memory_space<vmem>>, vector<1x16x8xf32>,
    } else {
    }
    return
  }
  func.func @transform_0(%arg0: i32, %arg1: i32, %arg2: i32) -> (i32, i32, i32) {
    %c0_i32 = arith.constant 0 : i32
    %c0_i32_0 = arith.constant 0 : i32
    return %arg0, %arg1, %c0_i32 : i32, i32, i32
  }
  func.func @transform_1(%arg0: i32, %arg1: i32, %arg2: i32) -> (i32, i32, i32) {
    %c0_i32 = arith.constant 0 : i32
    %c0_i32_0 = arith.constant 0 : i32
    return %arg0, %arg2, %c0_i32 : i32, i32, i32
  }
  func.func @transform_2(%arg0: i32, %arg1: i32, %arg2: i32) -> (i32, i32, i32) {
    %c0_i32 = arith.constant 0 : i32
    %c0_i32_0 = arith.constant 0 : i32
    return %arg0, %arg2, %c0_i32 : i32, i32, i32
  }
  func.func @transform_3(%arg0: i32, %arg1: i32, %arg2: i32) -> (i32, i32, i32) {
    %c0_i32 = arith.constant 0 : i32
    %c0_i32_0 = arith.constant 0 : i32
    return %arg0, %arg1, %c0_i32 : i32, i32, i32
  }
}

module attributes {stable_mosaic.version = 11 : i64} {
  func.func @_matmul_kernel(%arg0: i32, %arg1: i32, %arg2: i32, %arg3: memref<32x32xbf16, #tpu.memory_space<vmem>>, %arg4: memref<32x32xbf16, #tpu.memory_space<vmem>>, %arg5: memref<1x32xf32, #tpu.memory_space<vmem>>, %arg6: memref<32x32xf32, #tpu.memory_space<vmem>>, %arg7: memref<32x32xf32, #tpu.memory_space<vmem>>) attributes {dimension_semantics = [#tpu.dimension_semantics<parallel>, #tpu.dimension_semantics<parallel>, #tpu.dimension_semantics<arbitrary>], iteration_bounds = array<i64: 1, 1, 1>, scalar_prefetch = 0 : i64, scratch_operands = 1 : i64, tpu.core_type = #tpu.core_type<tc>, window_params = [{transform_indices = @transform_0, window_bounds = array<i64: 32, 32>}, {transform_indices = @transform_1, window_bounds = array<i64: 32, 32>}, {transform_indices = @transform_2, window_bounds = array<i64: 1, 32>}, {transform_indices = @transform_3, window_bounds = array<i64: 32, 32>}]} {
    %c0_i32 = arith.constant 0 : i32
    %0 = arith.cmpi eq, %arg2, %c0_i32 : i32
    %1 = arith.extui %0 : i1 to i32
    %c0_i32_0 = arith.constant 0 : i32
    %2 = arith.cmpi ne, %1, %c0_i32_0 : i32
    scf.if %2 {
      %cst_10 = arith.constant 0.000000e+00 : f32
      %12 = vector.broadcast %cst_10 : f32 to vector<32x32xf32>
      %c0_11 = arith.constant 0 : index
      %c0_12 = arith.constant 0 : index
      %13 = vector.load %arg7[%c0_11, %c0_12] : memref<32x32xf32, #tpu.memory_space<vmem>>, vector<32x32xf32>
      tpu.vector_store %arg7[%c0_11, %c0_12], %12 {strides = array<i32>} : memref<32x32xf32, #tpu.memory_space<vmem>>, vector<32x32xf32>,
    } else {
    }
    %c0 = arith.constant 0 : index
    %c0_1 = arith.constant 0 : index
    %3 = vector.load %arg7[%c0, %c0_1] : memref<32x32xf32, #tpu.memory_space<vmem>>, vector<32x32xf32>
    %c0_2 = arith.constant 0 : index
    %c0_3 = arith.constant 0 : index
    %4 = vector.load %arg3[%c0_2, %c0_3] : memref<32x32xbf16, #tpu.memory_space<vmem>>, vector<32x32xbf16>
    %c0_4 = arith.constant 0 : index
    %c0_5 = arith.constant 0 : index
    %5 = vector.load %arg4[%c0_4, %c0_5] : memref<32x32xbf16, #tpu.memory_space<vmem>>, vector<32x32xbf16>
    %cst = arith.constant dense<0.000000e+00> : vector<32x32xf32>
    %6 = tpu.matmul %4, %5, %cst {dimension_numbers = #tpu.dot_dimension_numbers<[1], [0], [0], [1], [0, 0, 1, 1], [], []>} : vector<32x32xbf16>, vector<32x32xbf16>, vector<32x32xf32> -> vector<32x32xf32>
    %7 = arith.addf %3, %6 : vector<32x32xf32>
    %c0_6 = arith.constant 0 : index
    %c0_7 = arith.constant 0 : index
    %8 = vector.load %arg7[%c0_6, %c0_7] : memref<32x32xf32, #tpu.memory_space<vmem>>, vector<32x32xf32>
    tpu.vector_store %arg7[%c0_6, %c0_7], %7 {strides = array<i32>} : memref<32x32xf32, #tpu.memory_space<vmem>>, vector<32x32xf32>,
    %c0_i32_8 = arith.constant 0 : i32
    %9 = arith.cmpi eq, %arg2, %c0_i32_8 : i32
    %10 = arith.extui %9 : i1 to i32
    %c0_i32_9 = arith.constant 0 : i32
    %11 = arith.cmpi ne, %10, %c0_i32_9 : i32
    scf.if %11 {
      %c0_10 = arith.constant 0 : index
      %c0_11 = arith.constant 0 : index
      %12 = vector.load %arg7[%c0_10, %c0_11] : memref<32x32xf32, #tpu.memory_space<vmem>>, vector<32x32xf32>
      %c0_12 = arith.constant 0 : index
      %c0_13 = arith.constant 0 : index
      %13 = vector.load %arg5[%c0_12, %c0_13] : memref<1x32xf32, #tpu.memory_space<vmem>>, vector<1x32xf32>
      %14 = vector.broadcast %13 : vector<1x32xf32> to vector<32x32xf32>
      %15 = arith.addf %12, %14 : vector<32x32xf32>
      %c0_14 = arith.constant 0 : index
      %c0_15 = arith.constant 0 : index
      %16 = vector.load %arg6[%c0_14, %c0_15] : memref<32x32xf32, #tpu.memory_space<vmem>>, vector<32x32xf32>
      tpu.vector_store %arg6[%c0_14, %c0_15], %15 {strides = array<i32>} : memref<32x32xf32, #tpu.memory_space<vmem>>, vector<32x32xf32>,
    } else {
    }
    return
  }
  func.func @transform_0(%arg0: i32, %arg1: i32, %arg2: i32) -> (i32, i32) {
    %c0_i32 = arith.constant 0 : i32
    return %arg0, %arg2 : i32, i32
  }
  func.func @transform_1(%arg0: i32, %arg1: i32, %arg2: i32) -> (i32, i32) {
    %c0_i32 = arith.constant 0 : i32
    return %arg2, %arg1 : i32, i32
  }
  func.func @transform_2(%arg0: i32, %arg1: i32, %arg2: i32) -> (i32, i32) {
    %c0_i32 = arith.constant 0 : i32
    %c0_i32_0 = arith.constant 0 : i32
    return %c0_i32, %arg1 : i32, i32
  }
  func.func @transform_3(%arg0: i32, %arg1: i32, %arg2: i32) -> (i32, i32) {
    %c0_i32 = arith.constant 0 : i32
    return %arg0, %arg1 : i32, i32
  }
}

module attributes {stable_mosaic.version = 11 : i64} {
  func.func @_matmul_kernel(%arg0: i32, %arg1: i32, %arg2: i32, %arg3: memref<32x32xbf16, #tpu.memory_space<vmem>>, %arg4: memref<32x128xbf16, #tpu.memory_space<vmem>>, %arg5: memref<1x128xf32, #tpu.memory_space<vmem>>, %arg6: memref<32x128xf32, #tpu.memory_space<vmem>>, %arg7: memref<32x128xf32, #tpu.memory_space<vmem>>) attributes {dimension_semantics = [#tpu.dimension_semantics<parallel>, #tpu.dimension_semantics<parallel>, #tpu.dimension_semantics<arbitrary>], iteration_bounds = array<i64: 1, 1, 1>, scalar_prefetch = 0 : i64, scratch_operands = 1 : i64, tpu.core_type = #tpu.core_type<tc>, window_params = [{transform_indices = @transform_0, window_bounds = array<i64: 32, 32>}, {transform_indices = @transform_1, window_bounds = array<i64: 32, 128>}, {transform_indices = @transform_2, window_bounds = array<i64: 1, 128>}, {transform_indices = @transform_3, window_bounds = array<i64: 32, 128>}]} {
    %c0_i32 = arith.constant 0 : i32
    %0 = arith.cmpi eq, %arg2, %c0_i32 : i32
    %1 = arith.extui %0 : i1 to i32
    %c0_i32_0 = arith.constant 0 : i32
    %2 = arith.cmpi ne, %1, %c0_i32_0 : i32
    scf.if %2 {
      %cst_10 = arith.constant 0.000000e+00 : f32
      %12 = vector.broadcast %cst_10 : f32 to vector<32x128xf32>
      %c0_11 = arith.constant 0 : index
      %c0_12 = arith.constant 0 : index
      %13 = vector.load %arg7[%c0_11, %c0_12] : memref<32x128xf32, #tpu.memory_space<vmem>>, vector<32x128xf32>
      tpu.vector_store %arg7[%c0_11, %c0_12], %12 {strides = array<i32>} : memref<32x128xf32, #tpu.memory_space<vmem>>, vector<32x128xf32>,
    } else {
    }
    %c0 = arith.constant 0 : index
    %c0_1 = arith.constant 0 : index
    %3 = vector.load %arg7[%c0, %c0_1] : memref<32x128xf32, #tpu.memory_space<vmem>>, vector<32x128xf32>
    %c0_2 = arith.constant 0 : index
    %c0_3 = arith.constant 0 : index
    %4 = vector.load %arg3[%c0_2, %c0_3] : memref<32x32xbf16, #tpu.memory_space<vmem>>, vector<32x32xbf16>
    %c0_4 = arith.constant 0 : index
    %c0_5 = arith.constant 0 : index
    %5 = vector.load %arg4[%c0_4, %c0_5] : memref<32x128xbf16, #tpu.memory_space<vmem>>, vector<32x128xbf16>
    %cst = arith.constant dense<0.000000e+00> : vector<32x128xf32>
    %6 = tpu.matmul %4, %5, %cst {dimension_numbers = #tpu.dot_dimension_numbers<[1], [0], [0], [1], [0, 0, 1, 1], [], []>} : vector<32x32xbf16>, vector<32x128xbf16>, vector<32x128xf32> -> vector<32x128xf32>
    %7 = arith.addf %3, %6 : vector<32x128xf32>
    %c0_6 = arith.constant 0 : index
    %c0_7 = arith.constant 0 : index
    %8 = vector.load %arg7[%c0_6, %c0_7] : memref<32x128xf32, #tpu.memory_space<vmem>>, vector<32x128xf32>
    tpu.vector_store %arg7[%c0_6, %c0_7], %7 {strides = array<i32>} : memref<32x128xf32, #tpu.memory_space<vmem>>, vector<32x128xf32>,
    %c0_i32_8 = arith.constant 0 : i32
    %9 = arith.cmpi eq, %arg2, %c0_i32_8 : i32
    %10 = arith.extui %9 : i1 to i32
    %c0_i32_9 = arith.constant 0 : i32
    %11 = arith.cmpi ne, %10, %c0_i32_9 : i32
    scf.if %11 {
      %c0_10 = arith.constant 0 : index
      %c0_11 = arith.constant 0 : index
      %12 = vector.load %arg7[%c0_10, %c0_11] : memref<32x128xf32, #tpu.memory_space<vmem>>, vector<32x128xf32>
      %c0_12 = arith.constant 0 : index
      %c0_13 = arith.constant 0 : index
      %13 = vector.load %arg5[%c0_12, %c0_13] : memref<1x128xf32, #tpu.memory_space<vmem>>, vector<1x128xf32>
      %14 = vector.broadcast %13 : vector<1x128xf32> to vector<32x128xf32>
      %15 = arith.addf %12, %14 : vector<32x128xf32>
      %cst_14 = arith.constant 5.000000e-01 : f32
      %16 = vector.broadcast %cst_14 : f32 to vector<32x128xf32>
      %17 = arith.mulf %16, %15 : vector<32x128xf32>
      %cst_15 = arith.constant 0.707106769 : f32
      %18 = vector.broadcast %cst_15 : f32 to vector<32x128xf32>
      %19 = arith.mulf %15, %18 : vector<32x128xf32>
      %cst_16 = arith.constant 0.000000e+00 : f32
      %20 = vector.broadcast %cst_16 : f32 to vector<32x128xf32>
      %21 = arith.cmpf oge, %19, %20 : vector<32x128xf32>
      %cst_17 = arith.constant 1.000000e+00 : f32
      %cst_18 = arith.constant -1.000000e+00 : f32
      %22 = vector.broadcast %cst_17 : f32 to vector<32x128xf32>
      %23 = vector.broadcast %cst_18 : f32 to vector<32x128xf32>
      %24 = arith.select %21, %22, %23 : vector<32x128xi1>, vector<32x128xf32>
      %25 = math.absf %19 : vector<32x128xf32>
      %cst_19 = arith.constant 0.327591091 : f32
      %26 = vector.broadcast %cst_19 : f32 to vector<32x128xf32>
      %27 = arith.mulf %26, %25 : vector<32x128xf32>
      %cst_20 = arith.constant 1.000000e+00 : f32
      %28 = vector.broadcast %cst_20 : f32 to vector<32x128xf32>
      %29 = arith.addf %28, %27 : vector<32x128xf32>
      %cst_21 = arith.constant 1.000000e+00 : f32
      %30 = vector.broadcast %cst_21 : f32 to vector<32x128xf32>
      %31 = arith.divf %30, %29 : vector<32x128xf32>
      %cst_22 = arith.constant 1.06140542 : f32
      %32 = vector.broadcast %cst_22 : f32 to vector<32x128xf32>
      %33 = arith.mulf %32, %31 : vector<32x128xf32>
      %cst_23 = arith.constant -1.45315206 : f32
      %34 = vector.broadcast %cst_23 : f32 to vector<32x128xf32>
      %35 = arith.addf %33, %34 : vector<32x128xf32>
      %36 = arith.mulf %35, %31 : vector<32x128xf32>
      %cst_24 = arith.constant 1.42141378 : f32
      %37 = vector.broadcast %cst_24 : f32 to vector<32x128xf32>
      %38 = arith.addf %36, %37 : vector<32x128xf32>
      %39 = arith.mulf %38, %31 : vector<32x128xf32>
      %cst_25 = arith.constant -0.284496725 : f32
      %40 = vector.broadcast %cst_25 : f32 to vector<32x128xf32>
      %41 = arith.addf %39, %40 : vector<32x128xf32>
      %42 = arith.mulf %41, %31 : vector<32x128xf32>
      %cst_26 = arith.constant 0.254829586 : f32
      %43 = vector.broadcast %cst_26 : f32 to vector<32x128xf32>
      %44 = arith.addf %42, %43 : vector<32x128xf32>
      %45 = arith.mulf %44, %31 : vector<32x128xf32>
      %cst_27 = arith.constant 0.000000e+00 : f32
      %46 = vector.broadcast %cst_27 : f32 to vector<32x128xf32>
      %47 = arith.subf %46, %25 : vector<32x128xf32>
      %48 = arith.mulf %47, %25 : vector<32x128xf32>
      %49 = math.exp %48 : vector<32x128xf32>
      %50 = arith.mulf %45, %49 : vector<32x128xf32>
      %cst_28 = arith.constant 1.000000e+00 : f32
      %51 = vector.broadcast %cst_28 : f32 to vector<32x128xf32>
      %52 = arith.subf %51, %50 : vector<32x128xf32>
      %53 = arith.mulf %24, %52 : vector<32x128xf32>
      %cst_29 = arith.constant 1.000000e+00 : f32
      %54 = vector.broadcast %cst_29 : f32 to vector<32x128xf32>
      %55 = arith.addf %54, %53 : vector<32x128xf32>
      %56 = arith.mulf %17, %55 : vector<32x128xf32>
      %c0_30 = arith.constant 0 : index
      %c0_31 = arith.constant 0 : index
      %57 = vector.load %arg6[%c0_30, %c0_31] : memref<32x128xf32, #tpu.memory_space<vmem>>, vector<32x128xf32>
      tpu.vector_store %arg6[%c0_30, %c0_31], %56 {strides = array<i32>} : memref<32x128xf32, #tpu.memory_space<vmem>>, vector<32x128xf32>,
    } else {
    }
    return
  }
  func.func @transform_0(%arg0: i32, %arg1: i32, %arg2: i32) -> (i32, i32) {
    %c0_i32 = arith.constant 0 : i32
    return %arg0, %arg2 : i32, i32
  }
  func.func @transform_1(%arg0: i32, %arg1: i32, %arg2: i32) -> (i32, i32) {
    %c0_i32 = arith.constant 0 : i32
    return %arg2, %arg1 : i32, i32
  }
  func.func @transform_2(%arg0: i32, %arg1: i32, %arg2: i32) -> (i32, i32) {
    %c0_i32 = arith.constant 0 : i32
    %c0_i32_0 = arith.constant 0 : i32
    return %c0_i32, %arg1 : i32, i32
  }
  func.func @transform_3(%arg0: i32, %arg1: i32, %arg2: i32) -> (i32, i32) {
    %c0_i32 = arith.constant 0 : i32
    return %arg0, %arg1 : i32, i32
  }
}

module attributes {stable_mosaic.version = 11 : i64} {
  func.func @_matmul_kernel(%arg0: i32, %arg1: i32, %arg2: i32, %arg3: memref<32x128xbf16, #tpu.memory_space<vmem>>, %arg4: memref<128x32xbf16, #tpu.memory_space<vmem>>, %arg5: memref<1x32xf32, #tpu.memory_space<vmem>>, %arg6: memref<32x32xf32, #tpu.memory_space<vmem>>, %arg7: memref<32x32xf32, #tpu.memory_space<vmem>>) attributes {dimension_semantics = [#tpu.dimension_semantics<parallel>, #tpu.dimension_semantics<parallel>, #tpu.dimension_semantics<arbitrary>], iteration_bounds = array<i64: 1, 1, 1>, scalar_prefetch = 0 : i64, scratch_operands = 1 : i64, tpu.core_type = #tpu.core_type<tc>, window_params = [{transform_indices = @transform_0, window_bounds = array<i64: 32, 128>}, {transform_indices = @transform_1, window_bounds = array<i64: 128, 32>}, {transform_indices = @transform_2, window_bounds = array<i64: 1, 32>}, {transform_indices = @transform_3, window_bounds = array<i64: 32, 32>}]} {
    %c0_i32 = arith.constant 0 : i32
    %0 = arith.cmpi eq, %arg2, %c0_i32 : i32
    %1 = arith.extui %0 : i1 to i32
    %c0_i32_0 = arith.constant 0 : i32
    %2 = arith.cmpi ne, %1, %c0_i32_0 : i32
    scf.if %2 {
      %cst_10 = arith.constant 0.000000e+00 : f32
      %12 = vector.broadcast %cst_10 : f32 to vector<32x32xf32>
      %c0_11 = arith.constant 0 : index
      %c0_12 = arith.constant 0 : index
      %13 = vector.load %arg7[%c0_11, %c0_12] : memref<32x32xf32, #tpu.memory_space<vmem>>, vector<32x32xf32>
      tpu.vector_store %arg7[%c0_11, %c0_12], %12 {strides = array<i32>} : memref<32x32xf32, #tpu.memory_space<vmem>>, vector<32x32xf32>,
    } else {
    }
    %c0 = arith.constant 0 : index
    %c0_1 = arith.constant 0 : index
    %3 = vector.load %arg7[%c0, %c0_1] : memref<32x32xf32, #tpu.memory_space<vmem>>, vector<32x32xf32>
    %c0_2 = arith.constant 0 : index
    %c0_3 = arith.constant 0 : index
    %4 = vector.load %arg3[%c0_2, %c0_3] : memref<32x128xbf16, #tpu.memory_space<vmem>>, vector<32x128xbf16>
    %c0_4 = arith.constant 0 : index
    %c0_5 = arith.constant 0 : index
    %5 = vector.load %arg4[%c0_4, %c0_5] : memref<128x32xbf16, #tpu.memory_space<vmem>>, vector<128x32xbf16>
    %cst = arith.constant dense<0.000000e+00> : vector<32x32xf32>
    %6 = tpu.matmul %4, %5, %cst {dimension_numbers = #tpu.dot_dimension_numbers<[1], [0], [0], [1], [0, 0, 1, 1], [], []>} : vector<32x128xbf16>, vector<128x32xbf16>, vector<32x32xf32> -> vector<32x32xf32>
    %7 = arith.addf %3, %6 : vector<32x32xf32>
    %c0_6 = arith.constant 0 : index
    %c0_7 = arith.constant 0 : index
    %8 = vector.load %arg7[%c0_6, %c0_7] : memref<32x32xf32, #tpu.memory_space<vmem>>, vector<32x32xf32>
    tpu.vector_store %arg7[%c0_6, %c0_7], %7 {strides = array<i32>} : memref<32x32xf32, #tpu.memory_space<vmem>>, vector<32x32xf32>,
    %c0_i32_8 = arith.constant 0 : i32
    %9 = arith.cmpi eq, %arg2, %c0_i32_8 : i32
    %10 = arith.extui %9 : i1 to i32
    %c0_i32_9 = arith.constant 0 : i32
    %11 = arith.cmpi ne, %10, %c0_i32_9 : i32
    scf.if %11 {
      %c0_10 = arith.constant 0 : index
      %c0_11 = arith.constant 0 : index
      %12 = vector.load %arg7[%c0_10, %c0_11] : memref<32x32xf32, #tpu.memory_space<vmem>>, vector<32x32xf32>
      %c0_12 = arith.constant 0 : index
      %c0_13 = arith.constant 0 : index
      %13 = vector.load %arg5[%c0_12, %c0_13] : memref<1x32xf32, #tpu.memory_space<vmem>>, vector<1x32xf32>
      %14 = vector.broadcast %13 : vector<1x32xf32> to vector<32x32xf32>
      %15 = arith.addf %12, %14 : vector<32x32xf32>
      %c0_14 = arith.constant 0 : index
      %c0_15 = arith.constant 0 : index
      %16 = vector.load %arg6[%c0_14, %c0_15] : memref<32x32xf32, #tpu.memory_space<vmem>>, vector<32x32xf32>
      tpu.vector_store %arg6[%c0_14, %c0_15], %15 {strides = array<i32>} : memref<32x32xf32, #tpu.memory_space<vmem>>, vector<32x32xf32>,
    } else {
    }
    return
  }
  func.func @transform_0(%arg0: i32, %arg1: i32, %arg2: i32) -> (i32, i32) {
    %c0_i32 = arith.constant 0 : i32
    return %arg0, %arg2 : i32, i32
  }
  func.func @transform_1(%arg0: i32, %arg1: i32, %arg2: i32) -> (i32, i32) {
    %c0_i32 = arith.constant 0 : i32
    return %arg2, %arg1 : i32, i32
  }
  func.func @transform_2(%arg0: i32, %arg1: i32, %arg2: i32) -> (i32, i32) {
    %c0_i32 = arith.constant 0 : i32
    %c0_i32_0 = arith.constant 0 : i32
    return %c0_i32, %arg1 : i32, i32
  }
  func.func @transform_3(%arg0: i32, %arg1: i32, %arg2: i32) -> (i32, i32) {
    %c0_i32 = arith.constant 0 : i32
    return %arg0, %arg1 : i32, i32
  }
}

module attributes {stable_mosaic.version = 11 : i64} {
  func.func @_matmul_kernel(%arg0: i32, %arg1: i32, %arg2: i32, %arg3: memref<32x32xbf16, #tpu.memory_space<vmem>>, %arg4: memref<32x64xbf16, #tpu.memory_space<vmem>>, %arg5: memref<1x64xf32, #tpu.memory_space<vmem>>, %arg6: memref<32x64xf32, #tpu.memory_space<vmem>>, %arg7: memref<32x64xf32, #tpu.memory_space<vmem>>) attributes {dimension_semantics = [#tpu.dimension_semantics<parallel>, #tpu.dimension_semantics<parallel>, #tpu.dimension_semantics<arbitrary>], iteration_bounds = array<i64: 1, 1, 1>, scalar_prefetch = 0 : i64, scratch_operands = 1 : i64, tpu.core_type = #tpu.core_type<tc>, window_params = [{transform_indices = @transform_0, window_bounds = array<i64: 32, 32>}, {transform_indices = @transform_1, window_bounds = array<i64: 32, 64>}, {transform_indices = @transform_2, window_bounds = array<i64: 1, 64>}, {transform_indices = @transform_3, window_bounds = array<i64: 32, 64>}]} {
    %c0_i32 = arith.constant 0 : i32
    %0 = arith.cmpi eq, %arg2, %c0_i32 : i32
    %1 = arith.extui %0 : i1 to i32
    %c0_i32_0 = arith.constant 0 : i32
    %2 = arith.cmpi ne, %1, %c0_i32_0 : i32
    scf.if %2 {
      %cst_10 = arith.constant 0.000000e+00 : f32
      %12 = vector.broadcast %cst_10 : f32 to vector<32x64xf32>
      %c0_11 = arith.constant 0 : index
      %c0_12 = arith.constant 0 : index
      %13 = vector.load %arg7[%c0_11, %c0_12] : memref<32x64xf32, #tpu.memory_space<vmem>>, vector<32x64xf32>
      tpu.vector_store %arg7[%c0_11, %c0_12], %12 {strides = array<i32>} : memref<32x64xf32, #tpu.memory_space<vmem>>, vector<32x64xf32>,
    } else {
    }
    %c0 = arith.constant 0 : index
    %c0_1 = arith.constant 0 : index
    %3 = vector.load %arg7[%c0, %c0_1] : memref<32x64xf32, #tpu.memory_space<vmem>>, vector<32x64xf32>
    %c0_2 = arith.constant 0 : index
    %c0_3 = arith.constant 0 : index
    %4 = vector.load %arg3[%c0_2, %c0_3] : memref<32x32xbf16, #tpu.memory_space<vmem>>, vector<32x32xbf16>
    %c0_4 = arith.constant 0 : index
    %c0_5 = arith.constant 0 : index
    %5 = vector.load %arg4[%c0_4, %c0_5] : memref<32x64xbf16, #tpu.memory_space<vmem>>, vector<32x64xbf16>
    %cst = arith.constant dense<0.000000e+00> : vector<32x64xf32>
    %6 = tpu.matmul %4, %5, %cst {dimension_numbers = #tpu.dot_dimension_numbers<[1], [0], [0], [1], [0, 0, 1, 1], [], []>} : vector<32x32xbf16>, vector<32x64xbf16>, vector<32x64xf32> -> vector<32x64xf32>
    %7 = arith.addf %3, %6 : vector<32x64xf32>
    %c0_6 = arith.constant 0 : index
    %c0_7 = arith.constant 0 : index
    %8 = vector.load %arg7[%c0_6, %c0_7] : memref<32x64xf32, #tpu.memory_space<vmem>>, vector<32x64xf32>
    tpu.vector_store %arg7[%c0_6, %c0_7], %7 {strides = array<i32>} : memref<32x64xf32, #tpu.memory_space<vmem>>, vector<32x64xf32>,
    %c0_i32_8 = arith.constant 0 : i32
    %9 = arith.cmpi eq, %arg2, %c0_i32_8 : i32
    %10 = arith.extui %9 : i1 to i32
    %c0_i32_9 = arith.constant 0 : i32
    %11 = arith.cmpi ne, %10, %c0_i32_9 : i32
    scf.if %11 {
      %c0_10 = arith.constant 0 : index
      %c0_11 = arith.constant 0 : index
      %12 = vector.load %arg7[%c0_10, %c0_11] : memref<32x64xf32, #tpu.memory_space<vmem>>, vector<32x64xf32>
      %c0_12 = arith.constant 0 : index
      %c0_13 = arith.constant 0 : index
      %13 = vector.load %arg5[%c0_12, %c0_13] : memref<1x64xf32, #tpu.memory_space<vmem>>, vector<1x64xf32>
      %14 = vector.broadcast %13 : vector<1x64xf32> to vector<32x64xf32>
      %15 = arith.addf %12, %14 : vector<32x64xf32>
      %c0_14 = arith.constant 0 : index
      %c0_15 = arith.constant 0 : index
      %16 = vector.load %arg6[%c0_14, %c0_15] : memref<32x64xf32, #tpu.memory_space<vmem>>, vector<32x64xf32>
      tpu.vector_store %arg6[%c0_14, %c0_15], %15 {strides = array<i32>} : memref<32x64xf32, #tpu.memory_space<vmem>>, vector<32x64xf32>,
    } else {
    }
    return
  }
  func.func @transform_0(%arg0: i32, %arg1: i32, %arg2: i32) -> (i32, i32) {
    %c0_i32 = arith.constant 0 : i32
    return %arg0, %arg2 : i32, i32
  }
  func.func @transform_1(%arg0: i32, %arg1: i32, %arg2: i32) -> (i32, i32) {
    %c0_i32 = arith.constant 0 : i32
    return %arg2, %arg1 : i32, i32
  }
  func.func @transform_2(%arg0: i32, %arg1: i32, %arg2: i32) -> (i32, i32) {
    %c0_i32 = arith.constant 0 : i32
    %c0_i32_0 = arith.constant 0 : i32
    return %c0_i32, %arg1 : i32, i32
  }
  func.func @transform_3(%arg0: i32, %arg1: i32, %arg2: i32) -> (i32, i32) {
    %c0_i32 = arith.constant 0 : i32
    return %arg0, %arg1 : i32, i32
  }
}

module attributes {stable_mosaic.version = 11 : i64} {
  func.func @_flash_kernel(%arg0: i32, %arg1: i32, %arg2: i32, %arg3: memref<1x8x8xbf16, #tpu.memory_space<vmem>>, %arg4: memref<1x16x8xbf16, #tpu.memory_space<vmem>>, %arg5: memref<1x16x8xbf16, #tpu.memory_space<vmem>>, %arg6: memref<1x8x8xf32, #tpu.memory_space<vmem>>, %arg7: memref<8x1xf32, #tpu.memory_space<vmem>>, %arg8: memref<8x1xf32, #tpu.memory_space<vmem>>, %arg9: memref<8x8xf32, #tpu.memory_space<vmem>>) attributes {dimension_semantics = [#tpu.dimension_semantics<parallel>, #tpu.dimension_semantics<parallel>, #tpu.dimension_semantics<arbitrary>], iteration_bounds = array<i64: 8, 1, 1>, scalar_prefetch = 0 : i64, scratch_operands = 3 : i64, tpu.core_type = #tpu.core_type<tc>, window_params = [{transform_indices = @transform_0, window_bounds = array<i64: 1, 8, 8>}, {transform_indices = @transform_1, window_bounds = array<i64: 1, 16, 8>}, {transform_indices = @transform_2, window_bounds = array<i64: 1, 16, 8>}, {transform_indices = @transform_3, window_bounds = array<i64: 1, 8, 8>}]} {
    %c0_i32 = arith.constant 0 : i32
    %0 = arith.cmpi eq, %arg2, %c0_i32 : i32
    %1 = arith.extui %0 : i1 to i32
    %c0_i32_0 = arith.constant 0 : i32
    %2 = arith.cmpi ne, %1, %c0_i32_0 : i32
    scf.if %2 {
      %cst = arith.constant -1.000000e+30 : f32
      %13 = vector.broadcast %cst : f32 to vector<8x1xf32>
      %c0 = arith.constant 0 : index
      %c0_5 = arith.constant 0 : index
      %14 = vector.load %arg7[%c0, %c0_5] : memref<8x1xf32, #tpu.memory_space<vmem>>, vector<8x1xf32>
      tpu.vector_store %arg7[%c0, %c0_5], %13 {strides = array<i32>} : memref<8x1xf32, #tpu.memory_space<vmem>>, vector<8x1xf32>,
      %cst_6 = arith.constant 0.000000e+00 : f32
      %15 = vector.broadcast %cst_6 : f32 to vector<8x1xf32>
      %c0_7 = arith.constant 0 : index
      %c0_8 = arith.constant 0 : index
      %16 = vector.load %arg8[%c0_7, %c0_8] : memref<8x1xf32, #tpu.memory_space<vmem>>, vector<8x1xf32>
      tpu.vector_store %arg8[%c0_7, %c0_8], %15 {strides = array<i32>} : memref<8x1xf32, #tpu.memory_space<vmem>>, vector<8x1xf32>,
      %cst_9 = arith.constant 0.000000e+00 : f32
      %17 = vector.broadcast %cst_9 : f32 to vector<8x8xf32>
      %c0_10 = arith.constant 0 : index
      %c0_11 = arith.constant 0 : index
      %18 = vector.load %arg9[%c0_10, %c0_11] : memref<8x8xf32, #tpu.memory_space<vmem>>, vector<8x8xf32>
      tpu.vector_store %arg9[%c0_10, %c0_11], %17 {strides = array<i32>} : memref<8x8xf32, #tpu.memory_space<vmem>>, vector<8x8xf32>,
    } else {
    }
    %c16_i32 = arith.constant 16 : i32
    %3 = arith.muli %arg2, %c16_i32 : i32
    %c8_i32 = arith.constant 8 : i32
    %4 = arith.muli %arg1, %c8_i32 : i32
    %c8_i32_1 = arith.constant 8 : i32
    %5 = arith.addi %4, %c8_i32_1 : i32
    %c1_i32 = arith.constant 1 : i32
    %6 = arith.subi %5, %c1_i32 : i32
    %7 = arith.cmpi sle, %3, %6 : i32
    %8 = arith.extui %7 : i1 to i32
    %c0_i32_2 = arith.constant 0 : i32
    %9 = arith.cmpi ne, %8, %c0_i32_2 : i32
    scf.if %9 {
      %c0 = arith.constant 0 : index
      %c0_5 = arith.constant 0 : index
      %c0_6 = arith.constant 0 : index
      %13 = vector.load %arg3[%c0, %c0_5, %c0_6] : memref<1x8x8xbf16, #tpu.memory_space<vmem>>, vector<1x8x8xbf16>
      %14 = vector.shape_cast %13 : vector<1x8x8xbf16> to vector<8x8xbf16>
      %c0_7 = arith.constant 0 : index
      %c0_8 = arith.constant 0 : index
      %c0_9 = arith.constant 0 : index
      %15 = vector.load %arg4[%c0_7, %c0_8, %c0_9] : memref<1x16x8xbf16, #tpu.memory_space<vmem>>, vector<1x16x8xbf16>
      %16 = vector.shape_cast %15 : vector<1x16x8xbf16> to vector<16x8xbf16>
      %c0_10 = arith.constant 0 : index
      %c0_11 = arith.constant 0 : index
      %c0_12 = arith.constant 0 : index
      %17 = vector.load %arg5[%c0_10, %c0_11, %c0_12] : memref<1x16x8xbf16, #tpu.memory_space<vmem>>, vector<1x16x8xbf16>
      %18 = vector.shape_cast %17 : vector<1x16x8xbf16> to vector<16x8xbf16>
      %cst = arith.constant dense<0.000000e+00> : vector<8x16xf32>
      %19 = tpu.matmul %14, %16, %cst {dimension_numbers = #tpu.dot_dimension_numbers<[1], [1], [0], [0], [0, 0, 1, 0], [], []>} : vector<8x8xbf16>, vector<16x8xbf16>, vector<8x16xf32> -> vector<8x16xf32>
      %c16_i32_13 = arith.constant 16 : i32
      %20 = arith.muli %arg2, %c16_i32_13 : i32
      %21 = tpu.iota {dimensions = array<i32: 1>} : vector<8x16xi32>
      %22 = vector.broadcast %20 : i32 to vector<8x16xi32>
      %23 = arith.addi %22, %21 : vector<8x16xi32>
      %c8_i32_14 = arith.constant 8 : i32
      %24 = arith.muli %arg1, %c8_i32_14 : i32
      %25 = tpu.iota {dimensions = array<i32: 0>} : vector<8x16xi32>
      %26 = vector.broadcast %24 : i32 to vector<8x16xi32>
      %27 = arith.addi %26, %25 : vector<8x16xi32>
      %28 = arith.cmpi sle, %23, %27 : vector<8x16xi32>
      %cst_15 = arith.constant -1.000000e+30 : f32
      %29 = vector.broadcast %cst_15 : f32 to vector<8x16xf32>
      %30 = arith.select %28, %19, %29 : vector<8x16xi1>, vector<8x16xf32>
      %c0_16 = arith.constant 0 : index
      %c0_17 = arith.constant 0 : index
      %31 = vector.load %arg7[%c0_16, %c0_17] : memref<8x1xf32, #tpu.memory_space<vmem>>, vector<8x1xf32>
      %cst_18 = arith.constant dense<0xFF800000> : vector<8xf32>
      %32 = vector.multi_reduction <maximumf>, %30, %cst_18 [1] : vector<8x16xf32> to vector<8xf32>
      %33 = vector.shape_cast %32 : vector<8xf32> to vector<8x1xf32>
      %34 = arith.maximumf %31, %33 : vector<8x1xf32>
      %35 = arith.subf %31, %34 : vector<8x1xf32>
      %36 = math.exp %35 : vector<8x1xf32>
      %37 = vector.broadcast %34 : vector<8x1xf32> to vector<8x16xf32>
      %38 = arith.subf %30, %37 : vector<8x16xf32>
      %39 = math.exp %38 : vector<8x16xf32>
      %c0_19 = arith.constant 0 : index
      %c0_20 = arith.constant 0 : index
      %40 = vector.load %arg8[%c0_19, %c0_20] : memref<8x1xf32, #tpu.memory_space<vmem>>, vector<8x1xf32>
      %41 = arith.mulf %36, %40 : vector<8x1xf32>
      %cst_21 = arith.constant dense<0.000000e+00> : vector<8xf32>
      %42 = vector.multi_reduction <add>, %39, %cst_21 [1] : vector<8x16xf32> to vector<8xf32>
      %43 = vector.shape_cast %42 : vector<8xf32> to vector<8x1xf32>
      %44 = arith.addf %41, %43 : vector<8x1xf32>
      %c0_22 = arith.constant 0 : index
      %c0_23 = arith.constant 0 : index
      %45 = vector.load %arg8[%c0_22, %c0_23] : memref<8x1xf32, #tpu.memory_space<vmem>>, vector<8x1xf32>
      tpu.vector_store %arg8[%c0_22, %c0_23], %44 {strides = array<i32>} : memref<8x1xf32, #tpu.memory_space<vmem>>, vector<8x1xf32>,
      %c0_24 = arith.constant 0 : index
      %c0_25 = arith.constant 0 : index
      %46 = vector.load %arg9[%c0_24, %c0_25] : memref<8x8xf32, #tpu.memory_space<vmem>>, vector<8x8xf32>
      %47 = vector.broadcast %36 : vector<8x1xf32> to vector<8x8xf32>
      %48 = arith.mulf %47, %46 : vector<8x8xf32>
      %49 = arith.truncf %39 : vector<8x16xf32> to vector<8x16xbf16>
      %cst_26 = arith.constant dense<0.000000e+00> : vector<8x8xf32>
      %50 = tpu.matmul %49, %18, %cst_26 {dimension_numbers = #tpu.dot_dimension_numbers<[1], [0], [0], [1], [0, 0, 1, 1], [], []>} : vector<8x16xbf16>, vector<16x8xbf16>, vector<8x8xf32> -> vector<8x8xf32>
      %51 = arith.addf %48, %50 : vector<8x8xf32>
      %c0_27 = arith.constant 0 : index
      %c0_28 = arith.constant 0 : index
      %52 = vector.load %arg9[%c0_27, %c0_28] : memref<8x8xf32, #tpu.memory_space<vmem>>, vector<8x8xf32>
      tpu.vector_store %arg9[%c0_27, %c0_28], %51 {strides = array<i32>} : memref<8x8xf32, #tpu.memory_space<vmem>>, vector<8x8xf32>,
      %c0_29 = arith.constant 0 : index
      %c0_30 = arith.constant 0 : index
      %53 = vector.load %arg7[%c0_29, %c0_30] : memref<8x1xf32, #tpu.memory_space<vmem>>, vector<8x1xf32>
      tpu.vector_store %arg7[%c0_29, %c0_30], %34 {strides = array<i32>} : memref<8x1xf32, #tpu.memory_space<vmem>>, vector<8x1xf32>,
    } else {
    }
    %c0_i32_3 = arith.constant 0 : i32
    %10 = arith.cmpi eq, %arg2, %c0_i32_3 : i32
    %11 = arith.extui %10 : i1 to i32
    %c0_i32_4 = arith.constant 0 : i32
    %12 = arith.cmpi ne, %11, %c0_i32_4 : i32
    scf.if %12 {
      %c0 = arith.constant 0 : index
      %c0_5 = arith.constant 0 : index
      %13 = vector.load %arg9[%c0, %c0_5] : memref<8x8xf32, #tpu.memory_space<vmem>>, vector<8x8xf32>
      %c0_6 = arith.constant 0 : index
      %c0_7 = arith.constant 0 : index
      %14 = vector.load %arg8[%c0_6, %c0_7] : memref<8x1xf32, #tpu.memory_space<vmem>>, vector<8x1xf32>
      %15 = tpu.reciprocal %14 {approx = true} : vector<8x1xf32> -> vector<8x1xf32>
      %16 = vector.broadcast %15 : vector<8x1xf32> to vector<8x8xf32>
      %17 = arith.mulf %13, %16 : vector<8x8xf32>
      %c0_8 = arith.constant 0 : index
      %c0_9 = arith.constant 0 : index
      %c0_10 = arith.constant 0 : index
      %18 = vector.load %arg6[%c0_8, %c0_9, %c0_10] : memref<1x8x8xf32, #tpu.memory_space<vmem>>, vector<1x8x8xf32>
      %19 = vector.shape_cast %18 : vector<1x8x8xf32> to vector<8x8xf32>
      %20 = vector.shape_cast %17 : vector<8x8xf32> to vector<1x8x8xf32>
      tpu.vector_store %arg6[%c0_8, %c0_9, %c0_10], %20 {strides = array<i32>} : memref<1x8x8xf32, #tpu.memory_space<vmem>>, vector<1x8x8xf32>,
    } else {
    }
    return
  }
  func.func @transform_0(%arg0: i32, %arg1: i32, %arg2: i32) -> (i32, i32, i32) {
    %c0_i32 = arith.constant 0 : i32
    %c0_i32_0 = arith.constant 0 : i32
    return %arg0, %arg1, %c0_i32 : i32, i32, i32
  }
  func.func @transform_1(%arg0: i32, %arg1: i32, %arg2: i32) -> (i32, i32, i32) {
    %c0_i32 = arith.constant 0 : i32
    %c0_i32_0 = arith.constant 0 : i32
    return %arg0, %arg2, %c0_i32 : i32, i32, i32
  }
  func.func @transform_2(%arg0: i32, %arg1: i32, %arg2: i32) -> (i32, i32, i32) {
    %c0_i32 = arith.constant 0 : i32
    %c0_i32_0 = arith.constant 0 : i32
    return %arg0, %arg2, %c0_i32 : i32, i32, i32
  }
  func.func @transform_3(%arg0: i32, %arg1: i32, %arg2: i32) -> (i32, i32, i32) {
    %c0_i32 = arith.constant 0 : i32
    %c0_i32_0 = arith.constant 0 : i32
    return %arg0, %arg1, %c0_i32 : i32, i32, i32
  }
}

module attributes {stable_mosaic.version = 11 : i64} {
  func.func @_matmul_kernel(%arg0: i32, %arg1: i32, %arg2: i32, %arg3: memref<16x32xbf16, #tpu.memory_space<vmem>>, %arg4: memref<32x128xbf16, #tpu.memory_space<vmem>>, %arg5: memref<1x128xf32, #tpu.memory_space<vmem>>, %arg6: memref<16x128xf32, #tpu.memory_space<vmem>>, %arg7: memref<16x128xf32, #tpu.memory_space<vmem>>) attributes {dimension_semantics = [#tpu.dimension_semantics<parallel>, #tpu.dimension_semantics<parallel>, #tpu.dimension_semantics<arbitrary>], iteration_bounds = array<i64: 1, 1, 1>, scalar_prefetch = 0 : i64, scratch_operands = 1 : i64, tpu.core_type = #tpu.core_type<tc>, window_params = [{transform_indices = @transform_0, window_bounds = array<i64: 16, 32>}, {transform_indices = @transform_1, window_bounds = array<i64: 32, 128>}, {transform_indices = @transform_2, window_bounds = array<i64: 1, 128>}, {transform_indices = @transform_3, window_bounds = array<i64: 16, 128>}]} {
    %c0_i32 = arith.constant 0 : i32
    %0 = arith.cmpi eq, %arg2, %c0_i32 : i32
    %1 = arith.extui %0 : i1 to i32
    %c0_i32_0 = arith.constant 0 : i32
    %2 = arith.cmpi ne, %1, %c0_i32_0 : i32
    scf.if %2 {
      %cst_10 = arith.constant 0.000000e+00 : f32
      %12 = vector.broadcast %cst_10 : f32 to vector<16x128xf32>
      %c0_11 = arith.constant 0 : index
      %c0_12 = arith.constant 0 : index
      %13 = vector.load %arg7[%c0_11, %c0_12] : memref<16x128xf32, #tpu.memory_space<vmem>>, vector<16x128xf32>
      tpu.vector_store %arg7[%c0_11, %c0_12], %12 {strides = array<i32>} : memref<16x128xf32, #tpu.memory_space<vmem>>, vector<16x128xf32>,
    } else {
    }
    %c0 = arith.constant 0 : index
    %c0_1 = arith.constant 0 : index
    %3 = vector.load %arg7[%c0, %c0_1] : memref<16x128xf32, #tpu.memory_space<vmem>>, vector<16x128xf32>
    %c0_2 = arith.constant 0 : index
    %c0_3 = arith.constant 0 : index
    %4 = vector.load %arg3[%c0_2, %c0_3] : memref<16x32xbf16, #tpu.memory_space<vmem>>, vector<16x32xbf16>
    %c0_4 = arith.constant 0 : index
    %c0_5 = arith.constant 0 : index
    %5 = vector.load %arg4[%c0_4, %c0_5] : memref<32x128xbf16, #tpu.memory_space<vmem>>, vector<32x128xbf16>
    %cst = arith.constant dense<0.000000e+00> : vector<16x128xf32>
    %6 = tpu.matmul %4, %5, %cst {dimension_numbers = #tpu.dot_dimension_numbers<[1], [0], [0], [1], [0, 0, 1, 1], [], []>} : vector<16x32xbf16>, vector<32x128xbf16>, vector<16x128xf32> -> vector<16x128xf32>
    %7 = arith.addf %3, %6 : vector<16x128xf32>
    %c0_6 = arith.constant 0 : index
    %c0_7 = arith.constant 0 : index
    %8 = vector.load %arg7[%c0_6, %c0_7] : memref<16x128xf32, #tpu.memory_space<vmem>>, vector<16x128xf32>
    tpu.vector_store %arg7[%c0_6, %c0_7], %7 {strides = array<i32>} : memref<16x128xf32, #tpu.memory_space<vmem>>, vector<16x128xf32>,
    %c0_i32_8 = arith.constant 0 : i32
    %9 = arith.cmpi eq, %arg2, %c0_i32_8 : i32
    %10 = arith.extui %9 : i1 to i32
    %c0_i32_9 = arith.constant 0 : i32
    %11 = arith.cmpi ne, %10, %c0_i32_9 : i32
    scf.if %11 {
      %c0_10 = arith.constant 0 : index
      %c0_11 = arith.constant 0 : index
      %12 = vector.load %arg7[%c0_10, %c0_11] : memref<16x128xf32, #tpu.memory_space<vmem>>, vector<16x128xf32>
      %c0_12 = arith.constant 0 : index
      %c0_13 = arith.constant 0 : index
      %13 = vector.load %arg5[%c0_12, %c0_13] : memref<1x128xf32, #tpu.memory_space<vmem>>, vector<1x128xf32>
      %14 = vector.broadcast %13 : vector<1x128xf32> to vector<16x128xf32>
      %15 = arith.addf %12, %14 : vector<16x128xf32>
      %cst_14 = arith.constant 5.000000e-01 : f32
      %16 = vector.broadcast %cst_14 : f32 to vector<16x128xf32>
      %17 = arith.mulf %16, %15 : vector<16x128xf32>
      %cst_15 = arith.constant 0.707106769 : f32
      %18 = vector.broadcast %cst_15 : f32 to vector<16x128xf32>
      %19 = arith.mulf %15, %18 : vector<16x128xf32>
      %cst_16 = arith.constant 0.000000e+00 : f32
      %20 = vector.broadcast %cst_16 : f32 to vector<16x128xf32>
      %21 = arith.cmpf oge, %19, %20 : vector<16x128xf32>
      %cst_17 = arith.constant 1.000000e+00 : f32
      %cst_18 = arith.constant -1.000000e+00 : f32
      %22 = vector.broadcast %cst_17 : f32 to vector<16x128xf32>
      %23 = vector.broadcast %cst_18 : f32 to vector<16x128xf32>
      %24 = arith.select %21, %22, %23 : vector<16x128xi1>, vector<16x128xf32>
      %25 = math.absf %19 : vector<16x128xf32>
      %cst_19 = arith.constant 0.327591091 : f32
      %26 = vector.broadcast %cst_19 : f32 to vector<16x128xf32>
      %27 = arith.mulf %26, %25 : vector<16x128xf32>
      %cst_20 = arith.constant 1.000000e+00 : f32
      %28 = vector.broadcast %cst_20 : f32 to vector<16x128xf32>
      %29 = arith.addf %28, %27 : vector<16x128xf32>
      %cst_21 = arith.constant 1.000000e+00 : f32
      %30 = vector.broadcast %cst_21 : f32 to vector<16x128xf32>
      %31 = arith.divf %30, %29 : vector<16x128xf32>
      %cst_22 = arith.constant 1.06140542 : f32
      %32 = vector.broadcast %cst_22 : f32 to vector<16x128xf32>
      %33 = arith.mulf %32, %31 : vector<16x128xf32>
      %cst_23 = arith.constant -1.45315206 : f32
      %34 = vector.broadcast %cst_23 : f32 to vector<16x128xf32>
      %35 = arith.addf %33, %34 : vector<16x128xf32>
      %36 = arith.mulf %35, %31 : vector<16x128xf32>
      %cst_24 = arith.constant 1.42141378 : f32
      %37 = vector.broadcast %cst_24 : f32 to vector<16x128xf32>
      %38 = arith.addf %36, %37 : vector<16x128xf32>
      %39 = arith.mulf %38, %31 : vector<16x128xf32>
      %cst_25 = arith.constant -0.284496725 : f32
      %40 = vector.broadcast %cst_25 : f32 to vector<16x128xf32>
      %41 = arith.addf %39, %40 : vector<16x128xf32>
      %42 = arith.mulf %41, %31 : vector<16x128xf32>
      %cst_26 = arith.constant 0.254829586 : f32
      %43 = vector.broadcast %cst_26 : f32 to vector<16x128xf32>
      %44 = arith.addf %42, %43 : vector<16x128xf32>
      %45 = arith.mulf %44, %31 : vector<16x128xf32>
      %cst_27 = arith.constant 0.000000e+00 : f32
      %46 = vector.broadcast %cst_27 : f32 to vector<16x128xf32>
      %47 = arith.subf %46, %25 : vector<16x128xf32>
      %48 = arith.mulf %47, %25 : vector<16x128xf32>
      %49 = math.exp %48 : vector<16x128xf32>
      %50 = arith.mulf %45, %49 : vector<16x128xf32>
      %cst_28 = arith.constant 1.000000e+00 : f32
      %51 = vector.broadcast %cst_28 : f32 to vector<16x128xf32>
      %52 = arith.subf %51, %50 : vector<16x128xf32>
      %53 = arith.mulf %24, %52 : vector<16x128xf32>
      %cst_29 = arith.constant 1.000000e+00 : f32
      %54 = vector.broadcast %cst_29 : f32 to vector<16x128xf32>
      %55 = arith.addf %54, %53 : vector<16x128xf32>
      %56 = arith.mulf %17, %55 : vector<16x128xf32>
      %c0_30 = arith.constant 0 : index
      %c0_31 = arith.constant 0 : index
      %57 = vector.load %arg6[%c0_30, %c0_31] : memref<16x128xf32, #tpu.memory_space<vmem>>, vector<16x128xf32>
      tpu.vector_store %arg6[%c0_30, %c0_31], %56 {strides = array<i32>} : memref<16x128xf32, #tpu.memory_space<vmem>>, vector<16x128xf32>,
    } else {
    }
    return
  }
  func.func @transform_0(%arg0: i32, %arg1: i32, %arg2: i32) -> (i32, i32) {
    %c0_i32 = arith.constant 0 : i32
    return %arg0, %arg2 : i32, i32
  }
  func.func @transform_1(%arg0: i32, %arg1: i32, %arg2: i32) -> (i32, i32) {
    %c0_i32 = arith.constant 0 : i32
    return %arg2, %arg1 : i32, i32
  }
  func.func @transform_2(%arg0: i32, %arg1: i32, %arg2: i32) -> (i32, i32) {
    %c0_i32 = arith.constant 0 : i32
    %c0_i32_0 = arith.constant 0 : i32
    return %c0_i32, %arg1 : i32, i32
  }
  func.func @transform_3(%arg0: i32, %arg1: i32, %arg2: i32) -> (i32, i32) {
    %c0_i32 = arith.constant 0 : i32
    return %arg0, %arg1 : i32, i32
  }
}

module attributes {stable_mosaic.version = 11 : i64} {
  func.func @_matmul_kernel(%arg0: i32, %arg1: i32, %arg2: i32, %arg3: memref<16x128xbf16, #tpu.memory_space<vmem>>, %arg4: memref<128x32xbf16, #tpu.memory_space<vmem>>, %arg5: memref<1x32xf32, #tpu.memory_space<vmem>>, %arg6: memref<16x32xf32, #tpu.memory_space<vmem>>, %arg7: memref<16x32xf32, #tpu.memory_space<vmem>>) attributes {dimension_semantics = [#tpu.dimension_semantics<parallel>, #tpu.dimension_semantics<parallel>, #tpu.dimension_semantics<arbitrary>], iteration_bounds = array<i64: 1, 1, 1>, scalar_prefetch = 0 : i64, scratch_operands = 1 : i64, tpu.core_type = #tpu.core_type<tc>, window_params = [{transform_indices = @transform_0, window_bounds = array<i64: 16, 128>}, {transform_indices = @transform_1, window_bounds = array<i64: 128, 32>}, {transform_indices = @transform_2, window_bounds = array<i64: 1, 32>}, {transform_indices = @transform_3, window_bounds = array<i64: 16, 32>}]} {
    %c0_i32 = arith.constant 0 : i32
    %0 = arith.cmpi eq, %arg2, %c0_i32 : i32
    %1 = arith.extui %0 : i1 to i32
    %c0_i32_0 = arith.constant 0 : i32
    %2 = arith.cmpi ne, %1, %c0_i32_0 : i32
    scf.if %2 {
      %cst_10 = arith.constant 0.000000e+00 : f32
      %12 = vector.broadcast %cst_10 : f32 to vector<16x32xf32>
      %c0_11 = arith.constant 0 : index
      %c0_12 = arith.constant 0 : index
      %13 = vector.load %arg7[%c0_11, %c0_12] : memref<16x32xf32, #tpu.memory_space<vmem>>, vector<16x32xf32>
      tpu.vector_store %arg7[%c0_11, %c0_12], %12 {strides = array<i32>} : memref<16x32xf32, #tpu.memory_space<vmem>>, vector<16x32xf32>,
    } else {
    }
    %c0 = arith.constant 0 : index
    %c0_1 = arith.constant 0 : index
    %3 = vector.load %arg7[%c0, %c0_1] : memref<16x32xf32, #tpu.memory_space<vmem>>, vector<16x32xf32>
    %c0_2 = arith.constant 0 : index
    %c0_3 = arith.constant 0 : index
    %4 = vector.load %arg3[%c0_2, %c0_3] : memref<16x128xbf16, #tpu.memory_space<vmem>>, vector<16x128xbf16>
    %c0_4 = arith.constant 0 : index
    %c0_5 = arith.constant 0 : index
    %5 = vector.load %arg4[%c0_4, %c0_5] : memref<128x32xbf16, #tpu.memory_space<vmem>>, vector<128x32xbf16>
    %cst = arith.constant dense<0.000000e+00> : vector<16x32xf32>
    %6 = tpu.matmul %4, %5, %cst {dimension_numbers = #tpu.dot_dimension_numbers<[1], [0], [0], [1], [0, 0, 1, 1], [], []>} : vector<16x128xbf16>, vector<128x32xbf16>, vector<16x32xf32> -> vector<16x32xf32>
    %7 = arith.addf %3, %6 : vector<16x32xf32>
    %c0_6 = arith.constant 0 : index
    %c0_7 = arith.constant 0 : index
    %8 = vector.load %arg7[%c0_6, %c0_7] : memref<16x32xf32, #tpu.memory_space<vmem>>, vector<16x32xf32>
    tpu.vector_store %arg7[%c0_6, %c0_7], %7 {strides = array<i32>} : memref<16x32xf32, #tpu.memory_space<vmem>>, vector<16x32xf32>,
    %c0_i32_8 = arith.constant 0 : i32
    %9 = arith.cmpi eq, %arg2, %c0_i32_8 : i32
    %10 = arith.extui %9 : i1 to i32
    %c0_i32_9 = arith.constant 0 : i32
    %11 = arith.cmpi ne, %10, %c0_i32_9 : i32
    scf.if %11 {
      %c0_10 = arith.constant 0 : index
      %c0_11 = arith.constant 0 : index
      %12 = vector.load %arg7[%c0_10, %c0_11] : memref<16x32xf32, #tpu.memory_space<vmem>>, vector<16x32xf32>
      %c0_12 = arith.constant 0 : index
      %c0_13 = arith.constant 0 : index
      %13 = vector.load %arg5[%c0_12, %c0_13] : memref<1x32xf32, #tpu.memory_space<vmem>>, vector<1x32xf32>
      %14 = vector.broadcast %13 : vector<1x32xf32> to vector<16x32xf32>
      %15 = arith.addf %12, %14 : vector<16x32xf32>
      %c0_14 = arith.constant 0 : index
      %c0_15 = arith.constant 0 : index
      %16 = vector.load %arg6[%c0_14, %c0_15] : memref<16x32xf32, #tpu.memory_space<vmem>>, vector<16x32xf32>
      tpu.vector_store %arg6[%c0_14, %c0_15], %15 {strides = array<i32>} : memref<16x32xf32, #tpu.memory_space<vmem>>, vector<16x32xf32>,
    } else {
    }
    return
  }
  func.func @transform_0(%arg0: i32, %arg1: i32, %arg2: i32) -> (i32, i32) {
    %c0_i32 = arith.constant 0 : i32
    return %arg0, %arg2 : i32, i32
  }
  func.func @transform_1(%arg0: i32, %arg1: i32, %arg2: i32) -> (i32, i32) {
    %c0_i32 = arith.constant 0 : i32
    return %arg2, %arg1 : i32, i32
  }
  func.func @transform_2(%arg0: i32, %arg1: i32, %arg2: i32) -> (i32, i32) {
    %c0_i32 = arith.constant 0 : i32
    %c0_i32_0 = arith.constant 0 : i32
    return %c0_i32, %arg1 : i32, i32
  }
  func.func @transform_3(%arg0: i32, %arg1: i32, %arg2: i32) -> (i32, i32) {
    %c0_i32 = arith.constant 0 : i32
    return %arg0, %arg1 : i32, i32
  }
}

module attributes {stable_mosaic.version = 11 : i64} {
  func.func @_matmul_kernel(%arg0: i32, %arg1: i32, %arg2: i32, %arg3: memref<16x32xbf16, #tpu.memory_space<vmem>>, %arg4: memref<64x32xbf16, #tpu.memory_space<vmem>>, %arg5: memref<1x64xf32, #tpu.memory_space<vmem>>, %arg6: memref<16x64xf32, #tpu.memory_space<vmem>>, %arg7: memref<16x64xf32, #tpu.memory_space<vmem>>) attributes {dimension_semantics = [#tpu.dimension_semantics<parallel>, #tpu.dimension_semantics<parallel>, #tpu.dimension_semantics<arbitrary>], iteration_bounds = array<i64: 1, 1, 1>, scalar_prefetch = 0 : i64, scratch_operands = 1 : i64, tpu.core_type = #tpu.core_type<tc>, window_params = [{transform_indices = @transform_0, window_bounds = array<i64: 16, 32>}, {transform_indices = @transform_1, window_bounds = array<i64: 64, 32>}, {transform_indices = @transform_2, window_bounds = array<i64: 1, 64>}, {transform_indices = @transform_3, window_bounds = array<i64: 16, 64>}]} {
    %c0_i32 = arith.constant 0 : i32
    %0 = arith.cmpi eq, %arg2, %c0_i32 : i32
    %1 = arith.extui %0 : i1 to i32
    %c0_i32_0 = arith.constant 0 : i32
    %2 = arith.cmpi ne, %1, %c0_i32_0 : i32
    scf.if %2 {
      %cst_10 = arith.constant 0.000000e+00 : f32
      %12 = vector.broadcast %cst_10 : f32 to vector<16x64xf32>
      %c0_11 = arith.constant 0 : index
      %c0_12 = arith.constant 0 : index
      %13 = vector.load %arg7[%c0_11, %c0_12] : memref<16x64xf32, #tpu.memory_space<vmem>>, vector<16x64xf32>
      tpu.vector_store %arg7[%c0_11, %c0_12], %12 {strides = array<i32>} : memref<16x64xf32, #tpu.memory_space<vmem>>, vector<16x64xf32>,
    } else {
    }
    %c0 = arith.constant 0 : index
    %c0_1 = arith.constant 0 : index
    %3 = vector.load %arg7[%c0, %c0_1] : memref<16x64xf32, #tpu.memory_space<vmem>>, vector<16x64xf32>
    %c0_2 = arith.constant 0 : index
    %c0_3 = arith.constant 0 : index
    %4 = vector.load %arg3[%c0_2, %c0_3] : memref<16x32xbf16, #tpu.memory_space<vmem>>, vector<16x32xbf16>
    %c0_4 = arith.constant 0 : index
    %c0_5 = arith.constant 0 : index
    %5 = vector.load %arg4[%c0_4, %c0_5] : memref<64x32xbf16, #tpu.memory_space<vmem>>, vector<64x32xbf16>
    %cst = arith.constant dense<0.000000e+00> : vector<16x64xf32>
    %6 = tpu.matmul %4, %5, %cst {dimension_numbers = #tpu.dot_dimension_numbers<[1], [1], [0], [0], [0, 0, 1, 0], [], []>} : vector<16x32xbf16>, vector<64x32xbf16>, vector<16x64xf32> -> vector<16x64xf32>
    %7 = arith.addf %3, %6 : vector<16x64xf32>
    %c0_6 = arith.constant 0 : index
    %c0_7 = arith.constant 0 : index
    %8 = vector.load %arg7[%c0_6, %c0_7] : memref<16x64xf32, #tpu.memory_space<vmem>>, vector<16x64xf32>
    tpu.vector_store %arg7[%c0_6, %c0_7], %7 {strides = array<i32>} : memref<16x64xf32, #tpu.memory_space<vmem>>, vector<16x64xf32>,
    %c0_i32_8 = arith.constant 0 : i32
    %9 = arith.cmpi eq, %arg2, %c0_i32_8 : i32
    %10 = arith.extui %9 : i1 to i32
    %c0_i32_9 = arith.constant 0 : i32
    %11 = arith.cmpi ne, %10, %c0_i32_9 : i32
    scf.if %11 {
      %c0_10 = arith.constant 0 : index
      %c0_11 = arith.constant 0 : index
      %12 = vector.load %arg7[%c0_10, %c0_11] : memref<16x64xf32, #tpu.memory_space<vmem>>, vector<16x64xf32>
      %c0_12 = arith.constant 0 : index
      %c0_13 = arith.constant 0 : index
      %13 = vector.load %arg5[%c0_12, %c0_13] : memref<1x64xf32, #tpu.memory_space<vmem>>, vector<1x64xf32>
      %14 = vector.broadcast %13 : vector<1x64xf32> to vector<16x64xf32>
      %15 = arith.addf %12, %14 : vector<16x64xf32>
      %c0_14 = arith.constant 0 : index
      %c0_15 = arith.constant 0 : index
      %16 = vector.load %arg6[%c0_14, %c0_15] : memref<16x64xf32, #tpu.memory_space<vmem>>, vector<16x64xf32>
      tpu.vector_store %arg6[%c0_14, %c0_15], %15 {strides = array<i32>} : memref<16x64xf32, #tpu.memory_space<vmem>>, vector<16x64xf32>,
    } else {
    }
    return
  }
  func.func @transform_0(%arg0: i32, %arg1: i32, %arg2: i32) -> (i32, i32) {
    %c0_i32 = arith.constant 0 : i32
    return %arg0, %arg2 : i32, i32
  }
  func.func @transform_1(%arg0: i32, %arg1: i32, %arg2: i32) -> (i32, i32) {
    %c0_i32 = arith.constant 0 : i32
    return %arg1, %arg2 : i32, i32
  }
  func.func @transform_2(%arg0: i32, %arg1: i32, %arg2: i32) -> (i32, i32) {
    %c0_i32 = arith.constant 0 : i32
    %c0_i32_0 = arith.constant 0 : i32
    return %c0_i32, %arg1 : i32, i32
  }
  func.func @transform_3(%arg0: i32, %arg1: i32, %arg2: i32) -> (i32, i32) {
    %c0_i32 = arith.constant 0 : i32
    return %arg0, %arg1 : i32, i32
  }
}

</mosaic_0001>

<bundles_post_ra>
// kernel: transformer_forward.63
= control target key start
LH: loop header
LB: loop body
LE: loop exit
PB: predicated region body
PF: predicated region fallthrough
CT: control target
= control target key end

     0   :  { %vm19_vm0 = vcmask 785408   ;;  %v105_v1 = vmov 0.0   ;;  %vm47_vm1 = vcmask 261120   ;;  %s150_s1 = inlined_call_operand.vmem [shape: bf16[32,96], index: 1, kind: input, shape index: {}]   ;;  %s151_s2 = inlined_call_operand.vmem [shape: f32[1,96], index: 2, kind: input, shape index: {}]   ;;  %s152_s0 = inlined_call_operand.vmem [shape: bf16[16,32], index: 0, kind: input, shape index: {}]   ;;  %s153_s3 = inlined_call_operand.vmem [shape: f32[16,96], index: 3, kind: output, shape index: {}]  }
   0x1   :  { %v102_v0 = vld [vmem:[%s150_s1 + $0x8] sm:$0xff]  ;;  %20 = vst.msk [vmem:[#allocation2] sm:$0xff] %vm19_vm0, %v105_v1  ;;  %v101_v2 = vld [vmem:[%s150_s1] sm:$0xff] }
   0x2   :  { %21 = vst.msk [vmem:[#allocation2 + $0x8] sm:$0xff] %vm19_vm0, %v105_v1  ;;  %57 = vmatpush.bf16.msra.mxu0 %v102_v0  ;;  %v100_v3 = vld [vmem:[%s152_s0] sm:$0xff] }
   0x3   :  { %v104_v8 = vld [vmem:[%s151_s2] ss:$0 sm:$0xff] }
   0x6   :  { %58 = vmatpush.bf16.msra.mxu0 %v101_v2 }
   0x8   :  { %v22_v4 = vld [vmem:[#allocation2] sm:$0xff] }
   0x9   :  { %99 = vmatmul.msk.bf16.vlgmr.msra.gmra.mxu0 %vm47_vm1, %v100_v3  ;;  %v23_v7 = vld [vmem:[#allocation2 + $0x8] sm:$0xff] }
  0x86   :  { %v60_v5 = vpop.f32.mrf.mxu0 }
  0x87   :  { %v65_v6 = vadd.f32 %v60_v5, %v22_v4 }
  0x89   :  { %68 = vst.msk [vmem:[#allocation2] sm:$0xff] %vm19_vm0, %v65_v6 }
  0x8e   :  { %v62_v9 = vpop.f32.mrf.mxu0 }
  0x8f   :  { %v66_v10 = vadd.f32 %v62_v9, %v23_v7 }
  0x90   :  { %v73_v11 = vld [vmem:[#allocation2] sm:$0xff] }
  0x91   :  { %v79_v12 = vadd.f32 %v104_v8, %v73_v11  ;;  %69 = vst.msk [vmem:[#allocation2 + $0x8] sm:$0xff] %vm19_vm0, %v66_v10 }
  0x93   :  { %81 = vst.msk [vmem:[%s153_s3] sm:$0xff] %vm19_vm0, %v79_v12 }
  0x98   :  { %v74_v13 = vld [vmem:[#allocation2 + $0x8] sm:$0xff] }
  0x99   :  { %v80_v14 = vadd.f32 %v104_v8, %v74_v13 }
  0x9b   :  { %82 = vst.msk [vmem:[%s153_s3 + $0x8] sm:$0xff] %vm19_vm0, %v80_v14 }

// kernel: transformer_forward.62
= control target key start
LH: loop header
LB: loop body
LE: loop exit
PB: predicated region body
PF: predicated region fallthrough
CT: control target
= control target key end

     0   :  { %vm16_vm0 = vcmask 261120   ;;  %v95_v4 = vmov 32.0   ;;  %s140_s0 = inlined_call_operand.vmem [shape: f32[16,32], index: 0, kind: input, shape index: {}]   ;;  %s141_s1 = inlined_call_operand.vmem [shape: f32[1,32], index: 1, kind: input, shape index: {}]   ;;  %s142_s2 = inlined_call_operand.vmem [shape: f32[1,32], index: 2, kind: input, shape index: {}]   ;;  %s143_s3 = inlined_call_operand.vmem [shape: f32[16,32], index: 3, kind: output, shape index: {}]  }
   0x1   :  { %v14_v0 = vld [vmem:[%s140_s0] sm:$0xff]  ;;  %v15_v2 = vld [vmem:[%s140_s0 + $0x8] sm:$0xff]  ;;  %89 = vrcp.f32 %v95_v4 }
   0x2   :  { %v17_v1 = vsel %vm16_vm0, %v14_v0, 0.0  ;;  %v20_v3 = vsel %vm16_vm0, %v15_v2, 0.0  ;;  %v87_v35 = vld [vmem:[%s141_s1] ss:$0 sm:$0xff] }
   0x3   :  { %18 = vadd.xlane.f32.xlu0 %v17_v1  ;;  %v88_v38 = vld [vmem:[%s142_s2] ss:$0 sm:$0xff] }
   0x7   :  { %v90_v5 = vpop.eup %89 }
   0x8   :  { %v24_v6 = vmul.f32 32.0, %v90_v5  ;;  %vm28_vm1 = vweird.f32 %v90_v5 }
   0xa   :  { %v25_v7 = vsub.f32 1.0, %v24_v6 }
   0xb   :  { %21 = vadd.xlane.f32.xlu0 %v20_v3 }
   0xc   :  { %v26_v8 = vmul.f32 %v90_v5, %v25_v7 }
   0xe   :  { %v27_v9 = vadd.f32 %v90_v5, %v26_v8 }
  0x10   :  { %v29_v10 = vsel %vm28_vm1, %v90_v5, %v27_v9 }
  0x76   :  { %v19_v11 = vpop.xlane.xlu0 %18 }
  0x77   :  { %v30_v12 = vmul.f32 %v29_v10, %v19_v11 }
  0x79   :  { %v32_v13 = vsub.f32 %v14_v0, %v30_v12 }
  0x7b   :  { %v34_v14 = vmul.f32 %v32_v13, %v32_v13 }
  0x7d   :  { %v36_v15 = vsel %vm16_vm0, %v34_v14, 0.0 }
  0x7e   :  { %37 = vadd.xlane.f32.xlu1 %v36_v15  ;;  %v22_v16 = vpop.xlane.xlu0 %21 }
  0x7f   :  { %v31_v17 = vmul.f32 %v29_v10, %v22_v16 }
  0x81   :  { %v33_v18 = vsub.f32 %v15_v2, %v31_v17 }
  0x83   :  { %v35_v19 = vmul.f32 %v33_v18, %v33_v18 }
  0x85   :  { %v39_v20 = vsel %vm16_vm0, %v35_v19, 0.0 }
  0x86   :  { %40 = vadd.xlane.f32.xlu1 %v39_v20 }
  0xf1   :  { %v38_v21 = vpop.xlane.xlu1 %37 }
  0xf2   :  { %v42_v22 = vmul.f32 %v38_v21, %v29_v10 }
  0xf4   :  { %v44_v23 = vadd.f32 1e-05, %v42_v22 }
  0xf6   :  { %91 = vrsqrt.f32 %v44_v23  ;;  %vm52_vm3 = vweird.f32 %v44_v23 }
  0xf9   :  { %v41_v24 = vpop.xlane.xlu1 %40 }
  0xfa   :  { %v43_v25 = vmul.f32 %v41_v24, %v29_v10 }
  0xfc   :  { %v92_v26 = vpop.eup %91  ;;  %v45_v27 = vadd.f32 1e-05, %v43_v25 }
  0xfd   :  { %v47_v28 = vmul.f32 %v92_v26, %v44_v23  ;;  %vm53_vm2 = vweird.f32 %v92_v26 }
  0xfe   :  { %93 = vrsqrt.f32 %v45_v27  ;;  %vm54_vm4 = vmor %vm52_vm3, %vm53_vm2  ;;  %vm62_vm6 = vweird.f32 %v45_v27 }
  0xff   :  { %v48_v29 = vmul.f32 %v92_v26, %v47_v28 }
 0x101   :  { %v49_v30 = vmul.f32 0.5, %v48_v29 }
 0x103   :  { %v50_v31 = vsub.f32 1.5, %v49_v30 }
 0x104   :  { %v94_v32 = vpop.eup %93 }
 0x105   :  { %v51_v33 = vmul.f32 %v92_v26, %v50_v31  ;;  %v57_v34 = vmul.f32 %v94_v32, %v45_v27  ;;  %vm63_vm5 = vweird.f32 %v94_v32 }
 0x106   :  { %vm64_vm7 = vmor %vm62_vm6, %vm63_vm5 }
 0x107   :  { %v55_v36 = vsel %vm54_vm4, %v92_v26, %v51_v33  ;;  %v58_v37 = vmul.f32 %v94_v32, %v57_v34 }
 0x108   :  { %v66_v39 = vmul.f32 %v55_v36, %v32_v13 }
 0x109   :  { %v59_v40 = vmul.f32 0.5, %v58_v37 }
 0x10a   :  { %v72_v41 = vmul.f32 %v87_v35, %v66_v39 }
 0x10b   :  { %v60_v42 = vsub.f32 1.5, %v59_v40 }
 0x10c   :  { %v78_v43 = vadd.f32 %v88_v38, %v72_v41 }
 0x10d   :  { %v61_v44 = vmul.f32 %v94_v32, %v60_v42 }
 0x10e   :  { %80 = vst.msk [vmem:[%s143_s3] sm:$0xff] %vm16_vm0, %v78_v43 }
 0x10f   :  { %v65_v45 = vsel %vm64_vm7, %v94_v32, %v61_v44 }
 0x110   :  { %v67_v46 = vmul.f32 %v65_v45, %v33_v18 }
 0x112   :  { %v73_v47 = vmul.f32 %v87_v35, %v67_v46 }
 0x114   :  { %v79_v48 = vadd.f32 %v88_v38, %v73_v47 }
 0x116   :  { %81 = vst.msk [vmem:[%s143_s3 + $0x8] sm:$0xff] %vm16_vm0, %v79_v48 }

// kernel: transformer_forward.64
= control target key start
LH: loop header
LB: loop body
LE: loop exit
PB: predicated region body
PF: predicated region fallthrough
CT: control target
= control target key end

     0   :  { %s582_s12 = smov 0   ;;  %s584_s13 = smov 0   ;;  %s642_s0 = inlined_call_operand.vmem [shape: bf16[8,8,8], index: 0, kind: input, shape index: {}]   ;;  %s643_s1 = inlined_call_operand.vmem [shape: bf16[8,8,8], index: 1, kind: input, shape index: {}]   ;;  %s644_s2 = inlined_call_operand.vmem [shape: bf16[8,8,8], index: 2, kind: input, shape index: {}]   ;;  %s645_s3 = inlined_call_operand.vmem [shape: f32[8,8,8], index: 3, kind: output, shape index: {}]  }
   0x1   :  { %s586_s14 = smov 0  }
   0x2 LB: > { %s32_s15 = sadd.s32 1, %s553_s13  ;;  %p490_p0 = scmp.ge.s32.totalorder %s557_s14, 1  ;;  %s557_s14 = sphi %s586_s14, %s13_s14   ;;  %s553_s13 = sphi %s584_s13, %s647_s13   ;;  %s549_s12 = sphi %s582_s12, %s646_s12  }
   0x3   : > { %p34_p1 = scmp.ge.s32.totalorder %s32_s15, 8  ;;  %p190_p2 = scmp.lt.s32.totalorder %s557_s14, 9 }
   0x5   : > { %s649_s15 = smov (%p34_p1, %s32_s15), 0  ;;  %p191_p3 = pnand %p490_p0, %p190_p2 }
   0x6   : > { %p232_p4 = scmp.lt.s32.totalorder (!%p191_p3), %s549_s12, 7 }
   0x7   : > { %194 = sbr.rel (%p191_p3) target bundleno = 624 (0x270), region = 32 }
   0xc   : > { %s651_s12 = smov (!%p232_p4, %s549_s12), 7  ;;  %vm268_vm0 = vcmask 64512   ;;  %vm265_vm1 = vcmask 7168   ;;  %v559_v3 = vmov -1e+30   ;;  %v300_v4 = vlaneseq }
   0xd   : > { %s603_s16 = sshll.u32 %s651_s12, 2  ;;  %266 = vst.msk [vmem:[#allocation2] sm:$0xff] %vm265_vm1, %v559_v3  ;;  %v560_v11 = vmov 0   ;;  %v561_v12 = vmov 0.0   ;;  %vm345_vm3 = vcmask 1043456   ;;  %s494_s26 = sshll.u32 %s651_s12, 3 }
   0xe   : > { %s245_s19 = scalar_lea.vmem %s643_s1, %s603_s16  ;;  %s238_s22 = scalar_lea.vmem %s642_s0, %s603_s16  ;;  %v301_v5 = vand.u32 127, %v300_v4  ;;  %v305_v6 = vshrl.u32 %v300_v4, 7  ;;  %526 = vset.pattern.permute.xlu0 %v560_v11  ;;  %527 = vset.pattern.permute.xlu1 %v560_v11  ;;  %267 = vst.msk [vmem:[#allocation3] sm:$0xff] %vm265_vm1, %v561_v12 }
   0xf   : > { %v278_v0 = vld [vmem:[%s245_s19] sm:$0xf]  ;;  %528 = vset.pattern.permute.xlu2 %v560_v11  ;;  %269 = vst.msk [vmem:[#allocation4] sm:$0xff] %vm268_vm0, %v561_v12  ;;  %s252_s25 = scalar_lea.vmem %s644_s2, %s603_s16  ;;  %s259_s29 = scalar_lea.vmem %s645_s3, %s494_s26 }
  0x10   : > { %v285_v1 = vsel %vm268_vm0, %v278_v0, 0  ;;  %v277_v2 = vld [vmem:[%s238_s22] sm:$0xf]  ;;  %vm308_vm2 = vcmp.le.s32.totalorder %v301_v5, %v305_v6 }
  0x11   : > { %294 = vmatpush.bf16.xpose.msra.mxu0 %v285_v1  ;;  %v279_v17 = vld [vmem:[%s252_s25] sm:$0xf] }
  0x12   : > { %v347_v18 = vsel %vm345_vm3, %v279_v17, 0 }
  0x13   : > { %356 = vmatpush.bf16.msra.mxu1 %v347_v18 }
  0x14   : > { %v310_v13 = vld [vmem:[#allocation2] sm:$0xff] }
  0x15   : > { %v326_v27 = vld [vmem:[#allocation3] sm:$0xff] }
  0x16   : > { %v334_v35 = vld [vmem:[#allocation4] sm:$0xff] }
  0x18   : > { %495 = vmatmul.msk.bf16.vlgmr.msra.gmra.mxu0 %vm268_vm0, %v277_v2 }
  0x95   : > { %v296_v7 = vpop.f32.mrf.mxu0 }
  0x96   : > { %v309_v8 = vsel %vm308_vm2, %v296_v7, -1e+30 }
  0x97   : > { %v311_v9 = vsel %vm268_vm0, %v309_v8, -inf }
  0x98   : > { %312 = vmax.xlane.f32.xlu0 %v311_v9 }
  0x9d   : > { %v298_v10 = vpop.f32.mrf.mxu0 }
 0x10b   : > { %v313_v14 = vpop.xlane.xlu0 %312 }
 0x10c   : > { %v314_v15 = vmax.f32 %v310_v13, %v313_v14 }
 0x10e   : > { %v315_v16 = vsub.f32 %v310_v13, %v314_v15  ;;  %364 = vst.msk [vmem:[#allocation2] sm:$0xff] %vm265_vm1, %v314_v15  ;;  %320 = vperm.xlu0 %526, %v314_v15  }
 0x110   : > { %v316_v25 = vmul.f32 1.442695, %v315_v16 }
 0x180   : > { %v321_v19 = vpop.permute.xlu0 %320 }
 0x181   : > { %v323_v20 = vsub.f32 %v309_v8, %v321_v19 }
 0x183   : > { %v324_v21 = vmul.f32 1.442695, %v323_v20 }
 0x185   : > { %529 = vpow2.f32 %v324_v21 }
 0x186   : > { %531 = vpow2.f32 %v316_v25 }
 0x18b   : > { %v530_v22 = vpop.eup %529 }
 0x18c   : > { %v328_v23 = vsel %vm268_vm0, %v530_v22, 0.0  ;;  %v341_v24 = vpack.c.bf16 %v530_v22, %v530_v22  ;;  %v532_v26 = vpop.eup %531 }
 0x18d   : > { %329 = vadd.xlane.f32.xlu1 %v328_v23  ;;  %v327_v28 = vmul.f32 %v532_v26, %v326_v27 }
 0x18e   : > { %496 = vmatmul.msk.bf16.vlgmr.msra.gmra.mxu1 %vm268_vm0, %v341_v24 }
 0x1a6   : > { %337 = vperm.xlu1 %527, %v532_v26  }
 0x200   : > { %v330_v29 = vpop.xlane.xlu1 %329 }
 0x201   : > { %v331_v30 = vadd.f32 %v330_v29, %v327_v28 }
 0x203   : > { %333 = vst.msk [vmem:[#allocation3] sm:$0xff] %vm265_vm1, %v331_v30 }
 0x20a   : > { %v369_v31 = vld [vmem:[#allocation3] sm:$0xff] }
 0x20b   : > { %v358_v32 = vpop.f32.mrf.mxu1  ;;  %533 = vrcp.f32 %v369_v31 }
 0x211   : > { %v534_v33 = vpop.eup %533 }
 0x212   : > { %373 = vperm.xlu2 %528, %v534_v33  }
 0x213   : > { %v360_v34 = vpop.f32.mrf.mxu1 }
 0x218   : > { %v338_v36 = vpop.permute.xlu1 %337 }
 0x219   : > { %v340_v37 = vmul.f32 %v338_v36, %v334_v35 }
 0x21b   : > { %v362_v38 = vadd.f32 %v358_v32, %v340_v37 }
 0x21d   : > { %363 = vst.msk [vmem:[#allocation4] sm:$0xff] %vm268_vm0, %v362_v38 }
 0x224   : > { %v368_v39 = vld [vmem:[#allocation4] sm:$0xff] }
 0x26c   : > { %v374_v40 = vpop.permute.xlu2 %373 }
 0x26d   : > { %v376_v41 = vmul.f32 %v374_v40, %v368_v39 }
 0x26f   : > { %378 = vst.msk [vmem:[%s259_s29] sm:$0xff] %vm268_vm0, %v376_v41 }
 0x270 PF: > { %s13_s14 = sadd.s32 1, %s557_s14   ;;  %s646_s12 = smov %s553_s13 }
 0x271   : > { %p10_p5 = scmp.ge.s32.totalorder %s13_s14, 10   ;;  %s647_s13 = smov %s649_s15 }
 0x273   :  { %12 = sbr.rel (!%p10_p5) target bundleno = 2 (0x2), region = 80 }

// kernel: transformer_forward.65
= control target key start
LH: loop header
LB: loop body
LE: loop exit
PB: predicated region body
PF: predicated region fallthrough
CT: control target
= control target key end

     0   :  { %vm19_vm0 = vcmask 261120   ;;  %v104_v1 = vmov 0.0   ;;  %s150_s1 = inlined_call_operand.vmem [shape: bf16[32,32], index: 1, kind: input, shape index: {}]   ;;  %s151_s2 = inlined_call_operand.vmem [shape: f32[1,32], index: 2, kind: input, shape index: {}]   ;;  %s152_s0 = inlined_call_operand.vmem [shape: bf16[16,32], index: 0, kind: input, shape index: {}]   ;;  %s153_s3 = inlined_call_operand.vmem [shape: f32[16,32], index: 3, kind: output, shape index: {}]  }
   0x1   :  { %v101_v0 = vld [vmem:[%s150_s1 + $0x8] sm:$0xff]  ;;  %20 = vst.msk [vmem:[#allocation2] sm:$0xff] %vm19_vm0, %v104_v1  ;;  %v100_v2 = vld [vmem:[%s150_s1] sm:$0xff] }
   0x2   :  { %21 = vst.msk [vmem:[#allocation2 + $0x8] sm:$0xff] %vm19_vm0, %v104_v1  ;;  %57 = vmatpush.bf16.msra.mxu0 %v101_v0  ;;  %v99_v3 = vld [vmem:[%s152_s0] sm:$0xff] }
   0x3   :  { %v103_v8 = vld [vmem:[%s151_s2] ss:$0 sm:$0xff] }
   0x6   :  { %58 = vmatpush.bf16.msra.mxu0 %v100_v2 }
   0x8   :  { %v22_v4 = vld [vmem:[#allocation2] sm:$0xff] }
   0x9   :  { %98 = vmatmul.msk.bf16.vlgmr.msra.gmra.mxu0 %vm19_vm0, %v99_v3  ;;  %v23_v7 = vld [vmem:[#allocation2 + $0x8] sm:$0xff] }
  0x86   :  { %v60_v5 = vpop.f32.mrf.mxu0 }
  0x87   :  { %v65_v6 = vadd.f32 %v60_v5, %v22_v4 }
  0x89   :  { %67 = vst.msk [vmem:[#allocation2] sm:$0xff] %vm19_vm0, %v65_v6 }
  0x8e   :  { %v62_v9 = vpop.f32.mrf.mxu0 }
  0x8f   :  { %v66_v10 = vadd.f32 %v62_v9, %v23_v7 }
  0x90   :  { %v72_v11 = vld [vmem:[#allocation2] sm:$0xff] }
  0x91   :  { %v78_v12 = vadd.f32 %v103_v8, %v72_v11  ;;  %68 = vst.msk [vmem:[#allocation2 + $0x8] sm:$0xff] %vm19_vm0, %v66_v10 }
  0x93   :  { %80 = vst.msk [vmem:[%s153_s3] sm:$0xff] %vm19_vm0, %v78_v12 }
  0x98   :  { %v73_v13 = vld [vmem:[#allocation2 + $0x8] sm:$0xff] }
  0x99   :  { %v79_v14 = vadd.f32 %v103_v8, %v73_v13 }
  0x9b   :  { %81 = vst.msk [vmem:[%s153_s3 + $0x8] sm:$0xff] %vm19_vm0, %v79_v14 }

// kernel: transformer_forward.45
= control target key start
LH: loop header
LB: loop body
LE: loop exit
PB: predicated region body
PF: predicated region fallthrough
CT: control target
= control target key end

     0   :  { %s546_s9 = smov 0   ;;  %s548_s10 = smov 0   ;;  %s611_s0 = inlined_call_operand.vmem [shape: bf16[2,18,8], index: 0, kind: input, shape index: {}]   ;;  %s612_s1 = inlined_call_operand.vmem [shape: bf16[24,32], index: 1, kind: input, shape index: {}]   ;;  %s613_s2 = inlined_call_operand.vmem [shape: f32[2,16,32], index: 2, kind: output, shape index: {}]  }
   0x1   :  { %s550_s11 = smov 0  }
   0x2 LB: > { %s24_s12 = sadd.s32 1, %s524_s10  ;;  %p457_p0 = scmp.ge.s32.totalorder %s528_s11, 1  ;;  %s528_s11 = sphi %s550_s11, %s12_s11   ;;  %s524_s10 = sphi %s548_s10, %s615_s10   ;;  %s520_s9 = sphi %s546_s9, %s614_s9  }
   0x3   : > { %p26_p1 = scmp.ge.s32.totalorder %s24_s12, 2  ;;  %p135_p2 = scmp.lt.s32.totalorder %s528_s11, 3 }
   0x5   : > { %s617_s12 = smov (%p26_p1, %s24_s12), 0  ;;  %p136_p3 = pnand %p457_p0, %p135_p2 }
   0x6   : > { %p164_p4 = scmp.lt.s32.totalorder (!%p136_p3), %s520_s9, 1 }
   0x7   : > { %139 = sbr.rel (%p136_p3) target bundleno = 220 (0xdc), region = 28 }
   0xc   : > { %v185_v0 = vld [vmem:[%s612_s1] sm:$0xf]  ;;  %vm212_vm0 = vcmask 1043456   ;;  %v249_v2 = vld [vmem:[%s612_s1 + $0x8] sm:$0xf]  ;;  %s619_s9 = smov (!%p164_p4, %s520_s9), 1 }
   0xd   : > { %v233_v1 = vsel %vm212_vm0, %v185_v0, 0  ;;  %v186_v3 = vld [vmem:[%s612_s1 + $0x4] sm:$0xf]  ;;  %v258_v4 = vsel %vm212_vm0, %v249_v2, 0  ;;  %s472_s19 = smul.u32 12, %s619_s9  ;;  %vm208_vm1 = vcmask 64512  }
   0xe   : > { %242 = vmatpush.bf16.msra.mxu1 %v233_v1  ;;  %v214_v5 = vsel %vm212_vm0, %v186_v3, 0  ;;  %267 = vmatpush.bf16.msra.mxu2 %v258_v4  ;;  %vm250_vm2 = vcmask 1046528   ;;  %vm195_vm3 = vsmask.f32 7424  ;;  %s470_s23 = sshll.u32 %s619_s9, 4  ;;  %vm356_vm13 = vcmask 261120  }
   0xf   : > { %223 = vmatpush.bf16.msra.mxu0 %v214_v5  ;;  %s168_s22 = scalar_lea.vmem %s611_s0, %s472_s19  ;;  %s180_s26 = scalar_lea.vmem %s613_s2, %s470_s23 }
  0x10   : > { %v471_v6 = vld [vmem:[%s168_s22] sm:$0xff]  ;;  %v184_v7 = vld [vmem:[%s168_s22 + $0x8] sm:$0x1] }
  0x11   : > { %v192_v8 = vunpack.c.l.b16 %v184_v7  ;;  %466 = vmatmul.msk.bf16.vlgmr.msra.gmra.mxu1 %vm208_vm1, %v471_v6  ;;  %v197_v9 = vshrl.u32 %v471_v6, 16  ;;  %v199_v10 = vshll.u32 %v471_v6, 16  ;;  %v251_v12 = vrot.slane %v471_v6, 1 }
  0x13   : > { %v194_v11 = vpack.c.b16 %v192_v8, %v192_v8  ;;  %v201_v13 = vrot.slane %v199_v10, 1 }
  0x15   : > { %v252_v14 = vrot.slane %v194_v11, 1  ;;  %v204_v15 = vshll.u32 %v194_v11, 16  ;;  %v202_v16 = vor.u32 %v201_v13, %v197_v9 }
  0x17   : > { %v253_v17 = vsel %vm250_vm2, %v251_v12, %v252_v14  ;;  %v206_v18 = vrot.slane %v204_v15, 1 }
  0x18   : > { %467 = vmatmul.msk.bf16.vlgmr.msra.gmra.mxu2 %vm208_vm1, %v253_v17 }
  0x19   : > { %v207_v19 = vsel %vm195_vm3, %v202_v16, %v206_v18  ;;  %v530_v18 = vmov -1.0  }
  0x1a   : > { %465 = vmatmul.msk.bf16.vlgmr.msra.gmra.mxu0 %vm208_vm1, %v207_v19 }
  0x8e   : > { %v244_v20 = vpop.f32.mrf.mxu1 }
  0x96   : > { %v246_v28 = vpop.f32.mrf.mxu1 }
  0x97   : > { %v225_v21 = vpop.f32.mrf.mxu0 }
  0x98   : > { %v245_v22 = vadd.f32 %v244_v20, %v225_v21 }
  0x9b   : > { %v269_v23 = vpop.f32.mrf.mxu2 }
  0x9c   : > { %v582_v24 = vadd.f32 %v269_v23, %v245_v22 }
  0x9e   : > { %v585_v25 = vmul.f32 0.70710677, %v582_v24  ;;  %v276_v23 = vmul.f32 0.5, %v582_v24 }
  0x9f   : > { %v227_v26 = vpop.f32.mrf.mxu0 }
  0xa0   : > { %v284_v27 = vand.u32 2147483647, %v585_v25  ;;  %v247_v30 = vadd.f32 %v246_v28, %v227_v26  ;;  %vm280_vm12 = vcmp.ge.f32.partialorder %v585_v25, 0.0 }
  0xa1   : > { %v282_v19 = vsel %vm280_vm12, 1.0, %v530_v18 }
  0xa2   : > { %v286_v29 = vmul.f32 0.3275911, %v284_v27  ;;  %v338_v49 = vsub.f32 0.0, %v284_v27 }
  0xa3   : > { %v271_v31 = vpop.f32.mrf.mxu2 }
  0xa4   : > { %v288_v32 = vadd.f32 1.0, %v286_v29  ;;  %v588_v33 = vadd.f32 %v271_v31, %v247_v30  ;;  %v340_v55 = vmul.f32 %v338_v49, %v284_v27 }
  0xa6   : > { %498 = vrcp.f32 %v288_v32  ;;  %v591_v34 = vmul.f32 0.70710677, %v588_v33  ;;  %v301_v41 = vand.u32 2147483648, %v288_v32  ;;  %v299_v43 = vand.u32 2147483647, %v288_v32 }
  0xa7   : > { %vm295_vm5 = vweird.f32 %v288_v32  ;;  %v342_v62 = vmul.f32 1.442695, %v340_v55 }
  0xa8   : > { %v285_v35 = vand.u32 2147483647, %v591_v34  ;;  %v302_v45 = vor.u32 1.1754944e-38, %v301_v41  ;;  %vm300_vm7 = vcmp.eq.f32.partialorder %v299_v43, 8.507059e+37  ;;  %vm281_vm14 = vcmp.ge.f32.partialorder %v591_v34, 0.0 }
  0xa9   : > { %v283_v31 = vsel %vm281_vm14, 1.0, %v530_v18 }
  0xaa   : > { %v287_v36 = vmul.f32 0.3275911, %v285_v35  ;;  %v339_v2 = vsub.f32 0.0, %v285_v35 }
  0xac   : > { %v499_v37 = vpop.eup %498  ;;  %v289_v39 = vadd.f32 1.0, %v287_v36  ;;  %v341_v7 = vmul.f32 %v339_v2, %v285_v35  ;;  %v277_v35 = vmul.f32 0.5, %v588_v33 }
  0xad   : > { %v291_v38 = vmul.f32 %v499_v37, %v288_v32  ;;  %vm296_vm4 = vweird.f32 %v499_v37 }
  0xae   : > { %500 = vrcp.f32 %v289_v39  ;;  %vm297_vm6 = vmor %vm295_vm5, %vm296_vm4  ;;  %v316_v54 = vand.u32 2147483648, %v289_v39  ;;  %v314_v57 = vand.u32 2147483647, %v289_v39  ;;  %vm310_vm9 = vweird.f32 %v289_v39 }
  0xaf   : > { %v292_v40 = vsub.f32 1.0, %v291_v38  ;;  %502 = vpow2.f32 %v342_v62  ;;  %v344_v12 = vmul.f32 1.442695, %v341_v7 }
  0xb0   : > { %v317_v61 = vor.u32 1.1754944e-38, %v316_v54  ;;  %vm315_vm11 = vcmp.eq.f32.partialorder %v314_v57, 8.507059e+37 }
  0xb1   : > { %v293_v42 = vmul.f32 %v499_v37, %v292_v40  ;;  %504 = vpow2.f32 %v344_v12 }
  0xb3   : > { %v294_v44 = vadd.f32 %v499_v37, %v293_v42 }
  0xb4   : > { %v501_v46 = vpop.eup %500 }
  0xb5   : > { %v298_v47 = vsel %vm297_vm6, %v499_v37, %v294_v44  ;;  %v306_v50 = vmul.f32 %v501_v46, %v289_v39  ;;  %vm311_vm8 = vweird.f32 %v501_v46  ;;  %v503_v13 = vpop.eup %502 }
  0xb6   : > { %v303_v48 = vsel %vm300_vm7, %v302_v45, %v298_v47  ;;  %vm312_vm10 = vmor %vm310_vm9, %vm311_vm8 }
  0xb7   : > { %v320_v51 = vmul.f32 1.0614054, %v303_v48  ;;  %v307_v52 = vsub.f32 1.0, %v306_v50  ;;  %v505_v25 = vpop.eup %504 }
  0xb9   : > { %v322_v53 = vadd.f32 -1.4531521, %v320_v51  ;;  %v308_v56 = vmul.f32 %v501_v46, %v307_v52 }
  0xbb   : > { %v324_v58 = vmul.f32 %v322_v53, %v303_v48  ;;  %v309_v59 = vadd.f32 %v501_v46, %v308_v56 }
  0xbd   : > { %v326_v60 = vadd.f32 1.4214138, %v324_v58  ;;  %v313_v63 = vsel %vm312_vm10, %v501_v46, %v309_v59 }
  0xbe   : > { %v318_v1 = vsel %vm315_vm11, %v317_v61, %v313_v63 }
  0xbf   : > { %v328_v0 = vmul.f32 %v326_v60, %v303_v48  ;;  %v321_v3 = vmul.f32 1.0614054, %v318_v1 }
  0xc1   : > { %v330_v4 = vadd.f32 -0.28449672, %v328_v0  ;;  %v323_v5 = vadd.f32 -1.4531521, %v321_v3 }
  0xc3   : > { %v332_v6 = vmul.f32 %v330_v4, %v303_v48  ;;  %v325_v8 = vmul.f32 %v323_v5, %v318_v1 }
  0xc5   : > { %v334_v9 = vadd.f32 0.2548296, %v332_v6  ;;  %v327_v10 = vadd.f32 1.4214138, %v325_v8 }
  0xc7   : > { %v336_v11 = vmul.f32 %v334_v9, %v303_v48  ;;  %v329_v14 = vmul.f32 %v327_v10, %v318_v1 }
  0xc9   : > { %v346_v15 = vmul.f32 %v503_v13, %v336_v11  ;;  %v331_v16 = vadd.f32 -0.28449672, %v329_v14 }
  0xcb   : > { %v348_v17 = vsub.f32 1.0, %v346_v15  ;;  %v333_v20 = vmul.f32 %v331_v16, %v318_v1 }
  0xcd   : > { %v350_v21 = vmul.f32 %v348_v17, %v282_v19  ;;  %v335_v22 = vadd.f32 0.2548296, %v333_v20 }
  0xcf   : > { %v352_v26 = vadd.f32 1.0, %v350_v21  ;;  %v337_v27 = vmul.f32 %v335_v22, %v318_v1 }
  0xd1   : > { %v354_v28 = vmul.f32 %v352_v26, %v276_v23  ;;  %v347_v29 = vmul.f32 %v505_v25, %v337_v27 }
  0xd3   : > { %357 = vst.msk [vmem:[%s180_s26] sm:$0xff] %vm356_vm13, %v354_v28  ;;  %v349_v30 = vsub.f32 1.0, %v347_v29 }
  0xd5   : > { %v351_v32 = vmul.f32 %v349_v30, %v283_v31 }
  0xd7   : > { %v353_v36 = vadd.f32 1.0, %v351_v32 }
  0xd9   : > { %v355_v24 = vmul.f32 %v353_v36, %v277_v35 }
  0xdb   : > { %358 = vst.msk [vmem:[%s180_s26 + $0x8] sm:$0xff] %vm356_vm13, %v355_v24 }
  0xdc PF: > { %s12_s11 = sadd.s32 1, %s528_s11   ;;  %s614_s9 = smov %s524_s10 }
  0xdd   : > { %p9_p5 = scmp.ge.s32.totalorder %s12_s11, 4   ;;  %s615_s10 = smov %s617_s12 }
  0xdf   :  { %11 = sbr.rel (!%p9_p5) target bundleno = 2 (0x2), region = 61 }

// kernel: transformer_forward.47
= control target key start
LH: loop header
LB: loop body
LE: loop exit
PB: predicated region body
PF: predicated region fallthrough
CT: control target
= control target key end

     0   :  { %vm18_vm0 = vcmask 261120   ;;  %v151_v8 = vmov 32.0   ;;  %s229_s0 = inlined_call_operand.vmem [shape: f32[32,32], index: 0, kind: input, shape index: {}]   ;;  %s230_s1 = inlined_call_operand.vmem [shape: f32[1,32], index: 1, kind: input, shape index: {}]   ;;  %s231_s2 = inlined_call_operand.vmem [shape: f32[1,32], index: 2, kind: input, shape index: {}]   ;;  %s232_s3 = inlined_call_operand.vmem [shape: f32[32,32], index: 3, kind: output, shape index: {}]  }
   0x1   :  { %v16_v0 = vld [vmem:[%s229_s0 + $0x10] sm:$0xff]  ;;  %v14_v1 = vld [vmem:[%s229_s0] sm:$0xff]  ;;  %v17_v4 = vld [vmem:[%s229_s0 + $0x18] sm:$0xff]  ;;  %141 = vrcp.f32 %v151_v8 }
   0x2   :  { %v25_v2 = vsel %vm18_vm0, %v16_v0, 0.0  ;;  %v19_v3 = vsel %vm18_vm0, %v14_v1, 0.0  ;;  %v15_v5 = vld [vmem:[%s229_s0 + $0x8] sm:$0xff]  ;;  %v28_v6 = vsel %vm18_vm0, %v17_v4, 0.0  ;;  %v139_v61 = vld [vmem:[%s230_s1] ss:$0 sm:$0xff] }
   0x3   :  { %26 = vadd.xlane.f32.xlu1 %v25_v2  ;;  %20 = vadd.xlane.f32.xlu0 %v19_v3  ;;  %v22_v7 = vsel %vm18_vm0, %v15_v5, 0.0  ;;  %v140_v2 = vld [vmem:[%s231_s2] ss:$0 sm:$0xff] }
   0x7   :  { %v142_v9 = vpop.eup %141 }
   0x8   :  { %v32_v10 = vmul.f32 32.0, %v142_v9  ;;  %vm36_vm1 = vweird.f32 %v142_v9 }
   0xa   :  { %v33_v11 = vsub.f32 1.0, %v32_v10 }
   0xb   :  { %29 = vadd.xlane.f32.xlu1 %v28_v6  ;;  %23 = vadd.xlane.f32.xlu0 %v22_v7 }
   0xc   :  { %v34_v12 = vmul.f32 %v142_v9, %v33_v11 }
   0xe   :  { %v35_v13 = vadd.f32 %v142_v9, %v34_v12 }
  0x10   :  { %v37_v14 = vsel %vm36_vm1, %v142_v9, %v35_v13 }
  0x76   :  { %v27_v15 = vpop.xlane.xlu1 %26  ;;  %v21_v16 = vpop.xlane.xlu0 %20 }
  0x77   :  { %v40_v17 = vmul.f32 %v37_v14, %v27_v15  ;;  %v38_v18 = vmul.f32 %v37_v14, %v21_v16 }
  0x79   :  { %v188_v19 = vsub.f32 %v16_v0, %v40_v17  ;;  %v42_v20 = vsub.f32 %v14_v1, %v38_v18 }
  0x7b   :  { %v48_v21 = vmul.f32 %v188_v19, %v188_v19  ;;  %v46_v22 = vmul.f32 %v42_v20, %v42_v20 }
  0x7d   :  { %v56_v23 = vsel %vm18_vm0, %v48_v21, 0.0  ;;  %v50_v24 = vsel %vm18_vm0, %v46_v22, 0.0 }
  0x7e   :  { %v30_v25 = vpop.xlane.xlu1 %29  ;;  %57 = vadd.xlane.f32.xlu0 %v56_v23  ;;  %51 = vadd.xlane.f32.xlu2 %v50_v24  ;;  %v24_v26 = vpop.xlane.xlu0 %23 }
  0x7f   :  { %v41_v27 = vmul.f32 %v37_v14, %v30_v25  ;;  %v39_v28 = vmul.f32 %v37_v14, %v24_v26 }
  0x81   :  { %v194_v29 = vsub.f32 %v17_v4, %v41_v27  ;;  %v196_v30 = vsub.f32 %v15_v5, %v39_v28 }
  0x83   :  { %v49_v31 = vmul.f32 %v194_v29, %v194_v29  ;;  %v47_v32 = vmul.f32 %v196_v30, %v196_v30 }
  0x85   :  { %v59_v33 = vsel %vm18_vm0, %v49_v31, 0.0  ;;  %v53_v34 = vsel %vm18_vm0, %v47_v32, 0.0 }
  0x86   :  { %60 = vadd.xlane.f32.xlu1 %v59_v33  ;;  %54 = vadd.xlane.f32.xlu2 %v53_v34 }
  0xf1   :  { %v52_v35 = vpop.xlane.xlu2 %51  ;;  %v58_v36 = vpop.xlane.xlu0 %57 }
  0xf2   :  { %v62_v37 = vmul.f32 %v52_v35, %v37_v14  ;;  %v64_v38 = vmul.f32 %v58_v36, %v37_v14 }
  0xf4   :  { %v66_v39 = vadd.f32 1e-05, %v62_v37  ;;  %v68_v40 = vadd.f32 1e-05, %v64_v38 }
  0xf6   :  { %143 = vrsqrt.f32 %v66_v39  ;;  %vm76_vm4 = vweird.f32 %v66_v39  ;;  %vm96_vm6 = vweird.f32 %v68_v40 }
  0xf7   :  { %145 = vrsqrt.f32 %v68_v40 }
  0xf9   :  { %v61_v41 = vpop.xlane.xlu1 %60  ;;  %v55_v42 = vpop.xlane.xlu2 %54 }
  0xfa   :  { %v65_v43 = vmul.f32 %v61_v41, %v37_v14  ;;  %v63_v44 = vmul.f32 %v55_v42, %v37_v14 }
  0xfc   :  { %v144_v45 = vpop.eup %143  ;;  %v69_v46 = vadd.f32 1e-05, %v65_v43  ;;  %v67_v47 = vadd.f32 1e-05, %v63_v44 }
  0xfd   :  { %v146_v48 = vpop.eup %145  ;;  %v71_v49 = vmul.f32 %v144_v45, %v66_v39  ;;  %vm77_vm2 = vweird.f32 %v144_v45 }
  0xfe   :  { %v91_v50 = vmul.f32 %v146_v48, %v68_v40  ;;  %147 = vrsqrt.f32 %v69_v46  ;;  %vm97_vm3 = vweird.f32 %v146_v48  ;;  %vm78_vm5 = vmor %vm76_vm4, %vm77_vm2  ;;  %vm106_vm10 = vweird.f32 %v69_v46 }
  0xff   :  { %v72_v51 = vmul.f32 %v144_v45, %v71_v49  ;;  %149 = vrsqrt.f32 %v67_v47  ;;  %vm98_vm7 = vmor %vm96_vm6, %vm97_vm3  ;;  %vm86_vm12 = vweird.f32 %v67_v47 }
 0x100   :  { %v92_v52 = vmul.f32 %v146_v48, %v91_v50 }
 0x101   :  { %v73_v53 = vmul.f32 0.5, %v72_v51 }
 0x102   :  { %v93_v54 = vmul.f32 0.5, %v92_v52 }
 0x103   :  { %v74_v55 = vsub.f32 1.5, %v73_v53 }
 0x104   :  { %v148_v56 = vpop.eup %147  ;;  %v94_v57 = vsub.f32 1.5, %v93_v54 }
 0x105   :  { %v150_v58 = vpop.eup %149  ;;  %v75_v59 = vmul.f32 %v144_v45, %v74_v55  ;;  %v101_v60 = vmul.f32 %v148_v56, %v69_v46  ;;  %vm107_vm8 = vweird.f32 %v148_v56 }
 0x106   :  { %v95_v62 = vmul.f32 %v146_v48, %v94_v57  ;;  %v81_v63 = vmul.f32 %v150_v58, %v67_v47  ;;  %vm87_vm9 = vweird.f32 %v150_v58  ;;  %vm108_vm11 = vmor %vm106_vm10, %vm107_vm8 }
 0x107   :  { %v79_v0 = vsel %vm78_vm5, %v144_v45, %v75_v59  ;;  %v102_v1 = vmul.f32 %v148_v56, %v101_v60  ;;  %vm88_vm13 = vmor %vm86_vm12, %vm87_vm9 }
 0x108   :  { %v110_v3 = vmul.f32 %v79_v0, %v42_v20  ;;  %v99_v4 = vsel %vm98_vm7, %v146_v48, %v95_v62  ;;  %v82_v5 = vmul.f32 %v150_v58, %v81_v63 }
 0x109   :  { %v112_v6 = vmul.f32 %v99_v4, %v188_v19  ;;  %v103_v7 = vmul.f32 0.5, %v102_v1 }
 0x10a   :  { %v118_v8 = vmul.f32 %v139_v61, %v110_v3  ;;  %v83_v9 = vmul.f32 0.5, %v82_v5 }
 0x10b   :  { %v120_v10 = vmul.f32 %v139_v61, %v112_v6  ;;  %v104_v11 = vsub.f32 1.5, %v103_v7 }
 0x10c   :  { %v126_v12 = vadd.f32 %v140_v2, %v118_v8  ;;  %v84_v13 = vsub.f32 1.5, %v83_v9 }
 0x10d   :  { %v128_v14 = vadd.f32 %v140_v2, %v120_v10  ;;  %v105_v15 = vmul.f32 %v148_v56, %v104_v11 }
 0x10e   :  { %130 = vst.msk [vmem:[%s232_s3] sm:$0xff] %vm18_vm0, %v126_v12  ;;  %v85_v16 = vmul.f32 %v150_v58, %v84_v13 }
 0x10f   :  { %132 = vst.msk [vmem:[%s232_s3 + $0x10] sm:$0xff] %vm18_vm0, %v128_v14  ;;  %v109_v17 = vsel %vm108_vm11, %v148_v56, %v105_v15 }
 0x110   :  { %v113_v18 = vmul.f32 %v109_v17, %v194_v29  ;;  %v89_v19 = vsel %vm88_vm13, %v150_v58, %v85_v16 }
 0x111   :  { %v111_v20 = vmul.f32 %v89_v19, %v196_v30 }
 0x112   :  { %v121_v21 = vmul.f32 %v139_v61, %v113_v18 }
 0x113   :  { %v119_v22 = vmul.f32 %v139_v61, %v111_v20 }
 0x114   :  { %v129_v23 = vadd.f32 %v140_v2, %v121_v21 }
 0x115   :  { %v127_v24 = vadd.f32 %v140_v2, %v119_v22 }
 0x116   :  { %133 = vst.msk [vmem:[%s232_s3 + $0x18] sm:$0xff] %vm18_vm0, %v129_v23 }
 0x117   :  { %131 = vst.msk [vmem:[%s232_s3 + $0x8] sm:$0xff] %vm18_vm0, %v127_v24 }

// kernel: transformer_forward.46
= control target key start
LH: loop header
LB: loop body
LE: loop exit
PB: predicated region body
PF: predicated region fallthrough
CT: control target
= control target key end

     0   :  { %s610_s9 = smov 0   ;;  %s612_s10 = smov 0   ;;  %s686_s0 = inlined_call_operand.vmem [shape: bf16[2,18,32], index: 0, kind: input, shape index: {}]   ;;  %s687_s1 = inlined_call_operand.vmem [shape: bf16[96,32], index: 1, kind: input, shape index: {}]   ;;  %s688_s2 = inlined_call_operand.vmem [shape: f32[2,16,32], index: 2, kind: output, shape index: {}]  }
   0x1   :  { %s614_s11 = smov 0  }
   0x2 LB: > { %s24_s12 = sadd.s32 1, %s588_s10  ;;  %p491_p0 = scmp.ge.s32.totalorder %s592_s11, 1  ;;  %s592_s11 = sphi %s614_s11, %s12_s11   ;;  %s588_s10 = sphi %s612_s10, %s690_s10   ;;  %s584_s9 = sphi %s610_s9, %s689_s9  }
   0x3   : > { %p26_p1 = scmp.ge.s32.totalorder %s24_s12, 2  ;;  %p135_p2 = scmp.lt.s32.totalorder %s592_s11, 3 }
   0x5   : > { %s692_s12 = smov (%p26_p1, %s24_s12), 0  ;;  %p136_p3 = pnand %p491_p0, %p135_p2 }
   0x6   : > { %p164_p4 = scmp.lt.s32.totalorder (!%p136_p3), %s584_s9, 1 }
   0x7   : > { %139 = sbr.rel (%p136_p3) target bundleno = 220 (0xdc), region = 28 }
   0xc   : > { %v531_v0 = vld [vmem:[%s687_s1 + $0x8] sm:$0xff]  ;;  %v533_v2 = vld [vmem:[%s687_s1 + $0x18] sm:$0xff]  ;;  %v530_v3 = vld [vmem:[%s687_s1] sm:$0xff]  ;;  %s694_s9 = smov (!%p164_p4, %s584_s9), 1  ;;  %vm226_vm0 = vcmask 261120   ;;  %vm276_vm1 = vcmask 1046528  }
   0xd   : > { %v535_v1 = vld [vmem:[%s687_s1 + $0x28] sm:$0xff]  ;;  %264 = vmatpush.bf16.msra.mxu1 %v531_v0  ;;  %v534_v4 = vld [vmem:[%s687_s1 + $0x20] sm:$0xff]  ;;  %236 = vmatpush.bf16.msra.mxu0 %v533_v2  ;;  %v532_v5 = vld [vmem:[%s687_s1 + $0x10] sm:$0xff]  ;;  %s536_s25 = smul.u32 12, %s694_s9  ;;  %vm201_vm2 = vsmask.f32 7424 }
   0xe   : > { %301 = vmatpush.bf16.msra.mxu2 %v535_v1  ;;  %s528_s29 = sshll.u32 %s694_s9, 4 }
   0xf   : > { %s168_s28 = scalar_lea.vmem %s686_s0, %s536_s25  ;;  %s180_s4 = scalar_lea.vmem %s688_s2, %s528_s29 }
  0x10   : > { %v529_v6 = vld [vmem:[%s168_s28] sm:$0xff]  ;;  %v184_v7 = vld [vmem:[%s168_s28 + $0x8] sm:$0x1] }
  0x11   : > { %265 = vmatpush.bf16.msra.mxu1 %v530_v3  ;;  %237 = vmatpush.bf16.msra.mxu0 %v532_v5  ;;  %v198_v8 = vunpack.c.l.b16 %v184_v7  ;;  %v203_v9 = vshrl.u32 %v529_v6, 16  ;;  %v205_v10 = vshll.u32 %v529_v6, 16  ;;  %v277_v12 = vrot.slane %v529_v6, 1 }
  0x12   : > { %302 = vmatpush.bf16.msra.mxu2 %v534_v4 }
  0x13   : > { %v200_v11 = vpack.c.b16 %v198_v8, %v198_v8  ;;  %v207_v13 = vrot.slane %v205_v10, 1 }
  0x14   : > { %516 = vmatmul.msk.bf16.vlgmr.msra.gmra.mxu1 %vm226_vm0, %v529_v6 }
  0x15   : > { %v278_v14 = vrot.slane %v200_v11, 1  ;;  %v210_v15 = vshll.u32 %v200_v11, 16  ;;  %v208_v16 = vor.u32 %v207_v13, %v203_v9 }
  0x17   : > { %v279_v17 = vsel %vm276_vm1, %v277_v12, %v278_v14  ;;  %v212_v18 = vrot.slane %v210_v15, 1 }
  0x18   : > { %525 = vmatmul.msk.bf16.vlgmr.msra.gmra.mxu2 %vm226_vm0, %v279_v17 }
  0x19   : > { %v213_v19 = vsel %vm201_vm2, %v208_v16, %v212_v18  ;;  %v594_v18 = vmov -1.0  }
  0x1a   : > { %507 = vmatmul.msk.bf16.vlgmr.msra.gmra.mxu0 %vm226_vm0, %v213_v19 }
  0x91   : > { %v267_v20 = vpop.f32.mrf.mxu1 }
  0x97   : > { %v239_v21 = vpop.f32.mrf.mxu0 }
  0x98   : > { %v268_v22 = vadd.f32 %v267_v20, %v239_v21 }
  0x99   : > { %v269_v28 = vpop.f32.mrf.mxu1 }
  0x9b   : > { %v304_v23 = vpop.f32.mrf.mxu2 }
  0x9c   : > { %v655_v24 = vadd.f32 %v304_v23, %v268_v22 }
  0x9e   : > { %v658_v25 = vmul.f32 0.70710677, %v655_v24  ;;  %v311_v23 = vmul.f32 0.5, %v655_v24 }
  0x9f   : > { %v241_v26 = vpop.f32.mrf.mxu0 }
  0xa0   : > { %v319_v27 = vand.u32 2147483647, %v658_v25  ;;  %v270_v30 = vadd.f32 %v269_v28, %v241_v26  ;;  %vm315_vm11 = vcmp.ge.f32.partialorder %v658_v25, 0.0 }
  0xa1   : > { %v317_v19 = vsel %vm315_vm11, 1.0, %v594_v18 }
  0xa2   : > { %v321_v29 = vmul.f32 0.3275911, %v319_v27  ;;  %v373_v49 = vsub.f32 0.0, %v319_v27 }
  0xa3   : > { %v306_v31 = vpop.f32.mrf.mxu2 }
  0xa4   : > { %v323_v32 = vadd.f32 1.0, %v321_v29  ;;  %v661_v33 = vadd.f32 %v306_v31, %v270_v30  ;;  %v375_v55 = vmul.f32 %v373_v49, %v319_v27 }
  0xa6   : > { %562 = vrcp.f32 %v323_v32  ;;  %v664_v34 = vmul.f32 0.70710677, %v661_v33  ;;  %v336_v41 = vand.u32 2147483648, %v323_v32  ;;  %v334_v43 = vand.u32 2147483647, %v323_v32 }
  0xa7   : > { %vm330_vm4 = vweird.f32 %v323_v32  ;;  %v377_v62 = vmul.f32 1.442695, %v375_v55 }
  0xa8   : > { %v320_v35 = vand.u32 2147483647, %v664_v34  ;;  %v337_v45 = vor.u32 1.1754944e-38, %v336_v41  ;;  %vm335_vm6 = vcmp.eq.f32.partialorder %v334_v43, 8.507059e+37  ;;  %vm316_vm12 = vcmp.ge.f32.partialorder %v664_v34, 0.0 }
  0xa9   : > { %v318_v31 = vsel %vm316_vm12, 1.0, %v594_v18 }
  0xaa   : > { %v322_v36 = vmul.f32 0.3275911, %v320_v35  ;;  %v374_v2 = vsub.f32 0.0, %v320_v35 }
  0xac   : > { %v563_v37 = vpop.eup %562  ;;  %v324_v39 = vadd.f32 1.0, %v322_v36  ;;  %v376_v7 = vmul.f32 %v374_v2, %v320_v35  ;;  %v312_v35 = vmul.f32 0.5, %v661_v33 }
  0xad   : > { %v326_v38 = vmul.f32 %v563_v37, %v323_v32  ;;  %vm331_vm3 = vweird.f32 %v563_v37 }
  0xae   : > { %564 = vrcp.f32 %v324_v39  ;;  %vm332_vm5 = vmor %vm330_vm4, %vm331_vm3  ;;  %v351_v54 = vand.u32 2147483648, %v324_v39  ;;  %v349_v57 = vand.u32 2147483647, %v324_v39  ;;  %vm345_vm8 = vweird.f32 %v324_v39 }
  0xaf   : > { %v327_v40 = vsub.f32 1.0, %v326_v38  ;;  %566 = vpow2.f32 %v377_v62  ;;  %v379_v12 = vmul.f32 1.442695, %v376_v7 }
  0xb0   : > { %v352_v61 = vor.u32 1.1754944e-38, %v351_v54  ;;  %vm350_vm10 = vcmp.eq.f32.partialorder %v349_v57, 8.507059e+37 }
  0xb1   : > { %v328_v42 = vmul.f32 %v563_v37, %v327_v40  ;;  %568 = vpow2.f32 %v379_v12 }
  0xb3   : > { %v329_v44 = vadd.f32 %v563_v37, %v328_v42 }
  0xb4   : > { %v565_v46 = vpop.eup %564 }
  0xb5   : > { %v333_v47 = vsel %vm332_vm5, %v563_v37, %v329_v44  ;;  %v341_v50 = vmul.f32 %v565_v46, %v324_v39  ;;  %vm346_vm7 = vweird.f32 %v565_v46  ;;  %v567_v13 = vpop.eup %566 }
  0xb6   : > { %v338_v48 = vsel %vm335_vm6, %v337_v45, %v333_v47  ;;  %vm347_vm9 = vmor %vm345_vm8, %vm346_vm7 }
  0xb7   : > { %v355_v51 = vmul.f32 1.0614054, %v338_v48  ;;  %v342_v52 = vsub.f32 1.0, %v341_v50  ;;  %v569_v28 = vpop.eup %568 }
  0xb9   : > { %v357_v53 = vadd.f32 -1.4531521, %v355_v51  ;;  %v343_v56 = vmul.f32 %v565_v46, %v342_v52 }
  0xbb   : > { %v359_v58 = vmul.f32 %v357_v53, %v338_v48  ;;  %v344_v59 = vadd.f32 %v565_v46, %v343_v56 }
  0xbd   : > { %v361_v60 = vadd.f32 1.4214138, %v359_v58  ;;  %v348_v63 = vsel %vm347_vm9, %v565_v46, %v344_v59 }
  0xbe   : > { %v353_v1 = vsel %vm350_vm10, %v352_v61, %v348_v63 }
  0xbf   : > { %v363_v0 = vmul.f32 %v361_v60, %v338_v48  ;;  %v356_v3 = vmul.f32 1.0614054, %v353_v1 }
  0xc1   : > { %v365_v4 = vadd.f32 -0.28449672, %v363_v0  ;;  %v358_v5 = vadd.f32 -1.4531521, %v356_v3 }
  0xc3   : > { %v367_v6 = vmul.f32 %v365_v4, %v338_v48  ;;  %v360_v8 = vmul.f32 %v358_v5, %v353_v1 }
  0xc5   : > { %v369_v9 = vadd.f32 0.2548296, %v367_v6  ;;  %v362_v10 = vadd.f32 1.4214138, %v360_v8 }
  0xc7   : > { %v371_v11 = vmul.f32 %v369_v9, %v338_v48  ;;  %v364_v14 = vmul.f32 %v362_v10, %v353_v1 }
  0xc9   : > { %v381_v15 = vmul.f32 %v567_v13, %v371_v11  ;;  %v366_v16 = vadd.f32 -0.28449672, %v364_v14 }
  0xcb   : > { %v383_v17 = vsub.f32 1.0, %v381_v15  ;;  %v368_v20 = vmul.f32 %v366_v16, %v353_v1 }
  0xcd   : > { %v385_v21 = vmul.f32 %v383_v17, %v317_v19  ;;  %v370_v22 = vadd.f32 0.2548296, %v368_v20 }
  0xcf   : > { %v387_v26 = vadd.f32 1.0, %v385_v21  ;;  %v372_v27 = vmul.f32 %v370_v22, %v353_v1 }
  0xd1   : > { %v389_v25 = vmul.f32 %v387_v26, %v311_v23  ;;  %v382_v29 = vmul.f32 %v569_v28, %v372_v27 }
  0xd3   : > { %391 = vst.msk [vmem:[%s180_s4] sm:$0xff] %vm226_vm0, %v389_v25  ;;  %v384_v30 = vsub.f32 1.0, %v382_v29 }
  0xd5   : > { %v386_v32 = vmul.f32 %v384_v30, %v318_v31 }
  0xd7   : > { %v388_v36 = vadd.f32 1.0, %v386_v32 }
  0xd9   : > { %v390_v24 = vmul.f32 %v388_v36, %v312_v35 }
  0xdb   : > { %392 = vst.msk [vmem:[%s180_s4 + $0x8] sm:$0xff] %vm226_vm0, %v390_v24 }
  0xdc PF: > { %s12_s11 = sadd.s32 1, %s592_s11   ;;  %s689_s9 = smov %s588_s10 }
  0xdd   : > { %p9_p5 = scmp.ge.s32.totalorder %s12_s11, 4   ;;  %s690_s10 = smov %s692_s12 }
  0xdf   :  { %11 = sbr.rel (!%p9_p5) target bundleno = 2 (0x2), region = 61 }

// kernel: transformer_forward.48
= control target key start
LH: loop header
LB: loop body
LE: loop exit
PB: predicated region body
PF: predicated region fallthrough
CT: control target
= control target key end

     0   :  { %vm19_vm0 = vcmask 785408   ;;  %v142_v1 = vmov 0.0   ;;  %vm58_vm1 = vcmask 261120   ;;  %s202_s1 = inlined_call_operand.vmem [shape: bf16[32,96], index: 1, kind: input, shape index: {}]   ;;  %s203_s2 = inlined_call_operand.vmem [shape: f32[1,96], index: 2, kind: input, shape index: {}]   ;;  %s204_s0 = inlined_call_operand.vmem [shape: bf16[32,32], index: 0, kind: input, shape index: {}]   ;;  %s205_s3 = inlined_call_operand.vmem [shape: f32[32,96], index: 3, kind: output, shape index: {}]  }
   0x1   :  { %v137_v0 = vld [vmem:[%s202_s1 + $0x8] sm:$0xff]  ;;  %20 = vst.msk [vmem:[#allocation2] sm:$0xff] %vm19_vm0, %v142_v1  ;;  %v136_v2 = vld [vmem:[%s202_s1] sm:$0xff] }
   0x2   :  { %21 = vst.msk [vmem:[#allocation2 + $0x8] sm:$0xff] %vm19_vm0, %v142_v1  ;;  %71 = vmatpush.bf16.msra.mxu0 %v137_v0  ;;  %138 = vmatpush.bf16.msra.mxu1 %v137_v0  ;;  %v134_v3 = vld [vmem:[%s204_s0] sm:$0xff]  ;;  %v135_v4 = vld [vmem:[%s204_s0 + $0x8] sm:$0xff] }
   0x3   :  { %22 = vst.msk [vmem:[#allocation2 + $0x10] sm:$0xff] %vm19_vm0, %v142_v1  ;;  %v141_v13 = vld [vmem:[%s203_s2] ss:$0 sm:$0xff] }
   0x4   :  { %23 = vst.msk [vmem:[#allocation2 + $0x18] sm:$0xff] %vm19_vm0, %v142_v1 }
   0x6   :  { %72 = vmatpush.bf16.msra.mxu0 %v136_v2  ;;  %139 = vmatpush.bf16.msra.mxu1 %v136_v2 }
   0x8   :  { %v24_v5 = vld [vmem:[#allocation2] sm:$0xff] }
   0x9   :  { %132 = vmatmul.msk.bf16.vlgmr.msra.gmra.mxu0 %vm58_vm1, %v134_v3  ;;  %133 = vmatmul.msk.bf16.vlgmr.msra.gmra.mxu1 %vm58_vm1, %v135_v4  ;;  %v25_v11 = vld [vmem:[#allocation2 + $0x8] sm:$0xff] }
   0xa   :  { %v26_v6 = vld [vmem:[#allocation2 + $0x10] sm:$0xff] }
   0xb   :  { %v27_v12 = vld [vmem:[#allocation2 + $0x18] sm:$0xff] }
  0x86   :  { %v74_v7 = vpop.f32.mrf.mxu0  ;;  %v79_v8 = vpop.f32.mrf.mxu1 }
  0x87   :  { %v84_v9 = vadd.f32 %v74_v7, %v24_v5  ;;  %v86_v10 = vadd.f32 %v79_v8, %v26_v6 }
  0x89   :  { %89 = vst.msk [vmem:[#allocation2] sm:$0xff] %vm19_vm0, %v84_v9 }
  0x8a   :  { %91 = vst.msk [vmem:[#allocation2 + $0x10] sm:$0xff] %vm19_vm0, %v86_v10 }
  0x8e   :  { %v76_v14 = vpop.f32.mrf.mxu0  ;;  %v81_v15 = vpop.f32.mrf.mxu1 }
  0x8f   :  { %v85_v16 = vadd.f32 %v76_v14, %v25_v11  ;;  %v87_v17 = vadd.f32 %v81_v15, %v27_v12 }
  0x90   :  { %v96_v18 = vld [vmem:[#allocation2] sm:$0xff] }
  0x91   :  { %v104_v19 = vadd.f32 %v141_v13, %v96_v18  ;;  %v98_v20 = vld [vmem:[#allocation2 + $0x10] sm:$0xff]  ;;  %90 = vst.msk [vmem:[#allocation2 + $0x8] sm:$0xff] %vm19_vm0, %v85_v16 }
  0x92   :  { %v106_v21 = vadd.f32 %v141_v13, %v98_v20  ;;  %92 = vst.msk [vmem:[#allocation2 + $0x18] sm:$0xff] %vm19_vm0, %v87_v17 }
  0x93   :  { %108 = vst.msk [vmem:[%s205_s3] sm:$0xff] %vm19_vm0, %v104_v19 }
  0x94   :  { %110 = vst.msk [vmem:[%s205_s3 + $0x10] sm:$0xff] %vm19_vm0, %v106_v21 }
  0x98   :  { %v97_v22 = vld [vmem:[#allocation2 + $0x8] sm:$0xff] }
  0x99   :  { %v105_v23 = vadd.f32 %v141_v13, %v97_v22  ;;  %v99_v24 = vld [vmem:[#allocation2 + $0x18] sm:$0xff] }
  0x9a   :  { %v107_v25 = vadd.f32 %v141_v13, %v99_v24 }
  0x9b   :  { %109 = vst.msk [vmem:[%s205_s3 + $0x8] sm:$0xff] %vm19_vm0, %v105_v23 }
  0x9c   :  { %111 = vst.msk [vmem:[%s205_s3 + $0x18] sm:$0xff] %vm19_vm0, %v107_v25 }

// kernel: transformer_forward.49
= control target key start
LH: loop header
LB: loop body
LE: loop exit
PB: predicated region body
PF: predicated region fallthrough
CT: control target
= control target key end

     0   :  { %s705_s12 = smov 0   ;;  %s707_s13 = smov 0   ;;  %s774_s0 = inlined_call_operand.vmem [shape: bf16[8,16,8], index: 0, kind: input, shape index: {}]   ;;  %s775_s1 = inlined_call_operand.vmem [shape: bf16[8,16,8], index: 1, kind: input, shape index: {}]   ;;  %s776_s2 = inlined_call_operand.vmem [shape: bf16[8,16,8], index: 2, kind: input, shape index: {}]   ;;  %s777_s3 = inlined_call_operand.vmem [shape: f32[8,16,8], index: 3, kind: output, shape index: {}]  }
   0x1   :  { %s709_s14 = smov 0  }
   0x2 LB: > { %s32_s15 = sadd.s32 1, %s676_s13  ;;  %p584_p0 = scmp.ge.s32.totalorder %s680_s14, 1  ;;  %s680_s14 = sphi %s709_s14, %s13_s14   ;;  %s676_s13 = sphi %s707_s13, %s779_s13   ;;  %s672_s12 = sphi %s705_s12, %s778_s12  }
   0x3   : > { %p34_p1 = scmp.ge.s32.totalorder %s32_s15, 8  ;;  %p199_p2 = scmp.lt.s32.totalorder %s680_s14, 9 }
   0x5   : > { %s781_s15 = smov (%p34_p1, %s32_s15), 0  ;;  %p200_p3 = pnand %p584_p0, %p199_p2 }
   0x6   : > { %p250_p4 = scmp.lt.s32.totalorder (!%p200_p3), %s672_s12, 7 }
   0x7   : > { %203 = sbr.rel (%p200_p3) target bundleno = 655 (0x28f), region = 32 }
   0xc   : > { %vm299_vm0 = vcmask 64512   ;;  %v682_v0 = vmov 0.0   ;;  %s783_s12 = smov (!%p250_p4, %s672_s12), 7  ;;  %vm294_vm1 = vcmask 7168   ;;  %v683_v4 = vmov -1e+30  }
   0xd   : > { %300 = vst.msk [vmem:[#allocation4] sm:$0xff] %vm299_vm0, %v682_v0  ;;  %s728_s16 = sshll.u32 %s783_s12, 3  ;;  %vm341_vm2 = vcmask 130048   ;;  %v684_v9 = vmov 0   ;;  %s612_s26 = sshll.u32 %s783_s12, 4 }
   0xe   : > { %301 = vst.msk [vmem:[#allocation4 + $0x8] sm:$0xff] %vm299_vm0, %v682_v0  ;;  %s267_s19 = scalar_lea.vmem %s775_s1, %s728_s16  ;;  %s257_s22 = scalar_lea.vmem %s774_s0, %s728_s16  ;;  %643 = vset.pattern.permute.xlu1 %v684_v9  ;;  %644 = vset.pattern.permute.xlu0 %v684_v9 }
   0xf   : > { %v614_v1 = vld [vmem:[%s267_s19] sm:$0xff]  ;;  %295 = vst.msk [vmem:[#allocation2] sm:$0xff] %vm294_vm1, %v683_v4  ;;  %645 = vset.pattern.permute.xlu2 %v684_v9  ;;  %s277_s25 = scalar_lea.vmem %s776_s2, %s728_s16  ;;  %s287_s29 = scalar_lea.vmem %s777_s3, %s612_s26 }
  0x10   : > { %v323_v2 = vsel %vm299_vm0, %v614_v1, 0  ;;  %v613_v3 = vld [vmem:[%s257_s22] sm:$0xff]  ;;  %296 = vst.msk [vmem:[#allocation2 + $0x8] sm:$0xff] %vm294_vm1, %v683_v4 }
  0x11   : > { %332 = vmatpush.bf16.xpose.msra.mxu0 %v323_v2  ;;  %297 = vst.msk [vmem:[#allocation3] sm:$0xff] %vm294_vm1, %v682_v0  ;;  %v615_v22 = vld [vmem:[%s277_s25] sm:$0xff] }
  0x12   : > { %298 = vst.msk [vmem:[#allocation3 + $0x8] sm:$0xff] %vm294_vm1, %v682_v0  ;;  %418 = vmatpush.bf16.msra.mxu1 %v615_v22 }
  0x14   : > { %v387_v43 = vld [vmem:[#allocation4] sm:$0xff] }
  0x15   : > { %v388_v50 = vld [vmem:[#allocation4 + $0x8] sm:$0xff] }
  0x16   : > { %v339_v10 = vld [vmem:[#allocation2] sm:$0xff] }
  0x17   : > { %v340_v15 = vld [vmem:[#allocation2 + $0x8] sm:$0xff] }
  0x18   : > { %601 = vmatmul.msk.bf16.vlgmr.msra.gmra.mxu0 %vm299_vm0, %v613_v3  ;;  %v372_v34 = vld [vmem:[#allocation3] sm:$0xff] }
  0x19   : > { %v373_v38 = vld [vmem:[#allocation3 + $0x8] sm:$0xff] }
  0x95   : > { %v334_v5 = vpop.f32.mrf.mxu0 }
  0x96   : > { %v342_v6 = vsel %vm341_vm2, %v334_v5, -inf }
  0x97   : > { %343 = vmax.xlane.f32.xlu0 %v342_v6 }
  0x9d   : > { %v336_v7 = vpop.f32.mrf.mxu0 }
  0x9e   : > { %v345_v8 = vsel %vm341_vm2, %v336_v7, -inf }
  0x9f   : > { %346 = vmax.xlane.f32.xlu0 %v345_v8 }
 0x10a   : > { %v344_v11 = vpop.xlane.xlu0 %343 }
 0x10b   : > { %v348_v12 = vmax.f32 %v339_v10, %v344_v11 }
 0x10d   : > { %v350_v13 = vsub.f32 %v339_v10, %v348_v12  ;;  %429 = vst.msk [vmem:[#allocation2] sm:$0xff] %vm294_vm1, %v348_v12  ;;  %358 = vperm.xlu1 %643, %v348_v12  }
 0x10f   : > { %v352_v14 = vmul.f32 1.442695, %v350_v13 }
 0x111   : > { %646 = vpow2.f32 %v352_v14 }
 0x112   : > { %v347_v16 = vpop.xlane.xlu0 %346 }
 0x113   : > { %v349_v17 = vmax.f32 %v340_v15, %v347_v16 }
 0x115   : > { %v351_v18 = vsub.f32 %v340_v15, %v349_v17  ;;  %430 = vst.msk [vmem:[#allocation2 + $0x8] sm:$0xff] %vm294_vm1, %v349_v17  ;;  %363 = vperm.xlu1 %643, %v349_v17  }
 0x117   : > { %v647_v19 = vpop.eup %646  ;;  %v354_v20 = vmul.f32 1.442695, %v351_v18 }
 0x118   : > { %391 = vperm.xlu0 %644, %v647_v19   ;;  %v374_v35 = vmul.f32 %v647_v19, %v372_v34 }
 0x119   : > { %648 = vpow2.f32 %v354_v20 }
 0x11f   : > { %v649_v21 = vpop.eup %648 }
 0x120   : > { %396 = vperm.xlu1 %643, %v649_v21   ;;  %v375_v39 = vmul.f32 %v649_v21, %v373_v38 }
 0x17f   : > { %v359_v23 = vpop.permute.xlu1 %358 }
 0x180   : > { %v366_v24 = vsub.f32 %v334_v5, %v359_v23 }
 0x182   : > { %v368_v25 = vmul.f32 1.442695, %v366_v24 }
 0x184   : > { %650 = vpow2.f32 %v368_v25 }
 0x187   : > { %v364_v26 = vpop.permute.xlu1 %363 }
 0x188   : > { %v367_v27 = vsub.f32 %v336_v7, %v364_v26 }
 0x18a   : > { %v651_v28 = vpop.eup %650  ;;  %v370_v29 = vmul.f32 1.442695, %v367_v27  ;;  %v392_v44 = vpop.permute.xlu0 %391 }
 0x18b   : > { %v376_v30 = vsel %vm341_vm2, %v651_v28, 0.0  ;;  %v399_v46 = vmul.f32 %v392_v44, %v387_v43 }
 0x18c   : > { %652 = vpow2.f32 %v370_v29  ;;  %377 = vadd.xlane.f32.xlu2 %v376_v30 }
 0x192   : > { %v653_v31 = vpop.eup %652  ;;  %v397_v51 = vpop.permute.xlu1 %396 }
 0x193   : > { %v379_v32 = vsel %vm341_vm2, %v653_v31, 0.0  ;;  %v401_v33 = vpack.c.bf16 %v653_v31, %v651_v28  ;;  %v400_v53 = vmul.f32 %v397_v51, %v388_v50 }
 0x194   : > { %380 = vadd.xlane.f32.xlu2 %v379_v32 }
 0x195   : > { %606 = vmatmul.msk.bf16.vlgmr.msra.gmra.mxu1 %vm341_vm2, %v401_v33 }
 0x1ff   : > { %v378_v36 = vpop.xlane.xlu2 %377 }
 0x200   : > { %v382_v37 = vadd.f32 %v378_v36, %v374_v35 }
 0x202   : > { %385 = vst.msk [vmem:[#allocation3] sm:$0xff] %vm294_vm1, %v382_v37 }
 0x207   : > { %v381_v40 = vpop.xlane.xlu2 %380 }
 0x208   : > { %v383_v41 = vadd.f32 %v381_v40, %v375_v39 }
 0x209   : > { %v436_v42 = vld [vmem:[#allocation3] sm:$0xff] }
 0x20a   : > { %386 = vst.msk [vmem:[#allocation3 + $0x8] sm:$0xff] %vm294_vm1, %v383_v41  ;;  %654 = vrcp.f32 %v436_v42 }
 0x210   : > { %v655_v45 = vpop.eup %654 }
 0x211   : > { %442 = vperm.xlu2 %645, %v655_v45   ;;  %v437_v47 = vld [vmem:[#allocation3 + $0x8] sm:$0xff] }
 0x212   : > { %v420_v48 = vpop.f32.mrf.mxu1  ;;  %656 = vrcp.f32 %v437_v47 }
 0x213   : > { %v425_v49 = vadd.f32 %v420_v48, %v399_v46 }
 0x215   : > { %427 = vst.msk [vmem:[#allocation4] sm:$0xff] %vm299_vm0, %v425_v49 }
 0x218   : > { %v657_v52 = vpop.eup %656 }
 0x219   : > { %447 = vperm.xlu1 %643, %v657_v52  }
 0x21a   : > { %v422_v54 = vpop.f32.mrf.mxu1 }
 0x21b   : > { %v426_v55 = vadd.f32 %v422_v54, %v400_v53 }
 0x21c   : > { %v434_v57 = vld [vmem:[#allocation4] sm:$0xff] }
 0x21d   : > { %428 = vst.msk [vmem:[#allocation4 + $0x8] sm:$0xff] %vm299_vm0, %v426_v55 }
 0x224   : > { %v435_v59 = vld [vmem:[#allocation4 + $0x8] sm:$0xff] }
 0x26b   : > { %v443_v56 = vpop.permute.xlu2 %442 }
 0x26c   : > { %v450_v58 = vmul.f32 %v443_v56, %v434_v57 }
 0x26e   : > { %452 = vst.msk [vmem:[%s287_s29] sm:$0xff] %vm299_vm0, %v450_v58 }
 0x28b   : > { %v448_v60 = vpop.permute.xlu1 %447 }
 0x28c   : > { %v451_v61 = vmul.f32 %v448_v60, %v435_v59 }
 0x28e   : > { %453 = vst.msk [vmem:[%s287_s29 + $0x8] sm:$0xff] %vm299_vm0, %v451_v61 }
 0x28f PF: > { %s13_s14 = sadd.s32 1, %s680_s14   ;;  %s778_s12 = smov %s676_s13 }
 0x290   : > { %p10_p5 = scmp.ge.s32.totalorder %s13_s14, 10   ;;  %s779_s13 = smov %s781_s15 }
 0x292   :  { %12 = sbr.rel (!%p10_p5) target bundleno = 2 (0x2), region = 76 }

// kernel: transformer_forward.50
= control target key start
LH: loop header
LB: loop body
LE: loop exit
PB: predicated region body
PF: predicated region fallthrough
CT: control target
= control target key end

     0   :  { %vm19_vm0 = vcmask 261120   ;;  %v141_v1 = vmov 0.0   ;;  %s203_s1 = inlined_call_operand.vmem [shape: bf16[32,32], index: 1, kind: input, shape index: {}]   ;;  %s204_s2 = inlined_call_operand.vmem [shape: f32[1,32], index: 2, kind: input, shape index: {}]   ;;  %s205_s0 = inlined_call_operand.vmem [shape: bf16[32,32], index: 0, kind: input, shape index: {}]   ;;  %s206_s3 = inlined_call_operand.vmem [shape: f32[32,32], index: 3, kind: output, shape index: {}]  }
   0x1   :  { %v136_v0 = vld [vmem:[%s203_s1 + $0x8] sm:$0xff]  ;;  %20 = vst.msk [vmem:[#allocation2] sm:$0xff] %vm19_vm0, %v141_v1  ;;  %v135_v2 = vld [vmem:[%s203_s1] sm:$0xff] }
   0x2   :  { %21 = vst.msk [vmem:[#allocation2 + $0x8] sm:$0xff] %vm19_vm0, %v141_v1  ;;  %71 = vmatpush.bf16.msra.mxu0 %v136_v0  ;;  %137 = vmatpush.bf16.msra.mxu1 %v136_v0  ;;  %v133_v3 = vld [vmem:[%s205_s0] sm:$0xff]  ;;  %v134_v4 = vld [vmem:[%s205_s0 + $0x8] sm:$0xff] }
   0x3   :  { %22 = vst.msk [vmem:[#allocation2 + $0x10] sm:$0xff] %vm19_vm0, %v141_v1  ;;  %v140_v13 = vld [vmem:[%s204_s2] ss:$0 sm:$0xff] }
   0x4   :  { %23 = vst.msk [vmem:[#allocation2 + $0x18] sm:$0xff] %vm19_vm0, %v141_v1 }
   0x6   :  { %72 = vmatpush.bf16.msra.mxu0 %v135_v2  ;;  %138 = vmatpush.bf16.msra.mxu1 %v135_v2 }
   0x8   :  { %v24_v5 = vld [vmem:[#allocation2] sm:$0xff] }
   0x9   :  { %131 = vmatmul.msk.bf16.vlgmr.msra.gmra.mxu0 %vm19_vm0, %v133_v3  ;;  %132 = vmatmul.msk.bf16.vlgmr.msra.gmra.mxu1 %vm19_vm0, %v134_v4  ;;  %v25_v11 = vld [vmem:[#allocation2 + $0x8] sm:$0xff] }
   0xa   :  { %v26_v6 = vld [vmem:[#allocation2 + $0x10] sm:$0xff] }
   0xb   :  { %v27_v12 = vld [vmem:[#allocation2 + $0x18] sm:$0xff] }
  0x86   :  { %v74_v7 = vpop.f32.mrf.mxu0  ;;  %v79_v8 = vpop.f32.mrf.mxu1 }
  0x87   :  { %v84_v9 = vadd.f32 %v74_v7, %v24_v5  ;;  %v86_v10 = vadd.f32 %v79_v8, %v26_v6 }
  0x89   :  { %88 = vst.msk [vmem:[#allocation2] sm:$0xff] %vm19_vm0, %v84_v9 }
  0x8a   :  { %90 = vst.msk [vmem:[#allocation2 + $0x10] sm:$0xff] %vm19_vm0, %v86_v10 }
  0x8e   :  { %v76_v14 = vpop.f32.mrf.mxu0  ;;  %v81_v15 = vpop.f32.mrf.mxu1 }
  0x8f   :  { %v85_v16 = vadd.f32 %v76_v14, %v25_v11  ;;  %v87_v17 = vadd.f32 %v81_v15, %v27_v12 }
  0x90   :  { %v95_v18 = vld [vmem:[#allocation2] sm:$0xff] }
  0x91   :  { %v103_v19 = vadd.f32 %v140_v13, %v95_v18  ;;  %v97_v20 = vld [vmem:[#allocation2 + $0x10] sm:$0xff]  ;;  %89 = vst.msk [vmem:[#allocation2 + $0x8] sm:$0xff] %vm19_vm0, %v85_v16 }
  0x92   :  { %v105_v21 = vadd.f32 %v140_v13, %v97_v20  ;;  %91 = vst.msk [vmem:[#allocation2 + $0x18] sm:$0xff] %vm19_vm0, %v87_v17 }
  0x93   :  { %107 = vst.msk [vmem:[%s206_s3] sm:$0xff] %vm19_vm0, %v103_v19 }
  0x94   :  { %109 = vst.msk [vmem:[%s206_s3 + $0x10] sm:$0xff] %vm19_vm0, %v105_v21 }
  0x98   :  { %v96_v22 = vld [vmem:[#allocation2 + $0x8] sm:$0xff] }
  0x99   :  { %v104_v23 = vadd.f32 %v140_v13, %v96_v22  ;;  %v98_v24 = vld [vmem:[#allocation2 + $0x18] sm:$0xff] }
  0x9a   :  { %v106_v25 = vadd.f32 %v140_v13, %v98_v24 }
  0x9b   :  { %108 = vst.msk [vmem:[%s206_s3 + $0x8] sm:$0xff] %vm19_vm0, %v104_v23 }
  0x9c   :  { %110 = vst.msk [vmem:[%s206_s3 + $0x18] sm:$0xff] %vm19_vm0, %v106_v25 }

// kernel: transformer_forward.52
= control target key start
LH: loop header
LB: loop body
LE: loop exit
PB: predicated region body
PF: predicated region fallthrough
CT: control target
= control target key end

     0   :  { %vm57_vm0 = vcmask 261120   ;;  %s421_s1 = inlined_call_operand.vmem [shape: bf16[32,128], index: 1, kind: input, shape index: {}]   ;;  %s422_s2 = inlined_call_operand.vmem [shape: f32[1,128], index: 2, kind: input, shape index: {}]   ;;  %s423_s0 = inlined_call_operand.vmem [shape: bf16[32,32], index: 0, kind: input, shape index: {}]   ;;  %s424_s3 = inlined_call_operand.vmem [shape: f32[32,128], index: 3, kind: output, shape index: {}]  }
   0x1   :  { %v295_v0 = vld [vmem:[%s421_s1 + $0x8] sm:$0xff]  ;;  %v294_v1 = vld [vmem:[%s421_s1] sm:$0xff] }
   0x2   :  { %70 = vmatpush.bf16.msra.mxu0 %v295_v0  ;;  %296 = vmatpush.bf16.msra.mxu1 %v295_v0  ;;  %v292_v2 = vld [vmem:[%s423_s0] sm:$0xff]  ;;  %v293_v3 = vld [vmem:[%s423_s0 + $0x8] sm:$0xff] }
   0x3   :  { %v299_v4 = vld [vmem:[%s422_s2] ss:$0 sm:$0xff] }
   0x6   :  { %71 = vmatpush.bf16.msra.mxu0 %v294_v1  ;;  %297 = vmatpush.bf16.msra.mxu1 %v294_v1 }
   0x9   :  { %290 = vmatmul.msk.bf16.vlgmr.msra.gmra.mxu0 %vm57_vm0, %v292_v2  ;;  %291 = vmatmul.msk.bf16.vlgmr.msra.gmra.mxu1 %vm57_vm0, %v293_v3 }
  0x86   :  { %v73_v5 = vpop.f32.mrf.mxu0  ;;  %v78_v6 = vpop.f32.mrf.mxu1 }
  0x87   :  { %v352_v7 = vadd.f32 %v299_v4, %v73_v5  ;;  %v354_v8 = vadd.f32 %v299_v4, %v78_v6 }
  0x89   :  { %v357_v9 = vmul.f32 0.70710677, %v352_v7  ;;  %v360_v10 = vmul.f32 0.70710677, %v354_v8 }
  0x8b   :  { %v122_v11 = vand.u32 2147483647, %v357_v9  ;;  %v124_v12 = vand.u32 2147483647, %v360_v10 }
  0x8d   :  { %v126_v13 = vmul.f32 0.3275911, %v122_v11  ;;  %v128_v14 = vmul.f32 0.3275911, %v124_v12  ;;  %v230_v23 = vsub.f32 0.0, %v122_v11  ;;  %v232_v34 = vsub.f32 0.0, %v124_v12 }
  0x8e   :  { %v75_v15 = vpop.f32.mrf.mxu0  ;;  %v80_v16 = vpop.f32.mrf.mxu1 }
  0x8f   :  { %v130_v17 = vadd.f32 1.0, %v126_v13  ;;  %v132_v18 = vadd.f32 1.0, %v128_v14  ;;  %v364_v19 = vadd.f32 %v299_v4, %v75_v15  ;;  %v366_v20 = vadd.f32 %v299_v4, %v80_v16 }
  0x90   :  { %v234_v33 = vmul.f32 %v230_v23, %v122_v11  ;;  %v236_v49 = vmul.f32 %v232_v34, %v124_v12 }
  0x91   :  { %300 = vrcp.f32 %v130_v17  ;;  %v369_v21 = vmul.f32 0.70710677, %v364_v19  ;;  %v372_v22 = vmul.f32 0.70710677, %v366_v20  ;;  %v143_v36 = vand.u32 2147483647, %v130_v17 }
  0x92   :  { %302 = vrcp.f32 %v132_v18  ;;  %v145_v37 = vand.u32 2147483648, %v130_v17  ;;  %v175_v41 = vand.u32 2147483648, %v132_v18  ;;  %v173_v43 = vand.u32 2147483647, %v132_v18 }
  0x93   :  { %v375_v24 = vand.u32 2147483647, %v369_v21  ;;  %v378_v26 = vand.u32 2147483647, %v372_v22  ;;  %vm139_vm3 = vweird.f32 %v130_v17  ;;  %vm169_vm5 = vweird.f32 %v132_v18 }
  0x94   :  { %v146_v45 = vor.u32 1.1754944e-38, %v145_v37  ;;  %vm144_vm6 = vcmp.eq.f32.partialorder %v143_v36, 8.507059e+37  ;;  %v176_v48 = vor.u32 1.1754944e-38, %v175_v41  ;;  %v238_v51 = vmul.f32 1.442695, %v234_v33 }
  0x95   :  { %v127_v29 = vmul.f32 0.3275911, %v375_v24  ;;  %v129_v31 = vmul.f32 0.3275911, %v378_v26  ;;  %vm174_vm8 = vcmp.eq.f32.partialorder %v173_v43, 8.507059e+37  ;;  %v231_v16 = vsub.f32 0.0, %v375_v24 }
  0x96   :  { %v242_v62 = vmul.f32 1.442695, %v236_v49  ;;  %v233_v36 = vsub.f32 0.0, %v378_v26 }
  0x97   :  { %v301_v25 = vpop.eup %300  ;;  %v382_v35 = vadd.f32 1.0, %v127_v29  ;;  %v384_v39 = vadd.f32 1.0, %v129_v31 }
  0x98   :  { %v303_v27 = vpop.eup %302  ;;  %v135_v28 = vmul.f32 %v301_v25, %v130_v17  ;;  %vm140_vm1 = vweird.f32 %v301_v25 }
  0x99   :  { %v165_v30 = vmul.f32 %v303_v27, %v132_v18  ;;  %304 = vrcp.f32 %v382_v35  ;;  %vm170_vm2 = vweird.f32 %v303_v27  ;;  %vm141_vm4 = vmor %vm139_vm3, %vm140_vm1  ;;  %v158_v1 = vand.u32 2147483647, %v382_v35 }
  0x9a   :  { %v136_v32 = vsub.f32 1.0, %v135_v28  ;;  %306 = vrcp.f32 %v384_v39  ;;  %vm171_vm7 = vmor %vm169_vm5, %vm170_vm2  ;;  %v160_v2 = vand.u32 2147483648, %v382_v35  ;;  %v190_v6 = vand.u32 2147483648, %v384_v39 }
  0x9b   :  { %v166_v38 = vsub.f32 1.0, %v165_v30  ;;  %308 = vpow2.f32 %v238_v51  ;;  %v188_v13 = vand.u32 2147483647, %v384_v39  ;;  %vm154_vm11 = vweird.f32 %v382_v35 }
  0x9c   :  { %v137_v40 = vmul.f32 %v301_v25, %v136_v32  ;;  %v161_v18 = vor.u32 1.1754944e-38, %v160_v2  ;;  %vm184_vm13 = vweird.f32 %v384_v39  ;;  %vm159_vm14 = vcmp.eq.f32.partialorder %v158_v1, 8.507059e+37 }
  0x9d   :  { %v167_v42 = vmul.f32 %v303_v27, %v166_v38  ;;  %v191_v29 = vor.u32 1.1754944e-38, %v190_v6  ;;  %vm189_vm0 = vcmp.eq.f32.partialorder %v188_v13, 8.507059e+37  ;;  %310 = vpow2.f32 %v242_v62 }
  0x9e   :  { %v138_v44 = vadd.f32 %v301_v25, %v137_v40  ;;  %vm114_vm1 = vcmp.ge.f32.partialorder %v357_v9, 0.0  ;;  %vm116_vm2 = vcmp.ge.f32.partialorder %v360_v10, 0.0  ;;  %v106_v2 = vmul.f32 0.5, %v352_v7 }
  0x9f   :  { %v168_v46 = vadd.f32 %v303_v27, %v167_v42  ;;  %v305_v53 = vpop.eup %304  ;;  %v235_v42 = vmul.f32 %v231_v16, %v375_v24  ;;  %vm115_vm3 = vcmp.ge.f32.partialorder %v369_v21, 0.0 }
  0xa0   :  { %v142_v47 = vsel %vm141_vm4, %v301_v25, %v138_v44  ;;  %v307_v56 = vpop.eup %306  ;;  %v150_v58 = vmul.f32 %v305_v53, %v382_v35  ;;  %vm155_vm9 = vweird.f32 %v305_v53  ;;  %vm117_vm4 = vcmp.ge.f32.partialorder %v372_v22, 0.0 }
  0xa1   :  { %v147_v50 = vsel %vm144_vm6, %v146_v45, %v142_v47  ;;  %v172_v52 = vsel %vm171_vm7, %v303_v27, %v168_v46  ;;  %v180_v60 = vmul.f32 %v307_v56, %v384_v39  ;;  %vm185_vm10 = vweird.f32 %v307_v56  ;;  %vm156_vm12 = vmor %vm154_vm11, %vm155_vm9  ;;  %v309_v25 = vpop.eup %308 }
  0xa2   :  { %v194_v54 = vmul.f32 1.0614054, %v147_v50  ;;  %v177_v55 = vsel %vm174_vm8, %v176_v48, %v172_v52  ;;  %v151_v63 = vsub.f32 1.0, %v150_v58  ;;  %vm186_vm15 = vmor %vm184_vm13, %vm185_vm10  ;;  %v237_v46 = vmul.f32 %v233_v36, %v378_v26 }
  0xa3   :  { %v196_v57 = vmul.f32 1.0614054, %v177_v55  ;;  %v181_v3 = vsub.f32 1.0, %v180_v60  ;;  %v311_v52 = vpop.eup %310 }
  0xa4   :  { %v198_v59 = vadd.f32 -1.4531521, %v194_v54  ;;  %v152_v5 = vmul.f32 %v305_v53, %v151_v63  ;;  %v240_v54 = vmul.f32 1.442695, %v235_v42  ;;  %v244_v24 = vmul.f32 1.442695, %v237_v46 }
  0xa5   :  { %v200_v61 = vadd.f32 -1.4531521, %v196_v57  ;;  %v182_v12 = vmul.f32 %v307_v56, %v181_v3 }
  0xa6   :  { %v202_v0 = vmul.f32 %v198_v59, %v147_v50  ;;  %v153_v15 = vadd.f32 %v305_v53, %v152_v5  ;;  %312 = vpow2.f32 %v240_v54 }
  0xa7   :  { %v204_v4 = vmul.f32 %v200_v61, %v177_v55  ;;  %v183_v23 = vadd.f32 %v307_v56, %v182_v12  ;;  %v316_v61 = vmov -1.0   ;;  %314 = vpow2.f32 %v244_v24 }
  0xa8   :  { %v206_v11 = vadd.f32 1.4214138, %v202_v0  ;;  %v157_v28 = vsel %vm156_vm12, %v305_v53, %v153_v15  ;;  %v118_v62 = vsel %vm114_vm1, 1.0, %v316_v61 }
  0xa9   :  { %v208_v14 = vadd.f32 1.4214138, %v204_v4  ;;  %v162_v31 = vsel %vm159_vm14, %v161_v18, %v157_v28  ;;  %v187_v32 = vsel %vm186_vm15, %v307_v56, %v183_v23  ;;  %v108_v4 = vmul.f32 0.5, %v354_v8 }
  0xaa   :  { %v210_v17 = vmul.f32 %v206_v11, %v147_v50  ;;  %v195_v34 = vmul.f32 1.0614054, %v162_v31  ;;  %v192_v35 = vsel %vm189_vm0, %v191_v29, %v187_v32  ;;  %v119_v23 = vsel %vm115_vm3, 1.0, %v316_v61 }
  0xab   :  { %v212_v27 = vmul.f32 %v208_v14, %v177_v55  ;;  %v197_v38 = vmul.f32 1.0614054, %v192_v35  ;;  %v121_v28 = vsel %vm117_vm4, 1.0, %v316_v61  ;;  %v109_v32 = vmul.f32 0.5, %v366_v20 }
  0xac   :  { %v214_v30 = vadd.f32 -0.28449672, %v210_v17  ;;  %v199_v40 = vadd.f32 -1.4531521, %v195_v34  ;;  %v313_v15 = vpop.eup %312 }
  0xad   :  { %v216_v33 = vadd.f32 -0.28449672, %v212_v27  ;;  %v201_v43 = vadd.f32 -1.4531521, %v197_v38  ;;  %v315_v17 = vpop.eup %314 }
  0xae   :  { %v218_v37 = vmul.f32 %v214_v30, %v147_v50  ;;  %v203_v45 = vmul.f32 %v199_v40, %v162_v31  ;;  %v107_v30 = vmul.f32 0.5, %v364_v19 }
  0xaf   :  { %v220_v39 = vmul.f32 %v216_v33, %v177_v55  ;;  %v205_v48 = vmul.f32 %v201_v43, %v192_v35 }
  0xb0   :  { %v222_v41 = vadd.f32 0.2548296, %v218_v37  ;;  %v207_v51 = vadd.f32 1.4214138, %v203_v45 }
  0xb1   :  { %v224_v44 = vadd.f32 0.2548296, %v220_v39  ;;  %v209_v56 = vadd.f32 1.4214138, %v205_v48 }
  0xb2   :  { %v226_v47 = vmul.f32 %v222_v41, %v147_v50  ;;  %v211_v58 = vmul.f32 %v207_v51, %v162_v31 }
  0xb3   :  { %v228_v49 = vmul.f32 %v224_v44, %v177_v55  ;;  %v213_v60 = vmul.f32 %v209_v56, %v192_v35  ;;  %v120_v55 = vsel %vm116_vm2, 1.0, %v316_v61 }
  0xb4   :  { %v246_v53 = vmul.f32 %v309_v25, %v226_v47  ;;  %v215_v50 = vadd.f32 -0.28449672, %v211_v58 }
  0xb5   :  { %v248_v57 = vmul.f32 %v311_v52, %v228_v49  ;;  %v217_v0 = vadd.f32 -0.28449672, %v213_v60 }
  0xb6   :  { %v250_v59 = vsub.f32 1.0, %v246_v53  ;;  %v219_v9 = vmul.f32 %v215_v50, %v162_v31 }
  0xb7   :  { %v252_v26 = vsub.f32 1.0, %v248_v57  ;;  %v221_v10 = vmul.f32 %v217_v0, %v192_v35 }
  0xb8   :  { %v254_v63 = vmul.f32 %v250_v59, %v118_v62  ;;  %v223_v6 = vadd.f32 0.2548296, %v219_v9 }
  0xb9   :  { %v256_v1 = vmul.f32 %v252_v26, %v120_v55  ;;  %v225_v12 = vadd.f32 0.2548296, %v221_v10 }
  0xba   :  { %v258_v3 = vadd.f32 1.0, %v254_v63  ;;  %v227_v14 = vmul.f32 %v223_v6, %v162_v31 }
  0xbb   :  { %v260_v5 = vadd.f32 1.0, %v256_v1  ;;  %v229_v16 = vmul.f32 %v225_v12, %v192_v35 }
  0xbc   :  { %v262_v11 = vmul.f32 %v258_v3, %v106_v2  ;;  %v247_v7 = vmul.f32 %v313_v15, %v227_v14 }
  0xbd   :  { %v264_v13 = vmul.f32 %v260_v5, %v108_v4  ;;  %v249_v8 = vmul.f32 %v315_v17, %v229_v16 }
  0xbe   :  { %266 = vst [vmem:[%s424_s3] sm:$0xff] %v262_v11  ;;  %v251_v18 = vsub.f32 1.0, %v247_v7 }
  0xbf   :  { %268 = vst [vmem:[%s424_s3 + $0x10] sm:$0xff] %v264_v13  ;;  %v253_v25 = vsub.f32 1.0, %v249_v8 }
  0xc0   :  { %v255_v27 = vmul.f32 %v251_v18, %v119_v23 }
  0xc1   :  { %v257_v29 = vmul.f32 %v253_v25, %v121_v28 }
  0xc2   :  { %v259_v31 = vadd.f32 1.0, %v255_v27 }
  0xc3   :  { %v261_v33 = vadd.f32 1.0, %v257_v29 }
  0xc4   :  { %v263_v34 = vmul.f32 %v259_v31, %v107_v30 }
  0xc5   :  { %v265_v35 = vmul.f32 %v261_v33, %v109_v32 }
  0xc6   :  { %267 = vst [vmem:[%s424_s3 + $0x8] sm:$0xff] %v263_v34 }
  0xc7   :  { %269 = vst [vmem:[%s424_s3 + $0x18] sm:$0xff] %v265_v35 }

// kernel: transformer_forward.53
= control target key start
LH: loop header
LB: loop body
LE: loop exit
PB: predicated region body
PF: predicated region fallthrough
CT: control target
= control target key end

     0   :  { %vm18_vm0 = vcmask 261120   ;;  %v218_v2 = vmov 0.0   ;;  %s296_s1 = inlined_call_operand.vmem [shape: bf16[128,32], index: 1, kind: input, shape index: {}]   ;;  %s297_s2 = inlined_call_operand.vmem [shape: f32[1,32], index: 2, kind: input, shape index: {}]   ;;  %s298_s0 = inlined_call_operand.vmem [shape: bf16[32,128], index: 0, kind: input, shape index: {}]   ;;  %s299_s3 = inlined_call_operand.vmem [shape: f32[32,32], index: 3, kind: output, shape index: {}]  }
   0x1   :  { %v207_v0 = vld [vmem:[%s296_s1 + $0x38] sm:$0xff]  ;;  %v206_v1 = vld [vmem:[%s296_s1 + $0x30] sm:$0xff]  ;;  %19 = vst.msk [vmem:[#allocation2] sm:$0xff] %vm18_vm0, %v218_v2  ;;  %v205_v3 = vld [vmem:[%s296_s1 + $0x28] sm:$0xff] }
   0x2   :  { %107 = vmatpush.bf16.msra.mxu0 %v207_v0  ;;  %208 = vmatpush.bf16.msra.mxu1 %v207_v0  ;;  %20 = vst.msk [vmem:[#allocation2 + $0x8] sm:$0xff] %vm18_vm0, %v218_v2  ;;  %v204_v4 = vld [vmem:[%s296_s1 + $0x20] sm:$0xff]  ;;  %v203_v5 = vld [vmem:[%s296_s1 + $0x18] sm:$0xff]  ;;  %v202_v6 = vld [vmem:[%s296_s1 + $0x10] sm:$0xff] }
   0x3   :  { %21 = vst.msk [vmem:[#allocation2 + $0x10] sm:$0xff] %vm18_vm0, %v218_v2  ;;  %v201_v7 = vld [vmem:[%s296_s1 + $0x8] sm:$0xff]  ;;  %v200_v8 = vld [vmem:[%s296_s1] sm:$0xff] }
   0x4   :  { %22 = vst.msk [vmem:[#allocation2 + $0x18] sm:$0xff] %vm18_vm0, %v218_v2  ;;  %v198_v9 = vld [vmem:[%s298_s0] sm:$0xff]  ;;  %v199_v10 = vld [vmem:[%s298_s0 + $0x8] sm:$0xff] }
   0x5   :  { %v217_v19 = vld [vmem:[%s297_s2] ss:$0 sm:$0xff] }
   0x6   :  { %108 = vmatpush.bf16.msra.mxu0 %v206_v1  ;;  %209 = vmatpush.bf16.msra.mxu1 %v206_v1 }
   0x8   :  { %v23_v11 = vld [vmem:[#allocation2] sm:$0xff] }
   0x9   :  { %v24_v17 = vld [vmem:[#allocation2 + $0x8] sm:$0xff] }
   0xa   :  { %109 = vmatpush.bf16.msra.mxu0 %v205_v3  ;;  %210 = vmatpush.bf16.msra.mxu1 %v205_v3  ;;  %v25_v12 = vld [vmem:[#allocation2 + $0x10] sm:$0xff] }
   0xb   :  { %v26_v18 = vld [vmem:[#allocation2 + $0x18] sm:$0xff] }
   0xe   :  { %110 = vmatpush.bf16.msra.mxu0 %v204_v4  ;;  %211 = vmatpush.bf16.msra.mxu1 %v204_v4 }
  0x12   :  { %111 = vmatpush.bf16.msra.mxu0 %v203_v5  ;;  %212 = vmatpush.bf16.msra.mxu1 %v203_v5 }
  0x16   :  { %112 = vmatpush.bf16.msra.mxu0 %v202_v6  ;;  %213 = vmatpush.bf16.msra.mxu1 %v202_v6 }
  0x1a   :  { %113 = vmatpush.bf16.msra.mxu0 %v201_v7  ;;  %214 = vmatpush.bf16.msra.mxu1 %v201_v7 }
  0x1e   :  { %114 = vmatpush.bf16.msra.mxu0 %v200_v8  ;;  %215 = vmatpush.bf16.msra.mxu1 %v200_v8 }
  0x21   :  { %115 = vmatmul.bf16.vlgmr.msra.gmra.mxu0 %v198_v9  ;;  %120 = vmatmul.bf16.vlgmr.msra.gmra.mxu1 %v199_v10 }
  0x9e   :  { %v116_v13 = vpop.f32.mrf.mxu0  ;;  %v121_v14 = vpop.f32.mrf.mxu1 }
  0x9f   :  { %v126_v15 = vadd.f32 %v116_v13, %v23_v11  ;;  %v128_v16 = vadd.f32 %v121_v14, %v25_v12 }
  0xa1   :  { %131 = vst.msk [vmem:[#allocation2] sm:$0xff] %vm18_vm0, %v126_v15 }
  0xa2   :  { %133 = vst.msk [vmem:[#allocation2 + $0x10] sm:$0xff] %vm18_vm0, %v128_v16 }
  0xa6   :  { %v118_v20 = vpop.f32.mrf.mxu0  ;;  %v123_v21 = vpop.f32.mrf.mxu1 }
  0xa7   :  { %v127_v22 = vadd.f32 %v118_v20, %v24_v17  ;;  %v129_v23 = vadd.f32 %v123_v21, %v26_v18 }
  0xa8   :  { %v138_v24 = vld [vmem:[#allocation2] sm:$0xff] }
  0xa9   :  { %v146_v25 = vadd.f32 %v217_v19, %v138_v24  ;;  %v140_v26 = vld [vmem:[#allocation2 + $0x10] sm:$0xff]  ;;  %132 = vst.msk [vmem:[#allocation2 + $0x8] sm:$0xff] %vm18_vm0, %v127_v22 }
  0xaa   :  { %v148_v27 = vadd.f32 %v217_v19, %v140_v26  ;;  %134 = vst.msk [vmem:[#allocation2 + $0x18] sm:$0xff] %vm18_vm0, %v129_v23 }
  0xab   :  { %150 = vst.msk [vmem:[%s299_s3] sm:$0xff] %vm18_vm0, %v146_v25 }
  0xac   :  { %152 = vst.msk [vmem:[%s299_s3 + $0x10] sm:$0xff] %vm18_vm0, %v148_v27 }
  0xb0   :  { %v139_v28 = vld [vmem:[#allocation2 + $0x8] sm:$0xff] }
  0xb1   :  { %v147_v29 = vadd.f32 %v217_v19, %v139_v28  ;;  %v141_v30 = vld [vmem:[#allocation2 + $0x18] sm:$0xff] }
  0xb2   :  { %v149_v31 = vadd.f32 %v217_v19, %v141_v30 }
  0xb3   :  { %151 = vst.msk [vmem:[%s299_s3 + $0x8] sm:$0xff] %vm18_vm0, %v147_v29 }
  0xb4   :  { %153 = vst.msk [vmem:[%s299_s3 + $0x18] sm:$0xff] %vm18_vm0, %v149_v31 }

// kernel: transformer_forward.69
= control target key start
LH: loop header
LB: loop body
LE: loop exit
PB: predicated region body
PF: predicated region fallthrough
CT: control target
= control target key end

     0   :  { %vm19_vm0 = vcmask 523264   ;;  %v142_v1 = vmov 0.0   ;;  %vm58_vm1 = vcmask 261120   ;;  %s202_s1 = inlined_call_operand.vmem [shape: bf16[32,64], index: 1, kind: input, shape index: {}]   ;;  %s203_s2 = inlined_call_operand.vmem [shape: f32[1,64], index: 2, kind: input, shape index: {}]   ;;  %s204_s0 = inlined_call_operand.vmem [shape: bf16[32,32], index: 0, kind: input, shape index: {}]   ;;  %s205_s3 = inlined_call_operand.vmem [shape: f32[32,64], index: 3, kind: output, shape index: {}]  }
   0x1   :  { %v137_v0 = vld [vmem:[%s202_s1 + $0x8] sm:$0xff]  ;;  %20 = vst.msk [vmem:[#allocation2] sm:$0xff] %vm19_vm0, %v142_v1  ;;  %v136_v2 = vld [vmem:[%s202_s1] sm:$0xff] }
   0x2   :  { %21 = vst.msk [vmem:[#allocation2 + $0x8] sm:$0xff] %vm19_vm0, %v142_v1  ;;  %71 = vmatpush.bf16.msra.mxu0 %v137_v0  ;;  %138 = vmatpush.bf16.msra.mxu1 %v137_v0  ;;  %v134_v3 = vld [vmem:[%s204_s0] sm:$0xff]  ;;  %v135_v4 = vld [vmem:[%s204_s0 + $0x8] sm:$0xff] }
   0x3   :  { %22 = vst.msk [vmem:[#allocation2 + $0x10] sm:$0xff] %vm19_vm0, %v142_v1  ;;  %v141_v13 = vld [vmem:[%s203_s2] ss:$0 sm:$0xff] }
   0x4   :  { %23 = vst.msk [vmem:[#allocation2 + $0x18] sm:$0xff] %vm19_vm0, %v142_v1 }
   0x6   :  { %72 = vmatpush.bf16.msra.mxu0 %v136_v2  ;;  %139 = vmatpush.bf16.msra.mxu1 %v136_v2 }
   0x8   :  { %v24_v5 = vld [vmem:[#allocation2] sm:$0xff] }
   0x9   :  { %132 = vmatmul.msk.bf16.vlgmr.msra.gmra.mxu0 %vm58_vm1, %v134_v3  ;;  %133 = vmatmul.msk.bf16.vlgmr.msra.gmra.mxu1 %vm58_vm1, %v135_v4  ;;  %v25_v11 = vld [vmem:[#allocation2 + $0x8] sm:$0xff] }
   0xa   :  { %v26_v6 = vld [vmem:[#allocation2 + $0x10] sm:$0xff] }
   0xb   :  { %v27_v12 = vld [vmem:[#allocation2 + $0x18] sm:$0xff] }
  0x86   :  { %v74_v7 = vpop.f32.mrf.mxu0  ;;  %v79_v8 = vpop.f32.mrf.mxu1 }
  0x87   :  { %v84_v9 = vadd.f32 %v74_v7, %v24_v5  ;;  %v86_v10 = vadd.f32 %v79_v8, %v26_v6 }
  0x89   :  { %89 = vst.msk [vmem:[#allocation2] sm:$0xff] %vm19_vm0, %v84_v9 }
  0x8a   :  { %91 = vst.msk [vmem:[#allocation2 + $0x10] sm:$0xff] %vm19_vm0, %v86_v10 }
  0x8e   :  { %v76_v14 = vpop.f32.mrf.mxu0  ;;  %v81_v15 = vpop.f32.mrf.mxu1 }
  0x8f   :  { %v85_v16 = vadd.f32 %v76_v14, %v25_v11  ;;  %v87_v17 = vadd.f32 %v81_v15, %v27_v12 }
  0x90   :  { %v96_v18 = vld [vmem:[#allocation2] sm:$0xff] }
  0x91   :  { %v104_v19 = vadd.f32 %v141_v13, %v96_v18  ;;  %v98_v20 = vld [vmem:[#allocation2 + $0x10] sm:$0xff]  ;;  %90 = vst.msk [vmem:[#allocation2 + $0x8] sm:$0xff] %vm19_vm0, %v85_v16 }
  0x92   :  { %v106_v21 = vadd.f32 %v141_v13, %v98_v20  ;;  %92 = vst.msk [vmem:[#allocation2 + $0x18] sm:$0xff] %vm19_vm0, %v87_v17 }
  0x93   :  { %108 = vst.msk [vmem:[%s205_s3] sm:$0xff] %vm19_vm0, %v104_v19 }
  0x94   :  { %110 = vst.msk [vmem:[%s205_s3 + $0x10] sm:$0xff] %vm19_vm0, %v106_v21 }
  0x98   :  { %v97_v22 = vld [vmem:[#allocation2 + $0x8] sm:$0xff] }
  0x99   :  { %v105_v23 = vadd.f32 %v141_v13, %v97_v22  ;;  %v99_v24 = vld [vmem:[#allocation2 + $0x18] sm:$0xff] }
  0x9a   :  { %v107_v25 = vadd.f32 %v141_v13, %v99_v24 }
  0x9b   :  { %109 = vst.msk [vmem:[%s205_s3 + $0x8] sm:$0xff] %vm19_vm0, %v105_v23 }
  0x9c   :  { %111 = vst.msk [vmem:[%s205_s3 + $0x18] sm:$0xff] %vm19_vm0, %v107_v25 }

// kernel: transformer_forward.73
= control target key start
LH: loop header
LB: loop body
LE: loop exit
PB: predicated region body
PF: predicated region fallthrough
CT: control target
= control target key end

     0   :  { %vm46_vm0 = vcmask 261120   ;;  %v191_v60 = vmov -1.0   ;;  %s246_s1 = inlined_call_operand.vmem [shape: bf16[32,128], index: 1, kind: input, shape index: {}]   ;;  %s247_s2 = inlined_call_operand.vmem [shape: f32[1,128], index: 2, kind: input, shape index: {}]   ;;  %s248_s0 = inlined_call_operand.vmem [shape: bf16[16,32], index: 0, kind: input, shape index: {}]   ;;  %s249_s3 = inlined_call_operand.vmem [shape: f32[16,128], index: 3, kind: output, shape index: {}]  }
   0x1   :  { %v180_v0 = vld [vmem:[%s246_s1 + $0x8] sm:$0xff]  ;;  %v179_v1 = vld [vmem:[%s246_s1] sm:$0xff] }
   0x2   :  { %56 = vmatpush.bf16.msra.mxu0 %v180_v0  ;;  %v178_v2 = vld [vmem:[%s248_s0] sm:$0xff] }
   0x3   :  { %v182_v3 = vld [vmem:[%s247_s2] ss:$0 sm:$0xff] }
   0x6   :  { %57 = vmatpush.bf16.msra.mxu0 %v179_v1 }
   0x9   :  { %177 = vmatmul.msk.bf16.vlgmr.msra.gmra.mxu0 %vm46_vm0, %v178_v2 }
  0x86   :  { %v59_v4 = vpop.f32.mrf.mxu0 }
  0x87   :  { %v224_v5 = vadd.f32 %v182_v3, %v59_v4 }
  0x89   :  { %v227_v6 = vmul.f32 0.70710677, %v224_v5  ;;  %v79_v1 = vmul.f32 0.5, %v224_v5 }
  0x8b   :  { %v87_v7 = vand.u32 2147483647, %v227_v6  ;;  %vm83_vm9 = vcmp.ge.f32.partialorder %v227_v6, 0.0 }
  0x8c   :  { %v85_v61 = vsel %vm83_vm9, 1.0, %v191_v60 }
  0x8d   :  { %v89_v8 = vmul.f32 0.3275911, %v87_v7  ;;  %v141_v27 = vsub.f32 0.0, %v87_v7 }
  0x8e   :  { %v61_v9 = vpop.f32.mrf.mxu0 }
  0x8f   :  { %v91_v10 = vadd.f32 1.0, %v89_v8  ;;  %v230_v11 = vadd.f32 %v182_v3, %v61_v9  ;;  %v143_v33 = vmul.f32 %v141_v27, %v87_v7 }
  0x91   :  { %183 = vrcp.f32 %v91_v10  ;;  %v233_v12 = vmul.f32 0.70710677, %v230_v11  ;;  %v104_v19 = vand.u32 2147483648, %v91_v10  ;;  %v102_v21 = vand.u32 2147483647, %v91_v10 }
  0x92   :  { %vm98_vm2 = vweird.f32 %v91_v10  ;;  %v145_v40 = vmul.f32 1.442695, %v143_v33 }
  0x93   :  { %v88_v13 = vand.u32 2147483647, %v233_v12  ;;  %v105_v23 = vor.u32 1.1754944e-38, %v104_v19  ;;  %vm103_vm4 = vcmp.eq.f32.partialorder %v102_v21, 8.507059e+37  ;;  %vm84_vm10 = vcmp.ge.f32.partialorder %v233_v12, 0.0 }
  0x94   :  { %v86_v9 = vsel %vm84_vm10, 1.0, %v191_v60 }
  0x95   :  { %v90_v14 = vmul.f32 0.3275911, %v88_v13  ;;  %v142_v44 = vsub.f32 0.0, %v88_v13 }
  0x97   :  { %v184_v15 = vpop.eup %183  ;;  %v92_v17 = vadd.f32 1.0, %v90_v14  ;;  %v144_v49 = vmul.f32 %v142_v44, %v88_v13  ;;  %v80_v13 = vmul.f32 0.5, %v230_v11 }
  0x98   :  { %v94_v16 = vmul.f32 %v184_v15, %v91_v10  ;;  %vm99_vm1 = vweird.f32 %v184_v15 }
  0x99   :  { %185 = vrcp.f32 %v92_v17  ;;  %vm100_vm3 = vmor %vm98_vm2, %vm99_vm1  ;;  %v119_v32 = vand.u32 2147483648, %v92_v17  ;;  %v117_v35 = vand.u32 2147483647, %v92_v17  ;;  %vm113_vm6 = vweird.f32 %v92_v17 }
  0x9a   :  { %v95_v18 = vsub.f32 1.0, %v94_v16  ;;  %187 = vpow2.f32 %v145_v40  ;;  %v147_v54 = vmul.f32 1.442695, %v144_v49 }
  0x9b   :  { %v120_v39 = vor.u32 1.1754944e-38, %v119_v32  ;;  %vm118_vm8 = vcmp.eq.f32.partialorder %v117_v35, 8.507059e+37 }
  0x9c   :  { %v96_v20 = vmul.f32 %v184_v15, %v95_v18  ;;  %189 = vpow2.f32 %v147_v54 }
  0x9e   :  { %v97_v22 = vadd.f32 %v184_v15, %v96_v20 }
  0x9f   :  { %v186_v24 = vpop.eup %185 }
  0xa0   :  { %v101_v25 = vsel %vm100_vm3, %v184_v15, %v97_v22  ;;  %v109_v28 = vmul.f32 %v186_v24, %v92_v17  ;;  %vm114_vm5 = vweird.f32 %v186_v24  ;;  %v188_v55 = vpop.eup %187 }
  0xa1   :  { %v106_v26 = vsel %vm103_vm4, %v105_v23, %v101_v25  ;;  %vm115_vm7 = vmor %vm113_vm6, %vm114_vm5 }
  0xa2   :  { %v123_v29 = vmul.f32 1.0614054, %v106_v26  ;;  %v110_v30 = vsub.f32 1.0, %v109_v28  ;;  %v190_v4 = vpop.eup %189 }
  0xa4   :  { %v125_v31 = vadd.f32 -1.4531521, %v123_v29  ;;  %v111_v34 = vmul.f32 %v186_v24, %v110_v30 }
  0xa6   :  { %v127_v36 = vmul.f32 %v125_v31, %v106_v26  ;;  %v112_v37 = vadd.f32 %v186_v24, %v111_v34 }
  0xa8   :  { %v129_v38 = vadd.f32 1.4214138, %v127_v36  ;;  %v116_v41 = vsel %vm115_vm7, %v186_v24, %v112_v37 }
  0xa9   :  { %v121_v43 = vsel %vm118_vm8, %v120_v39, %v116_v41 }
  0xaa   :  { %v131_v42 = vmul.f32 %v129_v38, %v106_v26  ;;  %v124_v45 = vmul.f32 1.0614054, %v121_v43 }
  0xac   :  { %v133_v46 = vadd.f32 -0.28449672, %v131_v42  ;;  %v126_v47 = vadd.f32 -1.4531521, %v124_v45 }
  0xae   :  { %v135_v48 = vmul.f32 %v133_v46, %v106_v26  ;;  %v128_v50 = vmul.f32 %v126_v47, %v121_v43 }
  0xb0   :  { %v137_v51 = vadd.f32 0.2548296, %v135_v48  ;;  %v130_v52 = vadd.f32 1.4214138, %v128_v50 }
  0xb2   :  { %v139_v53 = vmul.f32 %v137_v51, %v106_v26  ;;  %v132_v56 = vmul.f32 %v130_v52, %v121_v43 }
  0xb4   :  { %v149_v57 = vmul.f32 %v188_v55, %v139_v53  ;;  %v134_v58 = vadd.f32 -0.28449672, %v132_v56 }
  0xb6   :  { %v151_v59 = vsub.f32 1.0, %v149_v57  ;;  %v136_v62 = vmul.f32 %v134_v58, %v121_v43 }
  0xb8   :  { %v153_v63 = vmul.f32 %v151_v59, %v85_v61  ;;  %v138_v0 = vadd.f32 0.2548296, %v136_v62 }
  0xba   :  { %v155_v2 = vadd.f32 1.0, %v153_v63  ;;  %v140_v3 = vmul.f32 %v138_v0, %v121_v43 }
  0xbc   :  { %v157_v7 = vmul.f32 %v155_v2, %v79_v1  ;;  %v150_v8 = vmul.f32 %v190_v4, %v140_v3 }
  0xbe   :  { %159 = vst [vmem:[%s249_s3] sm:$0xff] %v157_v7  ;;  %v152_v6 = vsub.f32 1.0, %v150_v8 }
  0xc0   :  { %v154_v10 = vmul.f32 %v152_v6, %v86_v9 }
  0xc2   :  { %v156_v14 = vadd.f32 1.0, %v154_v10 }
  0xc4   :  { %v158_v15 = vmul.f32 %v156_v14, %v80_v13 }
  0xc6   :  { %160 = vst [vmem:[%s249_s3 + $0x8] sm:$0xff] %v158_v15 }

// kernel: transformer_forward.70
= control target key start
LH: loop header
LB: loop body
LE: loop exit
PB: predicated region body
PF: predicated region fallthrough
CT: control target
= control target key end

     0   :  { %s628_s12 = smov 0   ;;  %s630_s13 = smov 0   ;;  %s684_s0 = inlined_call_operand.vmem [shape: bf16[8,8,8], index: 0, kind: input, shape index: {}]   ;;  %s685_s1 = inlined_call_operand.vmem [shape: bf16[8,16,8], index: 1, kind: input, shape index: {}]   ;;  %s686_s2 = inlined_call_operand.vmem [shape: bf16[8,16,8], index: 2, kind: input, shape index: {}]   ;;  %s687_s3 = inlined_call_operand.vmem [shape: f32[8,8,8], index: 3, kind: output, shape index: {}]  }
   0x1   :  { %s632_s14 = smov 0  }
   0x2 LB: > { %s32_s15 = sadd.s32 1, %s599_s13  ;;  %p522_p0 = scmp.ge.s32.totalorder %s603_s14, 1  ;;  %s603_s14 = sphi %s632_s14, %s13_s14   ;;  %s599_s13 = sphi %s630_s13, %s689_s13   ;;  %s595_s12 = sphi %s628_s12, %s688_s12  }
   0x3   : > { %p34_p1 = scmp.ge.s32.totalorder %s32_s15, 8  ;;  %p196_p2 = scmp.lt.s32.totalorder %s603_s14, 9 }
   0x5   : > { %s691_s15 = smov (%p34_p1, %s32_s15), 0  ;;  %p197_p3 = pnand %p522_p0, %p196_p2 }
   0x6   : > { %p242_p4 = scmp.lt.s32.totalorder (!%p197_p3), %s595_s12, 7 }
   0x7   : > { %200 = sbr.rel (%p197_p3) target bundleno = 624 (0x270), region = 32 }
   0xc   : > { %s693_s12 = smov (!%p242_p4, %s595_s12), 7  ;;  %vm284_vm0 = vcmask 64512   ;;  %vm281_vm1 = vcmask 7168   ;;  %v605_v3 = vmov -1e+30   ;;  %v323_v4 = vlaneseq }
   0xd   : > { %s646_s16 = sshll.u32 %s693_s12, 3  ;;  %s523_s20 = sshll.u32 %s693_s12, 2  ;;  %282 = vst.msk [vmem:[#allocation2] sm:$0xff] %vm281_vm1, %v605_v3  ;;  %vm334_vm3 = vcmask 130048   ;;  %v606_v11 = vmov 0   ;;  %v607_v12 = vmov 0.0  }
   0xe   : > { %s257_s19 = scalar_lea.vmem %s685_s1, %s646_s16  ;;  %s248_s23 = scalar_lea.vmem %s684_s0, %s523_s20  ;;  %v324_v5 = vand.u32 127, %v323_v4  ;;  %v328_v6 = vshrl.u32 %v323_v4, 7  ;;  %572 = vset.pattern.permute.xlu0 %v606_v11  ;;  %573 = vset.pattern.permute.xlu1 %v606_v11  ;;  %283 = vst.msk [vmem:[#allocation3] sm:$0xff] %vm281_vm1, %v607_v12 }
   0xf   : > { %v543_v0 = vld [vmem:[%s257_s19] sm:$0xff]  ;;  %574 = vset.pattern.permute.xlu2 %v606_v11  ;;  %285 = vst.msk [vmem:[#allocation4] sm:$0xff] %vm284_vm0, %v607_v12  ;;  %s267_s26 = scalar_lea.vmem %s686_s2, %s646_s16  ;;  %s275_s29 = scalar_lea.vmem %s687_s3, %s646_s16 }
  0x10   : > { %v308_v1 = vsel %vm284_vm0, %v543_v0, 0  ;;  %v293_v2 = vld [vmem:[%s248_s23] sm:$0xf]  ;;  %vm331_vm2 = vcmp.le.s32.totalorder %v324_v5, %v328_v6 }
  0x11   : > { %317 = vmatpush.bf16.xpose.msra.mxu0 %v308_v1  ;;  %v544_v17 = vld [vmem:[%s267_s26] sm:$0xff] }
  0x12   : > { %382 = vmatpush.bf16.msra.mxu1 %v544_v17 }
  0x14   : > { %v333_v13 = vld [vmem:[#allocation2] sm:$0xff] }
  0x15   : > { %v350_v26 = vld [vmem:[#allocation3] sm:$0xff] }
  0x16   : > { %v358_v34 = vld [vmem:[#allocation4] sm:$0xff] }
  0x18   : > { %533 = vmatmul.msk.bf16.vlgmr.msra.gmra.mxu0 %vm284_vm0, %v293_v2 }
  0x95   : > { %v319_v7 = vpop.f32.mrf.mxu0 }
  0x96   : > { %v332_v8 = vsel %vm331_vm2, %v319_v7, -1e+30 }
  0x97   : > { %v335_v9 = vsel %vm334_vm3, %v332_v8, -inf }
  0x98   : > { %336 = vmax.xlane.f32.xlu0 %v335_v9 }
  0x9d   : > { %v321_v10 = vpop.f32.mrf.mxu0 }
 0x10b   : > { %v337_v14 = vpop.xlane.xlu0 %336 }
 0x10c   : > { %v338_v15 = vmax.f32 %v333_v13, %v337_v14 }
 0x10e   : > { %v339_v16 = vsub.f32 %v333_v13, %v338_v15  ;;  %390 = vst.msk [vmem:[#allocation2] sm:$0xff] %vm281_vm1, %v338_v15  ;;  %344 = vperm.xlu0 %572, %v338_v15  }
 0x110   : > { %v340_v24 = vmul.f32 1.442695, %v339_v16 }
 0x180   : > { %v345_v18 = vpop.permute.xlu0 %344 }
 0x181   : > { %v347_v19 = vsub.f32 %v332_v8, %v345_v18 }
 0x183   : > { %v348_v20 = vmul.f32 1.442695, %v347_v19 }
 0x185   : > { %575 = vpow2.f32 %v348_v20 }
 0x186   : > { %577 = vpow2.f32 %v340_v24 }
 0x18b   : > { %v576_v21 = vpop.eup %575 }
 0x18c   : > { %v352_v22 = vsel %vm334_vm3, %v576_v21, 0.0  ;;  %v365_v23 = vpack.c.bf16 %v576_v21, %v576_v21  ;;  %v578_v25 = vpop.eup %577 }
 0x18d   : > { %353 = vadd.xlane.f32.xlu1 %v352_v22  ;;  %v351_v27 = vmul.f32 %v578_v25, %v350_v26 }
 0x18e   : > { %538 = vmatmul.msk.bf16.vlgmr.msra.gmra.mxu1 %vm334_vm3, %v365_v23 }
 0x1a6   : > { %361 = vperm.xlu1 %573, %v578_v25  }
 0x200   : > { %v354_v28 = vpop.xlane.xlu1 %353 }
 0x201   : > { %v355_v29 = vadd.f32 %v354_v28, %v351_v27 }
 0x203   : > { %357 = vst.msk [vmem:[#allocation3] sm:$0xff] %vm281_vm1, %v355_v29 }
 0x20a   : > { %v395_v30 = vld [vmem:[#allocation3] sm:$0xff] }
 0x20b   : > { %v384_v31 = vpop.f32.mrf.mxu1  ;;  %579 = vrcp.f32 %v395_v30 }
 0x211   : > { %v580_v32 = vpop.eup %579 }
 0x212   : > { %399 = vperm.xlu2 %574, %v580_v32  }
 0x213   : > { %v386_v33 = vpop.f32.mrf.mxu1 }
 0x218   : > { %v362_v35 = vpop.permute.xlu1 %361 }
 0x219   : > { %v364_v36 = vmul.f32 %v362_v35, %v358_v34 }
 0x21b   : > { %v388_v37 = vadd.f32 %v384_v31, %v364_v36 }
 0x21d   : > { %389 = vst.msk [vmem:[#allocation4] sm:$0xff] %vm284_vm0, %v388_v37 }
 0x224   : > { %v394_v38 = vld [vmem:[#allocation4] sm:$0xff] }
 0x26c   : > { %v400_v39 = vpop.permute.xlu2 %399 }
 0x26d   : > { %v402_v40 = vmul.f32 %v400_v39, %v394_v38 }
 0x26f   : > { %404 = vst.msk [vmem:[%s275_s29] sm:$0xff] %vm284_vm0, %v402_v40 }
 0x270 PF: > { %s13_s14 = sadd.s32 1, %s603_s14   ;;  %s688_s12 = smov %s599_s13 }
 0x271   : > { %p10_p5 = scmp.ge.s32.totalorder %s13_s14, 10   ;;  %s689_s13 = smov %s691_s15 }
 0x273   :  { %12 = sbr.rel (!%p10_p5) target bundleno = 2 (0x2), region = 80 }

// kernel: transformer_forward.74
= control target key start
LH: loop header
LB: loop body
LE: loop exit
PB: predicated region body
PF: predicated region fallthrough
CT: control target
= control target key end

     0   :  { %vm18_vm0 = vcmask 261120   ;;  %v178_v2 = vmov 0.0   ;;  %s241_s1 = inlined_call_operand.vmem [shape: bf16[128,32], index: 1, kind: input, shape index: {}]   ;;  %s242_s2 = inlined_call_operand.vmem [shape: f32[1,32], index: 2, kind: input, shape index: {}]   ;;  %s243_s0 = inlined_call_operand.vmem [shape: bf16[16,128], index: 0, kind: input, shape index: {}]   ;;  %s244_s3 = inlined_call_operand.vmem [shape: f32[16,32], index: 3, kind: output, shape index: {}]  }
   0x1   :  { %v175_v0 = vld [vmem:[%s241_s1 + $0x38] sm:$0xff]  ;;  %v174_v1 = vld [vmem:[%s241_s1 + $0x30] sm:$0xff]  ;;  %19 = vst.msk [vmem:[#allocation2] sm:$0xff] %vm18_vm0, %v178_v2  ;;  %v173_v3 = vld [vmem:[%s241_s1 + $0x28] sm:$0xff] }
   0x2   :  { %95 = vmatpush.bf16.msra.mxu0 %v175_v0  ;;  %20 = vst.msk [vmem:[#allocation2 + $0x8] sm:$0xff] %vm18_vm0, %v178_v2  ;;  %v172_v4 = vld [vmem:[%s241_s1 + $0x20] sm:$0xff]  ;;  %v171_v5 = vld [vmem:[%s241_s1 + $0x18] sm:$0xff]  ;;  %v170_v6 = vld [vmem:[%s241_s1 + $0x10] sm:$0xff] }
   0x3   :  { %v169_v7 = vld [vmem:[%s241_s1 + $0x8] sm:$0xff]  ;;  %v168_v8 = vld [vmem:[%s241_s1] sm:$0xff] }
   0x4   :  { %v167_v9 = vld [vmem:[%s243_s0] sm:$0xff] }
   0x5   :  { %v177_v14 = vld [vmem:[%s242_s2] ss:$0 sm:$0xff] }
   0x6   :  { %96 = vmatpush.bf16.msra.mxu0 %v174_v1 }
   0x8   :  { %v21_v10 = vld [vmem:[#allocation2] sm:$0xff] }
   0x9   :  { %v22_v13 = vld [vmem:[#allocation2 + $0x8] sm:$0xff] }
   0xa   :  { %97 = vmatpush.bf16.msra.mxu0 %v173_v3 }
   0xe   :  { %98 = vmatpush.bf16.msra.mxu0 %v172_v4 }
  0x12   :  { %99 = vmatpush.bf16.msra.mxu0 %v171_v5 }
  0x16   :  { %100 = vmatpush.bf16.msra.mxu0 %v170_v6 }
  0x1a   :  { %101 = vmatpush.bf16.msra.mxu0 %v169_v7 }
  0x1e   :  { %102 = vmatpush.bf16.msra.mxu0 %v168_v8 }
  0x21   :  { %103 = vmatmul.bf16.vlgmr.msra.gmra.mxu0 %v167_v9 }
  0x9e   :  { %v104_v11 = vpop.f32.mrf.mxu0 }
  0x9f   :  { %v109_v12 = vadd.f32 %v104_v11, %v21_v10 }
  0xa1   :  { %112 = vst.msk [vmem:[#allocation2] sm:$0xff] %vm18_vm0, %v109_v12 }
  0xa6   :  { %v106_v15 = vpop.f32.mrf.mxu0 }
  0xa7   :  { %v110_v16 = vadd.f32 %v106_v15, %v22_v13 }
  0xa8   :  { %v117_v17 = vld [vmem:[#allocation2] sm:$0xff] }
  0xa9   :  { %v123_v18 = vadd.f32 %v177_v14, %v117_v17  ;;  %113 = vst.msk [vmem:[#allocation2 + $0x8] sm:$0xff] %vm18_vm0, %v110_v16 }
  0xab   :  { %125 = vst.msk [vmem:[%s244_s3] sm:$0xff] %vm18_vm0, %v123_v18 }
  0xb0   :  { %v118_v19 = vld [vmem:[#allocation2 + $0x8] sm:$0xff] }
  0xb1   :  { %v124_v20 = vadd.f32 %v177_v14, %v118_v19 }
  0xb3   :  { %126 = vst.msk [vmem:[%s244_s3 + $0x8] sm:$0xff] %vm18_vm0, %v124_v20 }

// kernel: transformer_forward.89
= control target key start
LH: loop header
LB: loop body
LE: loop exit
PB: predicated region body
PF: predicated region fallthrough
CT: control target
= control target key end

     0   :  { %vm60_vm0 = vcmask 261120   ;;  %s239_s0 = inlined_call_operand.vmem [shape: bf16[16,32], index: 0, kind: input, shape index: {}]   ;;  %s240_s1 = inlined_call_operand.vmem [shape: bf16[64,32], index: 1, kind: input, shape index: {}]   ;;  %s241_s2 = inlined_call_operand.vmem [shape: f32[1,64], index: 2, kind: input, shape index: {}]   ;;  %s242_s3 = inlined_call_operand.hbm [shape: f32[16,64], index: 3, kind: output, shape index: {}]  }
   0x1   :  { %v151_v0 = vld [vmem:[%s240_s1 + $0x18] sm:$0xff] }
   0x2   :  { %8 = vsyncpa [#allocation4], 0  ;;  %v74_v1 = vsel %vm60_vm0, %v151_v0, 0  ;;  %vm20_vm1 = vcmask 523264   ;;  %v150_v2 = vld [vmem:[%s240_s1 + $0x10] sm:$0xff]  ;;  %v183_v3 = vmov 0.0  }
   0x3   :  { %80 = vmatpush.bf16.xpose.msra.mxu0 %v74_v1  ;;  %21 = vst.msk [vmem:[#allocation2] sm:$0xff] %vm20_vm1, %v183_v3  ;;  %v71_v4 = vsel %vm60_vm0, %v150_v2, 0  ;;  %v149_v5 = vld [vmem:[%s240_s1 + $0x8] sm:$0xff]  ;;  %v148_v7 = vld [vmem:[%s240_s1] sm:$0xff]  ;;  %s114_s26 = sshll.u32 %s242_s3, 4  ;;  %s186_s27 = smov 8   ;;  %s115_s26 = int_to_ptr.hbm [resolvable:$true] %s114_s26 }
   0x4   :  { %22 = vst.msk [vmem:[#allocation2 + $0x8] sm:$0xff] %vm20_vm1, %v183_v3  ;;  %v68_v6 = vsel %vm60_vm0, %v149_v5, 0  ;;  %v65_v8 = vsel %vm60_vm0, %v148_v7, 0  ;;  %v147_v9 = vld [vmem:[%s239_s0] sm:$0xff]  ;;  %s184_s0 = smov [#allocation3]  }
   0x5   :  { %v156_v14 = vld [vmem:[%s241_s2] ss:$0 sm:$0xff]  ;;  %s112_s1 = sshll.u32 %s184_s0, 4  ;;  %s185_s2 = smov 128   ;;  %s113_s1 = int_to_ptr.vmem [resolvable:$true] %s112_s1 }
   0xa   :  { %v23_v10 = vld [vmem:[#allocation2] sm:$0xff] }
   0xb   :  { %81 = vmatpush.bf16.xpose.msra.mxu0 %v71_v4  ;;  %v24_v13 = vld [vmem:[#allocation2 + $0x8] sm:$0xff] }
  0x13   :  { %82 = vmatpush.bf16.xpose.msra.mxu0 %v68_v6 }
  0x1b   :  { %83 = vmatpush.bf16.xpose.msra.mxu0 %v65_v8 }
  0x22   :  { %146 = vmatmul.msk.bf16.vlgmr.msra.gmra.mxu0 %vm60_vm0, %v147_v9 }
  0x9f   :  { %v85_v11 = vpop.f32.mrf.mxu0 }
  0xa0   :  { %v90_v12 = vadd.f32 %v85_v11, %v23_v10 }
  0xa2   :  { %93 = vst.msk [vmem:[#allocation2] sm:$0xff] %vm20_vm1, %v90_v12 }
  0xa7   :  { %v87_v15 = vpop.f32.mrf.mxu0 }
  0xa8   :  { %v91_v16 = vadd.f32 %v87_v15, %v24_v13 }
  0xa9   :  { %v98_v17 = vld [vmem:[#allocation2] sm:$0xff] }
  0xaa   :  { %94 = vst.msk [vmem:[#allocation2 + $0x8] sm:$0xff] %vm20_vm1, %v91_v16  ;;  %v104_v18 = vadd.f32 %v156_v14, %v98_v17 }
  0xac   :  { %106 = vst.msk [vmem:[#allocation3] sm:$0xff] %vm20_vm1, %v104_v18 }
  0xb1   :  { %v99_v19 = vld [vmem:[#allocation2 + $0x8] sm:$0xff] }
  0xb2   :  { %v105_v20 = vadd.f32 %v156_v14, %v99_v19 }
  0xb4   :  { %107 = vst.msk [vmem:[#allocation3 + $0x8] sm:$0xff] %vm20_vm1, %v105_v20 }
  0xb5   :  { %120 = dma.vmem_to_hbm [thread:$0]  %s113_s1, 256, %s115_s26, [#allocation4], %s185_s2, %s185_s2, %s186_s27  }
  0xb6   :  { %181 = dma.done.wait [#allocation4], 256  }
  0xb7   :  { %182 = vsyncadd [#allocation4], 4294967040 }
  0xb8   :  { %125 = vsyncpa [#allocation4], 1 }

</bundles_post_ra>
